<compile_context>
chip_gen: v7x
topology: tpu7x:2x2x1
jax: 0.10.0
libtpu: 0.0.40
codegen_flags: <defaults>
</compile_context>

<pallas_src>
import functools

import jax
import jax.numpy as jnp
import numpy as np
from jax.experimental import pallas as pl
from jax.experimental.pallas import tpu as pltpu

EPS = 1e-5           # nn.InstanceNorm2d default eps (biased variance, no affine)
LEAKY_SLOPE = 0.01   # nn.LeakyReLU default negative_slope (FC head only; conv blocks use ReLU)


def _r16(n):
    return ((n + 15) // 16) * 16


# ----------------------- host-side constant builders ----------------------- #

def _interior_mask_np(H, W):
    """(P,) float mask over a padded (H+2)x(W+2) image: 1 at real positions, 0 on the ring."""
    Wp = W + 2
    m = np.zeros(((H + 2) * Wp,), np.float32)
    for y in range(H):
        m[(y + 1) * Wp + 1:(y + 1) * Wp + 1 + W] = 1.0
    return m


def _norm_mats_np(H, W, B):
    """Block-diagonal reduction matrix M (B*P, B) with M[b*P+p, b] = interior_mask[p],
    its transpose, and the batch-tiled interior mask (1, B*P)."""
    m = _interior_mask_np(H, W)
    P = m.shape[0]
    M = np.zeros((B * P, B), np.float32)
    for b in range(B):
        M[b * P:(b + 1) * P, b] = m
    return M, np.ascontiguousarray(M.T), np.tile(m, B)[None, :]


def _pool_to_slab_np(H, W, B):
    """0/1 matrix (L, 2*Gn + B*Pn) mapping the '4-corner max' vector of this layer's padded-flat
    activation directly onto the NEXT layer's FULL activation slab (guards + per-sample padded
    layout), so one matmul + one aligned full-slab store does pool + relayout + zero-fill."""
    Hp, Wp = H + 2, W + 2
    P = Hp * Wp
    L = B * P - (Wp + 1)
    Ho, Wo = H // 2, W // 2
    Wpn = Wo + 2
    Pn = (Ho + 2) * Wpn
    Gn = Wpn + 1
    S = np.zeros((L, 2 * Gn + B * Pn), np.float32)
    for b in range(B):
        for i in range(Ho):
            for j in range(Wo):
                src = b * P + (2 * i + 1) * Wp + (2 * j + 1)   # top-left corner of 2x2 window
                dst = Gn + b * Pn + (i + 1) * Wpn + (j + 1)
                S[src, dst] = 1.0
    return S


def _pool_corner_sel_np(H, W, B):
    """(L, B, sp) 0/1 tensor: hmax lane -> (sample, pooled row-major spatial index); used to
    fuse the LAST block's pool-selection + NCHW flatten into the first FC weight."""
    Hp, Wp = H + 2, W + 2
    P = Hp * Wp
    L = B * P - (Wp + 1)
    Ho, Wo = H // 2, W // 2
    S = np.zeros((L, B, Ho * Wo), np.float32)
    for b in range(B):
        for i in range(Ho):
            for j in range(Wo):
                S[b * P + (2 * i + 1) * Wp + (2 * j + 1), b, i * Wo + j] = 1.0
    return S


# ----------------------------- parameters ---------------------------------- #

def init_params(key, input_dim=(2, 16, 16), chans=4, num_pool_layers=2,
                fc_size=32, num_fc_layers=3):
    """Deterministic synthetic parameters with exactly the shapes the PyTorch module creates
    (conv weights OIHW + bias, Linear weights stored transposed as (in, out))."""
    in_chans, H, W = input_dim
    num_actions = W
    flattened = (chans * 2 ** num_pool_layers) * (H // 2 ** num_pool_layers) * (W // 2 ** num_pool_layers)

    conv_cfg = [(in_chans, chans, 1)] + [
        (chans * 2 ** i, chans * 2 ** (i + 1), 2) for i in range(num_pool_layers)]
    fc_cfg = []
    for layer in range(num_fc_layers):
        fin = flattened if layer == 0 else fc_size
        fout = num_actions if layer + 1 == num_fc_layers else fc_size
        fc_cfg.append((fin, fout))

    keys = iter(jax.random.split(key, 2 * (len(conv_cfg) + len(fc_cfg))))
    convs = []
    for (ci, co, pool) in conv_cfg:
        w = 0.2 * jax.random.normal(next(keys), (co, ci, 3, 3), jnp.float32)   # OIHW
        b = 0.05 * jax.random.normal(next(keys), (co,), jnp.float32)
        convs.append((w, b, pool))
    fcs = []
    for (fin, fout) in fc_cfg:
        w = (1.0 / jnp.sqrt(fin)) * jax.random.normal(next(keys), (fout, fin), jnp.float32)
        b = 0.01 * jax.random.normal(next(keys), (fout,), jnp.float32)
        fcs.append((jnp.transpose(w), b))    # stored as (in, out) for x @ W
    return {"convs": convs, "fc": fcs}


# ------------------------------ fused forward ------------------------------ #

def line_conv_sampler_forward(params, image_nchw, mask, slope):
    """image: (B, C, H, W); mask: flat 0/1 (bool), numel == B * num_actions; slope: scalar.
    Returns prob_mask (B, num_actions).  (use_softplus=False, activation='leakyrelu' path.)"""
    convs = params["convs"]
    fcs = params["fc"]
    B, Cin0, H0, W0 = map(int, image_nchw.shape)
    num_actions = int(fcs[-1][0].shape[1])
    fc1_out = int(fcs[0][0].shape[1])
    n_fc = len(fcs)

    # ---- static per-conv-layer geometry (channels padded to 16 = one packed bf16 tile) ----
    cfgs = []
    H, W = H0, W0
    for (w, _b, pool) in convs:
        Cout, Cin = int(w.shape[0]), int(w.shape[1])
        assert pool in (1, 2)
        if pool == 2:
            assert H % 2 == 0 and W % 2 == 0
        Hp, Wp = H + 2, W + 2
        Ho, Wo = (H // 2, W // 2) if pool == 2 else (H, W)
        cfgs.append(dict(Cin=Cin, Cout=Cout, C16in=_r16(Cin), C16out=_r16(Cout),
                         H=H, W=W, Hp=Hp, Wp=Wp, P=Hp * Wp, G=Wp + 1,
                         pool=pool, Ho=Ho, Wo=Wo))
        H, W = Ho, Wo
    n_layers = len(cfgs)
    last = cfgs[-1]
    assert last["pool"] == 2, "last conv block is expected to max-pool (module default)"
    sp = last["Ho"] * last["Wo"]
    Cl = last["Cout"]
    assert Cl * sp == int(fcs[0][0].shape[0])
    Bfc = B * fc1_out

    # --------------------- operands (host prep on tiny tensors) --------------------- #
    operands = [jnp.asarray(slope, jnp.float32).reshape(1)]
    in_specs = [pl.BlockSpec(memory_space=pltpu.MemorySpace.SMEM)]   # SMEM scalar slope

    def add(x):
        operands.append(x)
        in_specs.append(pl.BlockSpec(memory_space=pltpu.MemorySpace.VMEM))

    # Input image -> (16, G + B*P + G) bf16 padded-flat slab (channels zero-padded to 16,
    # spatial zero ring, G guard zeros on both lane ends).
    c0 = cfgs[0]
    xp = jnp.pad(image_nchw.astype(jnp.float32),
                 ((0, 0), (0, c0["C16in"] - Cin0), (1, 1), (1, 1)))
    xf = jnp.transpose(xp, (1, 0, 2, 3)).reshape(c0["C16in"], B * c0["P"])
    add(jnp.pad(xf, ((0, 0), (c0["G"], c0["G"]))).astype(jnp.bfloat16))

    for l, ((w, _b, _pool), cfg) in enumerate(zip(convs, cfgs)):
        # NOTE: the Conv2d bias is intentionally NOT passed: InstanceNorm2d (affine=False)
        # subtracts the per-(sample, channel) mean, so a per-channel constant bias cancels
        # exactly and never affects the output.
        wt = jnp.transpose(w, (0, 2, 3, 1)).reshape(cfg["Cout"], 9, cfg["Cin"])     # tap-major
        wt = jnp.pad(wt, ((0, cfg["C16out"] - cfg["Cout"]), (0, 0),
                          (0, cfg["C16in"] - cfg["Cin"])))
        add(wt.reshape(cfg["C16out"], 9 * cfg["C16in"]).astype(jnp.bfloat16))
        M, MT, mfull = _norm_mats_np(cfg["H"], cfg["W"], B)
        add(jnp.asarray(M))
        add(jnp.asarray(MT))
        add(jnp.asarray(mfull))
        if cfg["pool"] == 2 and l + 1 < n_layers:
            add(jnp.asarray(_pool_to_slab_np(cfg["H"], cfg["W"], B)).astype(jnp.bfloat16))

    # Last block: pool-selection + NCHW flatten + FC layer 0 fused into one bf16 matrix.
    w1, b1 = fcs[0]
    sel = jnp.asarray(_pool_corner_sel_np(last["H"], last["W"], B))                 # (L, B, sp)
    fcsel = jnp.einsum('lbs,csf->lcbf', sel, w1.reshape(Cl, sp, fc1_out)).reshape(-1, Cl * Bfc)
    add(fcsel.astype(jnp.bfloat16))
    D = np.zeros((last["C16out"], Cl * Bfc), np.float32)                            # diag mask
    for c in range(Cl):
        D[c, c * Bfc:(c + 1) * Bfc] = 1.0
    add(jnp.asarray(D))
    add(jnp.asarray(np.tile(np.eye(Bfc, dtype=np.float32), (Cl, 1))))               # block-sum
    add(jnp.tile(b1.reshape(1, fc1_out), (1, B)))                                   # (1, B*fc)

    for (wf, bf) in fcs[1:]:
        add(jnp.kron(jnp.eye(B, dtype=wf.dtype), wf).astype(jnp.bfloat16))  # block-diag over batch
        add(jnp.tile(bf.reshape(1, -1), (1, B)))

    add(1.0 - mask.reshape(1, B * num_actions).astype(jnp.float32))                 # ~mask row
    n_in = len(operands)

    scratch_shapes = (
        [pltpu.VMEM((9 * c["C16in"], B * c["P"]), jnp.bfloat16) for c in cfgs]      # im2col
        + [pltpu.VMEM((c["C16in"], 2 * c["G"] + B * c["P"]), jnp.bfloat16) for c in cfgs[1:]]
    )

    def kernel(*refs):
        it = iter(refs[:n_in])
        slope_ref = next(it)
        x0_ref = next(it)
        layer_refs = []
        for l, cfg in enumerate(cfgs):
            w_r, M_r, MT_r, mf_r = next(it), next(it), next(it), next(it)
            s_r = next(it) if (cfg["pool"] == 2 and l + 1 < n_layers) else None
            layer_refs.append((w_r, M_r, MT_r, mf_r, s_r))
        fcsel_r, d_r, red_r, b1_r = next(it), next(it), next(it), next(it)
        fc_refs = [(next(it), next(it)) for _ in range(n_fc - 1)]
        notmask_r = next(it)
        out_ref = refs[n_in]
        scr = refs[n_in + 1:]
        patch_refs = list(scr[:n_layers])
        act_refs = [x0_ref] + list(scr[n_layers:])

        h = None
        # ----------------------- conv stack (all in VMEM) ----------------------- #
        for l, cfg in enumerate(cfgs):
            C16in = cfg["C16in"]
            Wp, P, G = cfg["Wp"], cfg["P"], cfg["G"]
            BP = B * P
            w_r, M_r, MT_r, mf_r, s_r = layer_refs[l]
            src, patch = act_refs[l], patch_refs[l]

            # in-kernel im2col: 9 shifted static slices of the guarded bf16 slab; each tap
            # block is one full packed-tile-aligned 16-row store.
            for t, (dy, dx) in enumerate([(dy, dx) for dy in range(3) for dx in range(3)]):
                d = (dy - 1) * Wp + (dx - 1)
                patch[t * C16in:(t + 1) * C16in, :] = src[:, G + d:G + d + BP]

            # Conv3x3(pad=1) as ONE lane-dense bf16 GEMM (f32 accumulation).
            y = jnp.dot(w_r[...], patch[...], preferred_element_type=jnp.float32)

            # InstanceNorm2d + ReLU: batched per-(sample, channel) stats via block-diagonal
            # reduction matmuls on the idle MXU; pad/guard columns come out exactly 0.
            inv_hw = 1.0 / float(cfg["H"] * cfg["W"])
            mean = jnp.dot(y, M_r[...], preferred_element_type=jnp.float32) * inv_hw
            diff = y * mf_r[...] - jnp.dot(mean, MT_r[...], preferred_element_type=jnp.float32)
            var = jnp.dot(diff * diff, M_r[...], preferred_element_type=jnp.float32) * inv_hw
            rstd = jax.lax.rsqrt(var + EPS)
            z = jnp.maximum(
                diff * jnp.dot(rstd, MT_r[...], preferred_element_type=jnp.float32), 0.0)
            # Dropout2d(p=0) is the identity.

            if cfg["pool"] == 1:
                nxt = act_refs[l + 1]
                ncfg = cfgs[l + 1]
                Gn, BPn = ncfg["G"], B * ncfg["P"]
                zg = jnp.zeros((ncfg["C16in"], Gn), jnp.bfloat16)
                nxt[:, 0:Gn] = zg                               # zero only the guard lanes
                nxt[:, Gn + BPn:2 * Gn + BPn] = zg
                nxt[:, Gn:Gn + BPn] = z.astype(jnp.bfloat16)    # pad columns are exact zeros
            else:
                # fused 2x2/stride-2 max-pool over the whole batch slab: elementwise max of
                # the 4 window corners (taps never cross a sample's padded block), then one
                # bf16 selection matmul.
                L = BP - Wp - 1
                hmax = jnp.maximum(jnp.maximum(z[:, 0:L], z[:, 1:1 + L]),
                                   jnp.maximum(z[:, Wp:Wp + L], z[:, Wp + 1:Wp + 1 + L]))
                hb = hmax.astype(jnp.bfloat16)
                if l + 1 < n_layers:
                    # selection columns already carry the next slab's guard/pad zeros -> one
                    # aligned full-slab store, no zero-init pass.
                    slab = jnp.dot(hb, s_r[...], preferred_element_type=jnp.float32)
                    act_refs[l + 1][...] = slab.astype(jnp.bfloat16)
                else:
                    # pool-selection + NCHW flatten + first FC fused into one GEMM; the channel
                    # (sublane) contraction is finished with a diag mask + block-sum matmul.
                    mid = jnp.dot(hb, fcsel_r[...], preferred_element_type=jnp.float32)
                    q = jnp.dot(mid * d_r[...], red_r[...],
                                preferred_element_type=jnp.float32)          # (C16, B*fc)
                    ones_row = jnp.ones((1, q.shape[0]), jnp.float32)
                    h = jnp.dot(ones_row, q, preferred_element_type=jnp.float32) + b1_r[...]

        # --------- FC head on the flattened-batch row (block-diagonal weights) --------- #
        for (wf_r, bf_r) in fc_refs:
            h = jnp.where(h > 0, h, LEAKY_SLOPE * h)   # nn.LeakyReLU
            # TODO(synk): activation='elu' variant not implemented (module default is leakyrelu).
            h = jnp.dot(h.astype(jnp.bfloat16), wf_r[...],
                        preferred_element_type=jnp.float32) + bf_r[...]

        # use_softplus=False (default): sigmoid(slope * out), then * ~mask.  Exact sigmoid
        # (no approx reciprocal) per the correctness review.
        # TODO(synk): use_softplus=True branch (softplus + per-row max renorm) not implemented.
        p = 1.0 / (1.0 + jnp.exp(-slope_ref[0] * h))
        out_ref[...] = p * notmask_r[...]

    out_row = pl.pallas_call(
        kernel,
        out_shape=jax.ShapeDtypeStruct((1, B * num_actions), jnp.float32),
        in_specs=in_specs,
        out_specs=pl.BlockSpec(memory_space=pltpu.MemorySpace.VMEM),
        scratch_shapes=scratch_shapes,
        compiler_params=pltpu.CompilerParams(vmem_limit_bytes=32 * 1024 * 1024),
    )(*operands)
    # (1, B*num_actions) row is batch-major -> plain reshape reproduces torch's (B, num_actions).
    return out_row.reshape(B, num_actions)


if __name__ == "__main__":
    key = jax.random.PRNGKey(0)
    k_params, k_img, k_mask = jax.random.split(key, 3)

    # small config: input_dim=(2,16,16), chans=4, num_pool_layers=2, fc_size=32
    input_dim = (2, 16, 16)
    B = 2
    params = init_params(k_params, input_dim=input_dim, chans=4,
                         num_pool_layers=2, fc_size=32, num_fc_layers=3)

    image = jax.random.normal(k_img, (B,) + input_dim, jnp.float32)    # NCHW like PyTorch
    num_actions = input_dim[-1]
    mask = jax.random.uniform(k_mask, (B * num_actions,)) < 0.3        # flat 0/1 mask

    fwd = jax.jit(functools.partial(line_conv_sampler_forward, params))
    prob_mask = jax.block_until_ready(fwd(image, mask, jnp.float32(10.0)))

    assert prob_mask.shape == (B, num_actions)
    assert bool(jnp.all(jnp.isfinite(prob_mask)))
    assert bool(jnp.all((prob_mask >= 0.0) & (prob_mask <= 1.0)))
    print("KERNEL_OK")
</pallas_src>

<mosaic_0001>
module attributes {stable_mosaic.version = 11 : i64} {
  func.func @kernel(%arg0: memref<1xf32, #tpu.memory_space<smem>>, %arg1: memref<16x686xbf16, #tpu.memory_space<vmem>>, %arg2: memref<16x144xbf16, #tpu.memory_space<vmem>>, %arg3: memref<648x2xf32, #tpu.memory_space<vmem>>, %arg4: memref<2x648xf32, #tpu.memory_space<vmem>>, %arg5: memref<1x648xf32, #tpu.memory_space<vmem>>, %arg6: memref<16x144xbf16, #tpu.memory_space<vmem>>, %arg7: memref<648x2xf32, #tpu.memory_space<vmem>>, %arg8: memref<2x648xf32, #tpu.memory_space<vmem>>, %arg9: memref<1x648xf32, #tpu.memory_space<vmem>>, %arg10: memref<629x222xbf16, #tpu.memory_space<vmem>>, %arg11: memref<16x144xbf16, #tpu.memory_space<vmem>>, %arg12: memref<200x2xf32, #tpu.memory_space<vmem>>, %arg13: memref<2x200xf32, #tpu.memory_space<vmem>>, %arg14: memref<1x200xf32, #tpu.memory_space<vmem>>, %arg15: memref<189x1024xbf16, #tpu.memory_space<vmem>>, %arg16: memref<16x1024xf32, #tpu.memory_space<vmem>>, %arg17: memref<1024x64xf32, #tpu.memory_space<vmem>>, %arg18: memref<1x64xf32, #tpu.memory_space<vmem>>, %arg19: memref<64x64xbf16, #tpu.memory_space<vmem>>, %arg20: memref<1x64xf32, #tpu.memory_space<vmem>>, %arg21: memref<64x32xbf16, #tpu.memory_space<vmem>>, %arg22: memref<1x32xf32, #tpu.memory_space<vmem>>, %arg23: memref<1x32xf32, #tpu.memory_space<vmem>>, %arg24: memref<1x32xf32, #tpu.memory_space<vmem>>, %arg25: memref<144x648xbf16, #tpu.memory_space<vmem>>, %arg26: memref<144x648xbf16, #tpu.memory_space<vmem>>, %arg27: memref<144x200xbf16, #tpu.memory_space<vmem>>, %arg28: memref<16x686xbf16, #tpu.memory_space<vmem>>, %arg29: memref<16x222xbf16, #tpu.memory_space<vmem>>) attributes {dimension_semantics = [], scalar_prefetch = 0 : i64, scratch_operands = 5 : i64, tpu.core_type = #tpu.core_type<tc>} {
    %c0 = arith.constant 0 : index
    %c0_0 = arith.constant 0 : index
    %0 = vector.load %arg1[%c0, %c0_0] : memref<16x686xbf16, #tpu.memory_space<vmem>>, vector<16x648xbf16>
    %c0_1 = arith.constant 0 : index
    %c0_2 = arith.constant 0 : index
    %1 = vector.load %arg25[%c0_1, %c0_2] : memref<144x648xbf16, #tpu.memory_space<vmem>>, vector<16x648xbf16>
    tpu.vector_store %arg25[%c0_1, %c0_2], %0 {strides = array<i32>} : memref<144x648xbf16, #tpu.memory_space<vmem>>, vector<16x648xbf16>,
    %c0_3 = arith.constant 0 : index
    %c1 = arith.constant 1 : index
    %2 = vector.load %arg1[%c0_3, %c1] : memref<16x686xbf16, #tpu.memory_space<vmem>>, vector<16x648xbf16>
    %c16 = arith.constant 16 : index
    %c0_4 = arith.constant 0 : index
    %3 = vector.load %arg25[%c16, %c0_4] : memref<144x648xbf16, #tpu.memory_space<vmem>>, vector<16x648xbf16>
    tpu.vector_store %arg25[%c16, %c0_4], %2 {strides = array<i32>} : memref<144x648xbf16, #tpu.memory_space<vmem>>, vector<16x648xbf16>,
    %c0_5 = arith.constant 0 : index
    %c2 = arith.constant 2 : index
    %4 = vector.load %arg1[%c0_5, %c2] : memref<16x686xbf16, #tpu.memory_space<vmem>>, vector<16x648xbf16>
    %c32 = arith.constant 32 : index
    %c0_6 = arith.constant 0 : index
    %5 = vector.load %arg25[%c32, %c0_6] : memref<144x648xbf16, #tpu.memory_space<vmem>>, vector<16x648xbf16>
    tpu.vector_store %arg25[%c32, %c0_6], %4 {strides = array<i32>} : memref<144x648xbf16, #tpu.memory_space<vmem>>, vector<16x648xbf16>,
    %c0_7 = arith.constant 0 : index
    %c18 = arith.constant 18 : index
    %6 = vector.load %arg1[%c0_7, %c18] : memref<16x686xbf16, #tpu.memory_space<vmem>>, vector<16x648xbf16>
    %c48 = arith.constant 48 : index
    %c0_8 = arith.constant 0 : index
    %7 = vector.load %arg25[%c48, %c0_8] : memref<144x648xbf16, #tpu.memory_space<vmem>>, vector<16x648xbf16>
    tpu.vector_store %arg25[%c48, %c0_8], %6 {strides = array<i32>} : memref<144x648xbf16, #tpu.memory_space<vmem>>, vector<16x648xbf16>,
    %c0_9 = arith.constant 0 : index
    %c19 = arith.constant 19 : index
    %8 = vector.load %arg1[%c0_9, %c19] : memref<16x686xbf16, #tpu.memory_space<vmem>>, vector<16x648xbf16>
    %c64 = arith.constant 64 : index
    %c0_10 = arith.constant 0 : index
    %9 = vector.load %arg25[%c64, %c0_10] : memref<144x648xbf16, #tpu.memory_space<vmem>>, vector<16x648xbf16>
    tpu.vector_store %arg25[%c64, %c0_10], %8 {strides = array<i32>} : memref<144x648xbf16, #tpu.memory_space<vmem>>, vector<16x648xbf16>,
    %c0_11 = arith.constant 0 : index
    %c20 = arith.constant 20 : index
    %10 = vector.load %arg1[%c0_11, %c20] : memref<16x686xbf16, #tpu.memory_space<vmem>>, vector<16x648xbf16>
    %c80 = arith.constant 80 : index
    %c0_12 = arith.constant 0 : index
    %11 = vector.load %arg25[%c80, %c0_12] : memref<144x648xbf16, #tpu.memory_space<vmem>>, vector<16x648xbf16>
    tpu.vector_store %arg25[%c80, %c0_12], %10 {strides = array<i32>} : memref<144x648xbf16, #tpu.memory_space<vmem>>, vector<16x648xbf16>,
    %c0_13 = arith.constant 0 : index
    %c36 = arith.constant 36 : index
    %12 = vector.load %arg1[%c0_13, %c36] : memref<16x686xbf16, #tpu.memory_space<vmem>>, vector<16x648xbf16>
    %c96 = arith.constant 96 : index
    %c0_14 = arith.constant 0 : index
    %13 = vector.load %arg25[%c96, %c0_14] : memref<144x648xbf16, #tpu.memory_space<vmem>>, vector<16x648xbf16>
    tpu.vector_store %arg25[%c96, %c0_14], %12 {strides = array<i32>} : memref<144x648xbf16, #tpu.memory_space<vmem>>, vector<16x648xbf16>,
    %c0_15 = arith.constant 0 : index
    %c37 = arith.constant 37 : index
    %14 = vector.load %arg1[%c0_15, %c37] : memref<16x686xbf16, #tpu.memory_space<vmem>>, vector<16x648xbf16>
    %c112 = arith.constant 112 : index
    %c0_16 = arith.constant 0 : index
    %15 = vector.load %arg25[%c112, %c0_16] : memref<144x648xbf16, #tpu.memory_space<vmem>>, vector<16x648xbf16>
    tpu.vector_store %arg25[%c112, %c0_16], %14 {strides = array<i32>} : memref<144x648xbf16, #tpu.memory_space<vmem>>, vector<16x648xbf16>,
    %c0_17 = arith.constant 0 : index
    %c38 = arith.constant 38 : index
    %16 = vector.load %arg1[%c0_17, %c38] : memref<16x686xbf16, #tpu.memory_space<vmem>>, vector<16x648xbf16>
    %c128 = arith.constant 128 : index
    %c0_18 = arith.constant 0 : index
    %17 = vector.load %arg25[%c128, %c0_18] : memref<144x648xbf16, #tpu.memory_space<vmem>>, vector<16x648xbf16>
    tpu.vector_store %arg25[%c128, %c0_18], %16 {strides = array<i32>} : memref<144x648xbf16, #tpu.memory_space<vmem>>, vector<16x648xbf16>,
    %c0_19 = arith.constant 0 : index
    %c0_20 = arith.constant 0 : index
    %18 = vector.load %arg2[%c0_19, %c0_20] : memref<16x144xbf16, #tpu.memory_space<vmem>>, vector<16x144xbf16>
    %c0_21 = arith.constant 0 : index
    %c0_22 = arith.constant 0 : index
    %19 = vector.load %arg25[%c0_21, %c0_22] : memref<144x648xbf16, #tpu.memory_space<vmem>>, vector<144x648xbf16>
    %cst = arith.constant dense<0.000000e+00> : vector<16x648xf32>
    %20 = tpu.matmul %18, %19, %cst {dimension_numbers = #tpu.dot_dimension_numbers<[1], [0], [0], [1], [0, 0, 1, 1], [], []>} : vector<16x144xbf16>, vector<144x648xbf16>, vector<16x648xf32> -> vector<16x648xf32>
    %c0_23 = arith.constant 0 : index
    %c0_24 = arith.constant 0 : index
    %21 = vector.load %arg3[%c0_23, %c0_24] : memref<648x2xf32, #tpu.memory_space<vmem>>, vector<648x2xf32>
    %cst_25 = arith.constant dense<0.000000e+00> : vector<16x2xf32>
    %22 = tpu.matmul %20, %21, %cst_25 {dimension_numbers = #tpu.dot_dimension_numbers<[1], [0], [0], [1], [0, 0, 1, 1], [], []>} : vector<16x648xf32>, vector<648x2xf32>, vector<16x2xf32> -> vector<16x2xf32>
    %cst_26 = arith.constant 3.906250e-03 : f32
    %23 = vector.broadcast %cst_26 : f32 to vector<16x2xf32>
    %24 = arith.mulf %22, %23 : vector<16x2xf32>
    %c0_27 = arith.constant 0 : index
    %c0_28 = arith.constant 0 : index
    %25 = vector.load %arg5[%c0_27, %c0_28] : memref<1x648xf32, #tpu.memory_space<vmem>>, vector<1x648xf32>
    %26 = vector.broadcast %25 : vector<1x648xf32> to vector<16x648xf32>
    %27 = arith.mulf %20, %26 : vector<16x648xf32>
    %c0_29 = arith.constant 0 : index
    %c0_30 = arith.constant 0 : index
    %28 = vector.load %arg4[%c0_29, %c0_30] : memref<2x648xf32, #tpu.memory_space<vmem>>, vector<2x648xf32>
    %cst_31 = arith.constant dense<0.000000e+00> : vector<16x648xf32>
    %29 = tpu.matmul %24, %28, %cst_31 {dimension_numbers = #tpu.dot_dimension_numbers<[1], [0], [0], [1], [0, 0, 1, 1], [], []>} : vector<16x2xf32>, vector<2x648xf32>, vector<16x648xf32> -> vector<16x648xf32>
    %30 = arith.subf %27, %29 : vector<16x648xf32>
    %31 = arith.mulf %30, %30 : vector<16x648xf32>
    %c0_32 = arith.constant 0 : index
    %c0_33 = arith.constant 0 : index
    %32 = vector.load %arg3[%c0_32, %c0_33] : memref<648x2xf32, #tpu.memory_space<vmem>>, vector<648x2xf32>
    %cst_34 = arith.constant dense<0.000000e+00> : vector<16x2xf32>
    %33 = tpu.matmul %31, %32, %cst_34 {dimension_numbers = #tpu.dot_dimension_numbers<[1], [0], [0], [1], [0, 0, 1, 1], [], []>} : vector<16x648xf32>, vector<648x2xf32>, vector<16x2xf32> -> vector<16x2xf32>
    %cst_35 = arith.constant 3.906250e-03 : f32
    %34 = vector.broadcast %cst_35 : f32 to vector<16x2xf32>
    %35 = arith.mulf %33, %34 : vector<16x2xf32>
    %cst_36 = arith.constant 9.99999974E-6 : f32
    %36 = vector.broadcast %cst_36 : f32 to vector<16x2xf32>
    %37 = arith.addf %35, %36 : vector<16x2xf32>
    %38 = math.rsqrt %37 : vector<16x2xf32>
    %c0_37 = arith.constant 0 : index
    %c0_38 = arith.constant 0 : index
    %39 = vector.load %arg4[%c0_37, %c0_38] : memref<2x648xf32, #tpu.memory_space<vmem>>, vector<2x648xf32>
    %cst_39 = arith.constant dense<0.000000e+00> : vector<16x648xf32>
    %40 = tpu.matmul %38, %39, %cst_39 {dimension_numbers = #tpu.dot_dimension_numbers<[1], [0], [0], [1], [0, 0, 1, 1], [], []>} : vector<16x2xf32>, vector<2x648xf32>, vector<16x648xf32> -> vector<16x648xf32>
    %41 = arith.mulf %30, %40 : vector<16x648xf32>
    %cst_40 = arith.constant 0.000000e+00 : f32
    %42 = vector.broadcast %cst_40 : f32 to vector<16x648xf32>
    %43 = arith.maximumf %41, %42 : vector<16x648xf32>
    %cst_41 = arith.constant 0.000000e+00 : bf16
    %44 = vector.broadcast %cst_41 : bf16 to vector<16x19xbf16>
    %c0_42 = arith.constant 0 : index
    %c0_43 = arith.constant 0 : index
    %45 = vector.load %arg28[%c0_42, %c0_43] : memref<16x686xbf16, #tpu.memory_space<vmem>>, vector<16x19xbf16>
    tpu.vector_store %arg28[%c0_42, %c0_43], %44 {strides = array<i32>} : memref<16x686xbf16, #tpu.memory_space<vmem>>, vector<16x19xbf16>,
    %c0_44 = arith.constant 0 : index
    %c667 = arith.constant 667 : index
    %46 = vector.load %arg28[%c0_44, %c667] : memref<16x686xbf16, #tpu.memory_space<vmem>>, vector<16x19xbf16>
    tpu.vector_store %arg28[%c0_44, %c667], %44 {strides = array<i32>} : memref<16x686xbf16, #tpu.memory_space<vmem>>, vector<16x19xbf16>,
    %47 = arith.truncf %43 : vector<16x648xf32> to vector<16x648xbf16>
    %c0_45 = arith.constant 0 : index
    %c19_46 = arith.constant 19 : index
    %48 = vector.load %arg28[%c0_45, %c19_46] : memref<16x686xbf16, #tpu.memory_space<vmem>>, vector<16x648xbf16>
    tpu.vector_store %arg28[%c0_45, %c19_46], %47 {strides = array<i32>} : memref<16x686xbf16, #tpu.memory_space<vmem>>, vector<16x648xbf16>,
    %c0_47 = arith.constant 0 : index
    %c0_48 = arith.constant 0 : index
    %49 = vector.load %arg28[%c0_47, %c0_48] : memref<16x686xbf16, #tpu.memory_space<vmem>>, vector<16x648xbf16>
    %c0_49 = arith.constant 0 : index
    %c0_50 = arith.constant 0 : index
    %50 = vector.load %arg26[%c0_49, %c0_50] : memref<144x648xbf16, #tpu.memory_space<vmem>>, vector<16x648xbf16>
    tpu.vector_store %arg26[%c0_49, %c0_50], %49 {strides = array<i32>} : memref<144x648xbf16, #tpu.memory_space<vmem>>, vector<16x648xbf16>,
    %c0_51 = arith.constant 0 : index
    %c1_52 = arith.constant 1 : index
    %51 = vector.load %arg28[%c0_51, %c1_52] : memref<16x686xbf16, #tpu.memory_space<vmem>>, vector<16x648xbf16>
    %c16_53 = arith.constant 16 : index
    %c0_54 = arith.constant 0 : index
    %52 = vector.load %arg26[%c16_53, %c0_54] : memref<144x648xbf16, #tpu.memory_space<vmem>>, vector<16x648xbf16>
    tpu.vector_store %arg26[%c16_53, %c0_54], %51 {strides = array<i32>} : memref<144x648xbf16, #tpu.memory_space<vmem>>, vector<16x648xbf16>,
    %c0_55 = arith.constant 0 : index
    %c2_56 = arith.constant 2 : index
    %53 = vector.load %arg28[%c0_55, %c2_56] : memref<16x686xbf16, #tpu.memory_space<vmem>>, vector<16x648xbf16>
    %c32_57 = arith.constant 32 : index
    %c0_58 = arith.constant 0 : index
    %54 = vector.load %arg26[%c32_57, %c0_58] : memref<144x648xbf16, #tpu.memory_space<vmem>>, vector<16x648xbf16>
    tpu.vector_store %arg26[%c32_57, %c0_58], %53 {strides = array<i32>} : memref<144x648xbf16, #tpu.memory_space<vmem>>, vector<16x648xbf16>,
    %c0_59 = arith.constant 0 : index
    %c18_60 = arith.constant 18 : index
    %55 = vector.load %arg28[%c0_59, %c18_60] : memref<16x686xbf16, #tpu.memory_space<vmem>>, vector<16x648xbf16>
    %c48_61 = arith.constant 48 : index
    %c0_62 = arith.constant 0 : index
    %56 = vector.load %arg26[%c48_61, %c0_62] : memref<144x648xbf16, #tpu.memory_space<vmem>>, vector<16x648xbf16>
    tpu.vector_store %arg26[%c48_61, %c0_62], %55 {strides = array<i32>} : memref<144x648xbf16, #tpu.memory_space<vmem>>, vector<16x648xbf16>,
    %c0_63 = arith.constant 0 : index
    %c19_64 = arith.constant 19 : index
    %57 = vector.load %arg28[%c0_63, %c19_64] : memref<16x686xbf16, #tpu.memory_space<vmem>>, vector<16x648xbf16>
    %c64_65 = arith.constant 64 : index
    %c0_66 = arith.constant 0 : index
    %58 = vector.load %arg26[%c64_65, %c0_66] : memref<144x648xbf16, #tpu.memory_space<vmem>>, vector<16x648xbf16>
    tpu.vector_store %arg26[%c64_65, %c0_66], %57 {strides = array<i32>} : memref<144x648xbf16, #tpu.memory_space<vmem>>, vector<16x648xbf16>,
    %c0_67 = arith.constant 0 : index
    %c20_68 = arith.constant 20 : index
    %59 = vector.load %arg28[%c0_67, %c20_68] : memref<16x686xbf16, #tpu.memory_space<vmem>>, vector<16x648xbf16>
    %c80_69 = arith.constant 80 : index
    %c0_70 = arith.constant 0 : index
    %60 = vector.load %arg26[%c80_69, %c0_70] : memref<144x648xbf16, #tpu.memory_space<vmem>>, vector<16x648xbf16>
    tpu.vector_store %arg26[%c80_69, %c0_70], %59 {strides = array<i32>} : memref<144x648xbf16, #tpu.memory_space<vmem>>, vector<16x648xbf16>,
    %c0_71 = arith.constant 0 : index
    %c36_72 = arith.constant 36 : index
    %61 = vector.load %arg28[%c0_71, %c36_72] : memref<16x686xbf16, #tpu.memory_space<vmem>>, vector<16x648xbf16>
    %c96_73 = arith.constant 96 : index
    %c0_74 = arith.constant 0 : index
    %62 = vector.load %arg26[%c96_73, %c0_74] : memref<144x648xbf16, #tpu.memory_space<vmem>>, vector<16x648xbf16>
    tpu.vector_store %arg26[%c96_73, %c0_74], %61 {strides = array<i32>} : memref<144x648xbf16, #tpu.memory_space<vmem>>, vector<16x648xbf16>,
    %c0_75 = arith.constant 0 : index
    %c37_76 = arith.constant 37 : index
    %63 = vector.load %arg28[%c0_75, %c37_76] : memref<16x686xbf16, #tpu.memory_space<vmem>>, vector<16x648xbf16>
    %c112_77 = arith.constant 112 : index
    %c0_78 = arith.constant 0 : index
    %64 = vector.load %arg26[%c112_77, %c0_78] : memref<144x648xbf16, #tpu.memory_space<vmem>>, vector<16x648xbf16>
    tpu.vector_store %arg26[%c112_77, %c0_78], %63 {strides = array<i32>} : memref<144x648xbf16, #tpu.memory_space<vmem>>, vector<16x648xbf16>,
    %c0_79 = arith.constant 0 : index
    %c38_80 = arith.constant 38 : index
    %65 = vector.load %arg28[%c0_79, %c38_80] : memref<16x686xbf16, #tpu.memory_space<vmem>>, vector<16x648xbf16>
    %c128_81 = arith.constant 128 : index
    %c0_82 = arith.constant 0 : index
    %66 = vector.load %arg26[%c128_81, %c0_82] : memref<144x648xbf16, #tpu.memory_space<vmem>>, vector<16x648xbf16>
    tpu.vector_store %arg26[%c128_81, %c0_82], %65 {strides = array<i32>} : memref<144x648xbf16, #tpu.memory_space<vmem>>, vector<16x648xbf16>,
    %c0_83 = arith.constant 0 : index
    %c0_84 = arith.constant 0 : index
    %67 = vector.load %arg6[%c0_83, %c0_84] : memref<16x144xbf16, #tpu.memory_space<vmem>>, vector<16x144xbf16>
    %c0_85 = arith.constant 0 : index
    %c0_86 = arith.constant 0 : index
    %68 = vector.load %arg26[%c0_85, %c0_86] : memref<144x648xbf16, #tpu.memory_space<vmem>>, vector<144x648xbf16>
    %cst_87 = arith.constant dense<0.000000e+00> : vector<16x648xf32>
    %69 = tpu.matmul %67, %68, %cst_87 {dimension_numbers = #tpu.dot_dimension_numbers<[1], [0], [0], [1], [0, 0, 1, 1], [], []>} : vector<16x144xbf16>, vector<144x648xbf16>, vector<16x648xf32> -> vector<16x648xf32>
    %c0_88 = arith.constant 0 : index
    %c0_89 = arith.constant 0 : index
    %70 = vector.load %arg7[%c0_88, %c0_89] : memref<648x2xf32, #tpu.memory_space<vmem>>, vector<648x2xf32>
    %cst_90 = arith.constant dense<0.000000e+00> : vector<16x2xf32>
    %71 = tpu.matmul %69, %70, %cst_90 {dimension_numbers = #tpu.dot_dimension_numbers<[1], [0], [0], [1], [0, 0, 1, 1], [], []>} : vector<16x648xf32>, vector<648x2xf32>, vector<16x2xf32> -> vector<16x2xf32>
    %cst_91 = arith.constant 3.906250e-03 : f32
    %72 = vector.broadcast %cst_91 : f32 to vector<16x2xf32>
    %73 = arith.mulf %71, %72 : vector<16x2xf32>
    %c0_92 = arith.constant 0 : index
    %c0_93 = arith.constant 0 : index
    %74 = vector.load %arg9[%c0_92, %c0_93] : memref<1x648xf32, #tpu.memory_space<vmem>>, vector<1x648xf32>
    %75 = vector.broadcast %74 : vector<1x648xf32> to vector<16x648xf32>
    %76 = arith.mulf %69, %75 : vector<16x648xf32>
    %c0_94 = arith.constant 0 : index
    %c0_95 = arith.constant 0 : index
    %77 = vector.load %arg8[%c0_94, %c0_95] : memref<2x648xf32, #tpu.memory_space<vmem>>, vector<2x648xf32>
    %cst_96 = arith.constant dense<0.000000e+00> : vector<16x648xf32>
    %78 = tpu.matmul %73, %77, %cst_96 {dimension_numbers = #tpu.dot_dimension_numbers<[1], [0], [0], [1], [0, 0, 1, 1], [], []>} : vector<16x2xf32>, vector<2x648xf32>, vector<16x648xf32> -> vector<16x648xf32>
    %79 = arith.subf %76, %78 : vector<16x648xf32>
    %80 = arith.mulf %79, %79 : vector<16x648xf32>
    %c0_97 = arith.constant 0 : index
    %c0_98 = arith.constant 0 : index
    %81 = vector.load %arg7[%c0_97, %c0_98] : memref<648x2xf32, #tpu.memory_space<vmem>>, vector<648x2xf32>
    %cst_99 = arith.constant dense<0.000000e+00> : vector<16x2xf32>
    %82 = tpu.matmul %80, %81, %cst_99 {dimension_numbers = #tpu.dot_dimension_numbers<[1], [0], [0], [1], [0, 0, 1, 1], [], []>} : vector<16x648xf32>, vector<648x2xf32>, vector<16x2xf32> -> vector<16x2xf32>
    %cst_100 = arith.constant 3.906250e-03 : f32
    %83 = vector.broadcast %cst_100 : f32 to vector<16x2xf32>
    %84 = arith.mulf %82, %83 : vector<16x2xf32>
    %cst_101 = arith.constant 9.99999974E-6 : f32
    %85 = vector.broadcast %cst_101 : f32 to vector<16x2xf32>
    %86 = arith.addf %84, %85 : vector<16x2xf32>
    %87 = math.rsqrt %86 : vector<16x2xf32>
    %c0_102 = arith.constant 0 : index
    %c0_103 = arith.constant 0 : index
    %88 = vector.load %arg8[%c0_102, %c0_103] : memref<2x648xf32, #tpu.memory_space<vmem>>, vector<2x648xf32>
    %cst_104 = arith.constant dense<0.000000e+00> : vector<16x648xf32>
    %89 = tpu.matmul %87, %88, %cst_104 {dimension_numbers = #tpu.dot_dimension_numbers<[1], [0], [0], [1], [0, 0, 1, 1], [], []>} : vector<16x2xf32>, vector<2x648xf32>, vector<16x648xf32> -> vector<16x648xf32>
    %90 = arith.mulf %79, %89 : vector<16x648xf32>
    %cst_105 = arith.constant 0.000000e+00 : f32
    %91 = vector.broadcast %cst_105 : f32 to vector<16x648xf32>
    %92 = arith.maximumf %90, %91 : vector<16x648xf32>
    %93 = vector.extract_strided_slice %92 {offsets = [0, 0], sizes = [16, 629], strides = [1, 1]} : vector<16x648xf32> to vector<16x629xf32>
    %94 = vector.extract_strided_slice %92 {offsets = [0, 1], sizes = [16, 629], strides = [1, 1]} : vector<16x648xf32> to vector<16x629xf32>
    %95 = arith.maximumf %93, %94 : vector<16x629xf32>
    %96 = vector.extract_strided_slice %92 {offsets = [0, 18], sizes = [16, 629], strides = [1, 1]} : vector<16x648xf32> to vector<16x629xf32>
    %97 = vector.extract_strided_slice %92 {offsets = [0, 19], sizes = [16, 629], strides = [1, 1]} : vector<16x648xf32> to vector<16x629xf32>
    %98 = arith.maximumf %96, %97 : vector<16x629xf32>
    %99 = arith.maximumf %95, %98 : vector<16x629xf32>
    %100 = arith.truncf %99 : vector<16x629xf32> to vector<16x629xbf16>
    %c0_106 = arith.constant 0 : index
    %c0_107 = arith.constant 0 : index
    %101 = vector.load %arg10[%c0_106, %c0_107] : memref<629x222xbf16, #tpu.memory_space<vmem>>, vector<629x222xbf16>
    %cst_108 = arith.constant dense<0.000000e+00> : vector<16x222xf32>
    %102 = tpu.matmul %100, %101, %cst_108 {dimension_numbers = #tpu.dot_dimension_numbers<[1], [0], [0], [1], [0, 0, 1, 1], [], []>} : vector<16x629xbf16>, vector<629x222xbf16>, vector<16x222xf32> -> vector<16x222xf32>
    %103 = arith.truncf %102 : vector<16x222xf32> to vector<16x222xbf16>
    %c0_109 = arith.constant 0 : index
    %c0_110 = arith.constant 0 : index
    %104 = vector.load %arg29[%c0_109, %c0_110] : memref<16x222xbf16, #tpu.memory_space<vmem>>, vector<16x222xbf16>
    tpu.vector_store %arg29[%c0_109, %c0_110], %103 {strides = array<i32>} : memref<16x222xbf16, #tpu.memory_space<vmem>>, vector<16x222xbf16>,
    %c0_111 = arith.constant 0 : index
    %c0_112 = arith.constant 0 : index
    %105 = vector.load %arg29[%c0_111, %c0_112] : memref<16x222xbf16, #tpu.memory_space<vmem>>, vector<16x200xbf16>
    %c0_113 = arith.constant 0 : index
    %c0_114 = arith.constant 0 : index
    %106 = vector.load %arg27[%c0_113, %c0_114] : memref<144x200xbf16, #tpu.memory_space<vmem>>, vector<16x200xbf16>
    tpu.vector_store %arg27[%c0_113, %c0_114], %105 {strides = array<i32>} : memref<144x200xbf16, #tpu.memory_space<vmem>>, vector<16x200xbf16>,
    %c0_115 = arith.constant 0 : index
    %c1_116 = arith.constant 1 : index
    %107 = vector.load %arg29[%c0_115, %c1_116] : memref<16x222xbf16, #tpu.memory_space<vmem>>, vector<16x200xbf16>
    %c16_117 = arith.constant 16 : index
    %c0_118 = arith.constant 0 : index
    %108 = vector.load %arg27[%c16_117, %c0_118] : memref<144x200xbf16, #tpu.memory_space<vmem>>, vector<16x200xbf16>
    tpu.vector_store %arg27[%c16_117, %c0_118], %107 {strides = array<i32>} : memref<144x200xbf16, #tpu.memory_space<vmem>>, vector<16x200xbf16>,
    %c0_119 = arith.constant 0 : index
    %c2_120 = arith.constant 2 : index
    %109 = vector.load %arg29[%c0_119, %c2_120] : memref<16x222xbf16, #tpu.memory_space<vmem>>, vector<16x200xbf16>
    %c32_121 = arith.constant 32 : index
    %c0_122 = arith.constant 0 : index
    %110 = vector.load %arg27[%c32_121, %c0_122] : memref<144x200xbf16, #tpu.memory_space<vmem>>, vector<16x200xbf16>
    tpu.vector_store %arg27[%c32_121, %c0_122], %109 {strides = array<i32>} : memref<144x200xbf16, #tpu.memory_space<vmem>>, vector<16x200xbf16>,
    %c0_123 = arith.constant 0 : index
    %c10 = arith.constant 10 : index
    %111 = vector.load %arg29[%c0_123, %c10] : memref<16x222xbf16, #tpu.memory_space<vmem>>, vector<16x200xbf16>
    %c48_124 = arith.constant 48 : index
    %c0_125 = arith.constant 0 : index
    %112 = vector.load %arg27[%c48_124, %c0_125] : memref<144x200xbf16, #tpu.memory_space<vmem>>, vector<16x200xbf16>
    tpu.vector_store %arg27[%c48_124, %c0_125], %111 {strides = array<i32>} : memref<144x200xbf16, #tpu.memory_space<vmem>>, vector<16x200xbf16>,
    %c0_126 = arith.constant 0 : index
    %c11 = arith.constant 11 : index
    %113 = vector.load %arg29[%c0_126, %c11] : memref<16x222xbf16, #tpu.memory_space<vmem>>, vector<16x200xbf16>
    %c64_127 = arith.constant 64 : index
    %c0_128 = arith.constant 0 : index
    %114 = vector.load %arg27[%c64_127, %c0_128] : memref<144x200xbf16, #tpu.memory_space<vmem>>, vector<16x200xbf16>
    tpu.vector_store %arg27[%c64_127, %c0_128], %113 {strides = array<i32>} : memref<144x200xbf16, #tpu.memory_space<vmem>>, vector<16x200xbf16>,
    %c0_129 = arith.constant 0 : index
    %c12 = arith.constant 12 : index
    %115 = vector.load %arg29[%c0_129, %c12] : memref<16x222xbf16, #tpu.memory_space<vmem>>, vector<16x200xbf16>
    %c80_130 = arith.constant 80 : index
    %c0_131 = arith.constant 0 : index
    %116 = vector.load %arg27[%c80_130, %c0_131] : memref<144x200xbf16, #tpu.memory_space<vmem>>, vector<16x200xbf16>
    tpu.vector_store %arg27[%c80_130, %c0_131], %115 {strides = array<i32>} : memref<144x200xbf16, #tpu.memory_space<vmem>>, vector<16x200xbf16>,
    %c0_132 = arith.constant 0 : index
    %c20_133 = arith.constant 20 : index
    %117 = vector.load %arg29[%c0_132, %c20_133] : memref<16x222xbf16, #tpu.memory_space<vmem>>, vector<16x200xbf16>
    %c96_134 = arith.constant 96 : index
    %c0_135 = arith.constant 0 : index
    %118 = vector.load %arg27[%c96_134, %c0_135] : memref<144x200xbf16, #tpu.memory_space<vmem>>, vector<16x200xbf16>
    tpu.vector_store %arg27[%c96_134, %c0_135], %117 {strides = array<i32>} : memref<144x200xbf16, #tpu.memory_space<vmem>>, vector<16x200xbf16>,
    %c0_136 = arith.constant 0 : index
    %c21 = arith.constant 21 : index
    %119 = vector.load %arg29[%c0_136, %c21] : memref<16x222xbf16, #tpu.memory_space<vmem>>, vector<16x200xbf16>
    %c112_137 = arith.constant 112 : index
    %c0_138 = arith.constant 0 : index
    %120 = vector.load %arg27[%c112_137, %c0_138] : memref<144x200xbf16, #tpu.memory_space<vmem>>, vector<16x200xbf16>
    tpu.vector_store %arg27[%c112_137, %c0_138], %119 {strides = array<i32>} : memref<144x200xbf16, #tpu.memory_space<vmem>>, vector<16x200xbf16>,
    %c0_139 = arith.constant 0 : index
    %c22 = arith.constant 22 : index
    %121 = vector.load %arg29[%c0_139, %c22] : memref<16x222xbf16, #tpu.memory_space<vmem>>, vector<16x200xbf16>
    %c128_140 = arith.constant 128 : index
    %c0_141 = arith.constant 0 : index
    %122 = vector.load %arg27[%c128_140, %c0_141] : memref<144x200xbf16, #tpu.memory_space<vmem>>, vector<16x200xbf16>
    tpu.vector_store %arg27[%c128_140, %c0_141], %121 {strides = array<i32>} : memref<144x200xbf16, #tpu.memory_space<vmem>>, vector<16x200xbf16>,
    %c0_142 = arith.constant 0 : index
    %c0_143 = arith.constant 0 : index
    %123 = vector.load %arg11[%c0_142, %c0_143] : memref<16x144xbf16, #tpu.memory_space<vmem>>, vector<16x144xbf16>
    %c0_144 = arith.constant 0 : index
    %c0_145 = arith.constant 0 : index
    %124 = vector.load %arg27[%c0_144, %c0_145] : memref<144x200xbf16, #tpu.memory_space<vmem>>, vector<144x200xbf16>
    %cst_146 = arith.constant dense<0.000000e+00> : vector<16x200xf32>
    %125 = tpu.matmul %123, %124, %cst_146 {dimension_numbers = #tpu.dot_dimension_numbers<[1], [0], [0], [1], [0, 0, 1, 1], [], []>} : vector<16x144xbf16>, vector<144x200xbf16>, vector<16x200xf32> -> vector<16x200xf32>
    %c0_147 = arith.constant 0 : index
    %c0_148 = arith.constant 0 : index
    %126 = vector.load %arg12[%c0_147, %c0_148] : memref<200x2xf32, #tpu.memory_space<vmem>>, vector<200x2xf32>
    %cst_149 = arith.constant dense<0.000000e+00> : vector<16x2xf32>
    %127 = tpu.matmul %125, %126, %cst_149 {dimension_numbers = #tpu.dot_dimension_numbers<[1], [0], [0], [1], [0, 0, 1, 1], [], []>} : vector<16x200xf32>, vector<200x2xf32>, vector<16x2xf32> -> vector<16x2xf32>
    %cst_150 = arith.constant 1.562500e-02 : f32
    %128 = vector.broadcast %cst_150 : f32 to vector<16x2xf32>
    %129 = arith.mulf %127, %128 : vector<16x2xf32>
    %c0_151 = arith.constant 0 : index
    %c0_152 = arith.constant 0 : index
    %130 = vector.load %arg14[%c0_151, %c0_152] : memref<1x200xf32, #tpu.memory_space<vmem>>, vector<1x200xf32>
    %131 = vector.broadcast %130 : vector<1x200xf32> to vector<16x200xf32>
    %132 = arith.mulf %125, %131 : vector<16x200xf32>
    %c0_153 = arith.constant 0 : index
    %c0_154 = arith.constant 0 : index
    %133 = vector.load %arg13[%c0_153, %c0_154] : memref<2x200xf32, #tpu.memory_space<vmem>>, vector<2x200xf32>
    %cst_155 = arith.constant dense<0.000000e+00> : vector<16x200xf32>
    %134 = tpu.matmul %129, %133, %cst_155 {dimension_numbers = #tpu.dot_dimension_numbers<[1], [0], [0], [1], [0, 0, 1, 1], [], []>} : vector<16x2xf32>, vector<2x200xf32>, vector<16x200xf32> -> vector<16x200xf32>
    %135 = arith.subf %132, %134 : vector<16x200xf32>
    %136 = arith.mulf %135, %135 : vector<16x200xf32>
    %c0_156 = arith.constant 0 : index
    %c0_157 = arith.constant 0 : index
    %137 = vector.load %arg12[%c0_156, %c0_157] : memref<200x2xf32, #tpu.memory_space<vmem>>, vector<200x2xf32>
    %cst_158 = arith.constant dense<0.000000e+00> : vector<16x2xf32>
    %138 = tpu.matmul %136, %137, %cst_158 {dimension_numbers = #tpu.dot_dimension_numbers<[1], [0], [0], [1], [0, 0, 1, 1], [], []>} : vector<16x200xf32>, vector<200x2xf32>, vector<16x2xf32> -> vector<16x2xf32>
    %cst_159 = arith.constant 1.562500e-02 : f32
    %139 = vector.broadcast %cst_159 : f32 to vector<16x2xf32>
    %140 = arith.mulf %138, %139 : vector<16x2xf32>
    %cst_160 = arith.constant 9.99999974E-6 : f32
    %141 = vector.broadcast %cst_160 : f32 to vector<16x2xf32>
    %142 = arith.addf %140, %141 : vector<16x2xf32>
    %143 = math.rsqrt %142 : vector<16x2xf32>
    %c0_161 = arith.constant 0 : index
    %c0_162 = arith.constant 0 : index
    %144 = vector.load %arg13[%c0_161, %c0_162] : memref<2x200xf32, #tpu.memory_space<vmem>>, vector<2x200xf32>
    %cst_163 = arith.constant dense<0.000000e+00> : vector<16x200xf32>
    %145 = tpu.matmul %143, %144, %cst_163 {dimension_numbers = #tpu.dot_dimension_numbers<[1], [0], [0], [1], [0, 0, 1, 1], [], []>} : vector<16x2xf32>, vector<2x200xf32>, vector<16x200xf32> -> vector<16x200xf32>
    %146 = arith.mulf %135, %145 : vector<16x200xf32>
    %cst_164 = arith.constant 0.000000e+00 : f32
    %147 = vector.broadcast %cst_164 : f32 to vector<16x200xf32>
    %148 = arith.maximumf %146, %147 : vector<16x200xf32>
    %149 = vector.extract_strided_slice %148 {offsets = [0, 0], sizes = [16, 189], strides = [1, 1]} : vector<16x200xf32> to vector<16x189xf32>
    %150 = vector.extract_strided_slice %148 {offsets = [0, 1], sizes = [16, 189], strides = [1, 1]} : vector<16x200xf32> to vector<16x189xf32>
    %151 = arith.maximumf %149, %150 : vector<16x189xf32>
    %152 = vector.extract_strided_slice %148 {offsets = [0, 10], sizes = [16, 189], strides = [1, 1]} : vector<16x200xf32> to vector<16x189xf32>
    %153 = vector.extract_strided_slice %148 {offsets = [0, 11], sizes = [16, 189], strides = [1, 1]} : vector<16x200xf32> to vector<16x189xf32>
    %154 = arith.maximumf %152, %153 : vector<16x189xf32>
    %155 = arith.maximumf %151, %154 : vector<16x189xf32>
    %156 = arith.truncf %155 : vector<16x189xf32> to vector<16x189xbf16>
    %c0_165 = arith.constant 0 : index
    %c0_166 = arith.constant 0 : index
    %157 = vector.load %arg15[%c0_165, %c0_166] : memref<189x1024xbf16, #tpu.memory_space<vmem>>, vector<189x1024xbf16>
    %cst_167 = arith.constant dense<0.000000e+00> : vector<16x1024xf32>
    %158 = tpu.matmul %156, %157, %cst_167 {dimension_numbers = #tpu.dot_dimension_numbers<[1], [0], [0], [1], [0, 0, 1, 1], [], []>} : vector<16x189xbf16>, vector<189x1024xbf16>, vector<16x1024xf32> -> vector<16x1024xf32>
    %c0_168 = arith.constant 0 : index
    %c0_169 = arith.constant 0 : index
    %159 = vector.load %arg16[%c0_168, %c0_169] : memref<16x1024xf32, #tpu.memory_space<vmem>>, vector<16x1024xf32>
    %160 = arith.mulf %158, %159 : vector<16x1024xf32>
    %c0_170 = arith.constant 0 : index
    %c0_171 = arith.constant 0 : index
    %161 = vector.load %arg17[%c0_170, %c0_171] : memref<1024x64xf32, #tpu.memory_space<vmem>>, vector<1024x64xf32>
    %cst_172 = arith.constant dense<0.000000e+00> : vector<16x64xf32>
    %162 = tpu.matmul %160, %161, %cst_172 {dimension_numbers = #tpu.dot_dimension_numbers<[1], [0], [0], [1], [0, 0, 1, 1], [], []>} : vector<16x1024xf32>, vector<1024x64xf32>, vector<16x64xf32> -> vector<16x64xf32>
    %cst_173 = arith.constant 1.000000e+00 : f32
    %163 = vector.broadcast %cst_173 : f32 to vector<1x16xf32>
    %cst_174 = arith.constant dense<0.000000e+00> : vector<1x64xf32>
    %164 = tpu.matmul %163, %162, %cst_174 {dimension_numbers = #tpu.dot_dimension_numbers<[1], [0], [0], [1], [0, 0, 1, 1], [], []>} : vector<1x16xf32>, vector<16x64xf32>, vector<1x64xf32> -> vector<1x64xf32>
    %c0_175 = arith.constant 0 : index
    %c0_176 = arith.constant 0 : index
    %165 = vector.load %arg18[%c0_175, %c0_176] : memref<1x64xf32, #tpu.memory_space<vmem>>, vector<1x64xf32>
    %166 = arith.addf %164, %165 : vector<1x64xf32>
    %cst_177 = arith.constant 0.000000e+00 : f32
    %167 = vector.broadcast %cst_177 : f32 to vector<1x64xf32>
    %168 = arith.cmpf ogt, %166, %167 : vector<1x64xf32>
    %cst_178 = arith.constant 0.00999999977 : f32
    %169 = vector.broadcast %cst_178 : f32 to vector<1x64xf32>
    %170 = arith.mulf %169, %166 : vector<1x64xf32>
    %171 = arith.select %168, %166, %170 : vector<1x64xi1>, vector<1x64xf32>
    %172 = arith.truncf %171 : vector<1x64xf32> to vector<1x64xbf16>
    %c0_179 = arith.constant 0 : index
    %c0_180 = arith.constant 0 : index
    %173 = vector.load %arg19[%c0_179, %c0_180] : memref<64x64xbf16, #tpu.memory_space<vmem>>, vector<64x64xbf16>
    %cst_181 = arith.constant dense<0.000000e+00> : vector<1x64xf32>
    %174 = tpu.matmul %172, %173, %cst_181 {dimension_numbers = #tpu.dot_dimension_numbers<[1], [0], [0], [1], [0, 0, 1, 1], [], []>} : vector<1x64xbf16>, vector<64x64xbf16>, vector<1x64xf32> -> vector<1x64xf32>
    %c0_182 = arith.constant 0 : index
    %c0_183 = arith.constant 0 : index
    %175 = vector.load %arg20[%c0_182, %c0_183] : memref<1x64xf32, #tpu.memory_space<vmem>>, vector<1x64xf32>
    %176 = arith.addf %174, %175 : vector<1x64xf32>
    %cst_184 = arith.constant 0.000000e+00 : f32
    %177 = vector.broadcast %cst_184 : f32 to vector<1x64xf32>
    %178 = arith.cmpf ogt, %176, %177 : vector<1x64xf32>
    %cst_185 = arith.constant 0.00999999977 : f32
    %179 = vector.broadcast %cst_185 : f32 to vector<1x64xf32>
    %180 = arith.mulf %179, %176 : vector<1x64xf32>
    %181 = arith.select %178, %176, %180 : vector<1x64xi1>, vector<1x64xf32>
    %182 = arith.truncf %181 : vector<1x64xf32> to vector<1x64xbf16>
    %c0_186 = arith.constant 0 : index
    %c0_187 = arith.constant 0 : index
    %183 = vector.load %arg21[%c0_186, %c0_187] : memref<64x32xbf16, #tpu.memory_space<vmem>>, vector<64x32xbf16>
    %cst_188 = arith.constant dense<0.000000e+00> : vector<1x32xf32>
    %184 = tpu.matmul %182, %183, %cst_188 {dimension_numbers = #tpu.dot_dimension_numbers<[1], [0], [0], [1], [0, 0, 1, 1], [], []>} : vector<1x64xbf16>, vector<64x32xbf16>, vector<1x32xf32> -> vector<1x32xf32>
    %c0_189 = arith.constant 0 : index
    %c0_190 = arith.constant 0 : index
    %185 = vector.load %arg22[%c0_189, %c0_190] : memref<1x32xf32, #tpu.memory_space<vmem>>, vector<1x32xf32>
    %186 = arith.addf %184, %185 : vector<1x32xf32>
    %c0_191 = arith.constant 0 : index
    %187 = memref.load %arg0[%c0_191] : memref<1xf32, #tpu.memory_space<smem>>
    %cst_192 = arith.constant 0.000000e+00 : f32
    %188 = arith.subf %cst_192, %187 : f32
    %189 = vector.broadcast %188 : f32 to vector<1x32xf32>
    %190 = arith.mulf %189, %186 : vector<1x32xf32>
    %191 = math.exp %190 : vector<1x32xf32>
    %cst_193 = arith.constant 1.000000e+00 : f32
    %192 = vector.broadcast %cst_193 : f32 to vector<1x32xf32>
    %193 = arith.addf %192, %191 : vector<1x32xf32>
    %cst_194 = arith.constant 1.000000e+00 : f32
    %194 = vector.broadcast %cst_194 : f32 to vector<1x32xf32>
    %195 = arith.divf %194, %193 : vector<1x32xf32>
    %c0_195 = arith.constant 0 : index
    %c0_196 = arith.constant 0 : index
    %196 = vector.load %arg23[%c0_195, %c0_196] : memref<1x32xf32, #tpu.memory_space<vmem>>, vector<1x32xf32>
    %197 = arith.mulf %195, %196 : vector<1x32xf32>
    %c0_197 = arith.constant 0 : index
    %c0_198 = arith.constant 0 : index
    %198 = vector.load %arg24[%c0_197, %c0_198] : memref<1x32xf32, #tpu.memory_space<vmem>>, vector<1x32xf32>
    tpu.vector_store %arg24[%c0_197, %c0_198], %197 {strides = array<i32>} : memref<1x32xf32, #tpu.memory_space<vmem>>, vector<1x32xf32>,
    return
  }
}

</mosaic_0001>

<bundles_post_ra>
// kernel: line_conv_sampler_forward.1
= control target key start
LH: loop header
LB: loop body
LE: loop exit
PB: predicated region body
PF: predicated region fallthrough
CT: control target
= control target key end

     0   :  { %s11358_s0 = inlined_call_operand.<no memory space> [shape: f32[1], index: 0, kind: input, shape index: {}]   ;;  %s11359_s1 = inlined_call_operand.vmem [shape: bf16[16,686], index: 1, kind: input, shape index: {}]   ;;  %s11360_s2 = inlined_call_operand.vmem [shape: bf16[16,144], index: 2, kind: input, shape index: {}]   ;;  %s11361_s3 = inlined_call_operand.vmem [shape: f32[648,2], index: 3, kind: input, shape index: {}, may-alias: {3,7}]   ;;  %s11362_s4 = inlined_call_operand.vmem [shape: f32[2,648], index: 4, kind: input, shape index: {}, may-alias: {4,8}]   ;;  %s11363_s5 = inlined_call_operand.hbm [shape: f32[1,648], index: 5, kind: input, shape index: {}, may-alias: {5,9}]   ;;  %s11364_s6 = inlined_call_operand.vmem [shape: bf16[16,144], index: 6, kind: input, shape index: {}]   ;;  %s11365_s7 = inlined_call_operand.vmem [shape: f32[648,2], index: 7, kind: input, shape index: {}, may-alias: {3,7}]   ;;  %s11366_s8 = inlined_call_operand.vmem [shape: f32[2,648], index: 8, kind: input, shape index: {}, may-alias: {4,8}]   ;;  %s11367_s9 = inlined_call_operand.hbm [shape: f32[1,648], index: 9, kind: input, shape index: {}, may-alias: {5,9}]   ;;  %s11368_s10 = inlined_call_operand.vmem [shape: bf16[629,222], index: 10, kind: input, shape index: {}]   ;;  %s11369_s11 = inlined_call_operand.vmem [shape: bf16[16,144], index: 11, kind: input, shape index: {}]   ;;  %s11370_s12 = inlined_call_operand.hbm [shape: f32[200,2], index: 12, kind: input, shape index: {}]   ;;  %s11371_s13 = inlined_call_operand.hbm [shape: f32[2,200], index: 13, kind: input, shape index: {}]   ;;  %s11372_s14 = inlined_call_operand.hbm [shape: f32[1,200], index: 14, kind: input, shape index: {}]   ;;  %s11373_s15 = inlined_call_operand.hbm [shape: bf16[189,1024], index: 15, kind: input, shape index: {}]   ;;  %s11374_s16 = inlined_call_operand.hbm [shape: f32[16,1024], index: 16, kind: input, shape index: {}]   ;;  %s11375_s17 = inlined_call_operand.vmem [shape: f32[1024,64], index: 17, kind: input, shape index: {}]   ;;  %s11376_s18 = inlined_call_operand.vmem [shape: f32[1,64], index: 18, kind: input, shape index: {}]   ;;  %s11377_s19 = inlined_call_operand.vmem [shape: bf16[64,64], index: 19, kind: input, shape index: {}]   ;;  %s11378_s20 = inlined_call_operand.vmem [shape: f32[1,64], index: 20, kind: input, shape index: {}]   ;;  %s11379_s21 = inlined_call_operand.vmem [shape: bf16[64,32], index: 21, kind: input, shape index: {}]   ;;  %s11380_s22 = inlined_call_operand.vmem [shape: f32[1,32], index: 22, kind: input, shape index: {}]   ;;  %s11381_s23 = inlined_call_operand.vmem [shape: f32[1,32], index: 23, kind: input, shape index: {}]   ;;  %s11382_s24 = inlined_call_operand.vmem [shape: f32[1,32], index: 24, kind: output, shape index: {}]  }
   0x1   :  { %11438 = sst [smem:[#allocation43_spill]] %s11358_s0 }
   0x2   :  { %11439 = sst [smem:[#allocation44_spill]] %s11359_s1 }
   0x3   :  { %11440 = sst [smem:[#allocation45_spill]] %s11360_s2 }
   0x4   :  { %11441 = sst [smem:[#allocation46_spill]] %s11361_s3 }
   0x5   :  { %11442 = sst [smem:[#allocation47_spill]] %s11362_s4 }
   0x6   :  { %11443 = sst [smem:[#allocation48_spill]] %s11363_s5 }
   0x7   :  { %11444 = sst [smem:[#allocation49_spill]] %s11364_s6 }
   0x8   :  { %11445 = sst [smem:[#allocation50_spill]] %s11365_s7 }
   0x9   :  { %11446 = sst [smem:[#allocation51_spill]] %s11366_s8 }
   0xa   :  { %30 = vsyncpa [#allocation9], 0 }
   0xb   :  { %31 = vsyncpa [#allocation11], 0 }
   0xc   :  { %32 = vsyncpa [#allocation14], 0 }
   0xd   :  { %33 = vsyncpa [#allocation17], 0  ;;  %s8520_s5 = smov [#allocation10]   ;;  %s8521_s27 = smov [#allocation13]  }
   0xe   :  { %s66_s26 = sshll.u32 %s8520_s5, 4  ;;  %s92_s28 = sshll.u32 %s8521_s27, 4  ;;  %s67_s26 = int_to_ptr.vmem [resolvable:$true] %s66_s26  ;;  %s93_s28 = int_to_ptr.vmem [resolvable:$true] %s92_s28 }
   0xf   :  { %s8358_s29 = scalar_lea.hbm %s11367_s9, 96 }
  0x10   :  { %p8359_p0 = scmp.ne.s32.totalorder %s11367_s9, %s8358_s29  ;;  %p8362_p1 = scmp.lt.u32.totalorder %s8358_s29, %s11367_s9 }
  0x12   :  { %p8364_p2 = pnand %p8362_p1, %p8359_p0 }
  0x14   :  { %8367 = shalt.err (!%p8364_p2)
}
  0x15   :  { %s8368_s25 = scalar_lea.vmem %s67_s26, 96  ;;  %p8373_p4 = scmp.lt.s32.totalorder %s67_s26, %s67_s26 }
  0x16   :  { %p8369_p3 = scmp.ne.s32.totalorder %s67_s26, %s8368_s25  ;;  %p8374_p5 = scmp.lt.s32.totalorder %s8368_s25, %s8368_s25 }
  0x18   :  { %p8375_p6 = por %p8374_p5, %p8373_p4 }
  0x1a   :  { %p8376_p7 = pnand %p8375_p6, %p8369_p3 }
  0x1c   :  { %8379 = shalt.err (!%p8376_p7)
}
  0x1d   :  { %69 = dma.hbm_to_vmem [thread:$0]  %s11367_s9, 96, %s67_s26, [#allocation11]  }
  0x1e   :  { %s8380_s27 = scalar_lea.hbm %s11371_s13, 64 }
  0x1f   :  { %p8381_p8 = scmp.ne.s32.totalorder %s11371_s13, %s8380_s27  ;;  %p8384_p9 = scmp.lt.u32.totalorder %s8380_s27, %s11371_s13 }
  0x21   :  { %p8386_p10 = pnand %p8384_p9, %p8381_p8 }
  0x23   :  { %8389 = shalt.err (!%p8386_p10)
}
  0x24   :  { %s8390_s7 = scalar_lea.vmem %s93_s28, 64  ;;  %p8395_p12 = scmp.lt.s32.totalorder %s93_s28, %s93_s28 }
  0x25   :  { %p8391_p11 = scmp.ne.s32.totalorder %s93_s28, %s8390_s7  ;;  %p8396_p13 = scmp.lt.s32.totalorder %s8390_s7, %s8390_s7 }
  0x27   :  { %p8397_p0 = por %p8396_p13, %p8395_p12 }
  0x29   :  { %p8398_p1 = pnand %p8397_p0, %p8391_p11 }
  0x2b   :  { %8401 = shalt.err (!%p8398_p1)
}
  0x2c   :  { %95 = dma.hbm_to_vmem [thread:$0]  %s11371_s13, 64, %s93_s28, [#allocation14]  }
  0x2d   :  { %s8522_s30 = smov [#allocation16]   ;;  %s8402_s4 = scalar_lea.hbm %s11373_s15, 12288 }
  0x2e   :  { %s111_s3 = sshll.u32 %s8522_s30, 4  ;;  %p8403_p2 = scmp.ne.s32.totalorder %s11373_s15, %s8402_s4  ;;  %s112_s3 = int_to_ptr.vmem [resolvable:$true] %s111_s3 }
  0x2f   :  { %p8406_p3 = scmp.lt.u32.totalorder %s8402_s4, %s11373_s15 }
  0x31   :  { %p8408_p4 = pnand %p8406_p3, %p8403_p2 }
  0x33   :  { %8411 = shalt.err (!%p8408_p4)
}
  0x34   :  { %s8412_s2 = scalar_lea.vmem %s112_s3, 12288  ;;  %p8417_p6 = scmp.lt.s32.totalorder %s112_s3, %s112_s3 }
  0x35   :  { %p8413_p5 = scmp.ne.s32.totalorder %s112_s3, %s8412_s2  ;;  %p8418_p7 = scmp.lt.s32.totalorder %s8412_s2, %s8412_s2 }
  0x37   :  { %p8419_p8 = por %p8418_p7, %p8417_p6 }
  0x39   :  { %p8420_p9 = pnand %p8419_p8, %p8413_p5 }
  0x3b   :  { %8423 = shalt.err (!%p8420_p9)
}
  0x3c   :  { %s8523_s13 = smov 512   ;;  %s8524_s28 = smov 32  }
  0x3d   :  { %117 = dma.hbm_to_vmem [thread:$0]  %s11373_s15, 12288, %s112_s3, [#allocation17], %s8523_s13, %s8523_s13, %s8524_s28  }
  0x3e   :  { %s8525_s7 = smov [#allocation8]   ;;  %s8526_s26 = smov [#allocation12]  }
  0x3f   :  { %s50_s9 = sshll.u32 %s8525_s7, 4  ;;  %s79_s30 = sshll.u32 %s8526_s26, 4  ;;  %s51_s9 = int_to_ptr.vmem [resolvable:$true] %s50_s9  ;;  %s80_s30 = int_to_ptr.vmem [resolvable:$true] %s79_s30 }
  0x40   :  { %s11447_s4 = sld [smem:[#allocation48_spill]] }
  0x46   :  { %s8424_s1 = scalar_lea.hbm %s11447_s4, 96 }
  0x47   :  { %p8425_p10 = scmp.ne.s32.totalorder %s11447_s4, %s8424_s1  ;;  %p8428_p11 = scmp.lt.u32.totalorder %s8424_s1, %s11447_s4 }
  0x49   :  { %p8430_p12 = pnand %p8428_p11, %p8425_p10 }
  0x4b   :  { %8433 = shalt.err (!%p8430_p12)
}
  0x4c   :  { %s8434_s15 = scalar_lea.vmem %s51_s9, 96  ;;  %p8439_p0 = scmp.lt.s32.totalorder %s51_s9, %s51_s9 }
  0x4d   :  { %p8435_p13 = scmp.ne.s32.totalorder %s51_s9, %s8434_s15  ;;  %p8440_p1 = scmp.lt.s32.totalorder %s8434_s15, %s8434_s15 }
  0x4f   :  { %p8441_p2 = por %p8440_p1, %p8439_p0 }
  0x51   :  { %p8442_p3 = pnand %p8441_p2, %p8435_p13 }
  0x53   :  { %8445 = shalt.err (!%p8442_p3)
}
  0x54   :  { %53 = dma.hbm_to_vmem [thread:$0]  %s11447_s4, 96, %s51_s9, [#allocation9]  }
  0x55   :  { %s8446_s0 = scalar_lea.hbm %s11370_s12, 3200 }
  0x56   :  { %p8447_p4 = scmp.ne.s32.totalorder %s11370_s12, %s8446_s0  ;;  %p8450_p5 = scmp.lt.u32.totalorder %s8446_s0, %s11370_s12 }
  0x58   :  { %p8452_p6 = pnand %p8450_p5, %p8447_p4 }
  0x5a   :  { %8455 = shalt.err (!%p8452_p6)
}
  0x5b   :  { %s8456_s1 = scalar_lea.vmem %s80_s30, 3200  ;;  %p8461_p8 = scmp.lt.s32.totalorder %s80_s30, %s80_s30 }
  0x5c   :  { %p8457_p7 = scmp.ne.s32.totalorder %s80_s30, %s8456_s1  ;;  %p8462_p9 = scmp.lt.s32.totalorder %s8456_s1, %s8456_s1 }
  0x5e   :  { %p8463_p10 = por %p8462_p9, %p8461_p8 }
  0x60   :  { %p8464_p11 = pnand %p8463_p10, %p8457_p7 }
  0x62   :  { %8467 = shalt.err (!%p8464_p11)
}
  0x63   :  { %s8527_s9 = smov 128   ;;  %s8528_s4 = smov 8  }
  0x64   :  { %85 = dma.hbm_to_vmem [thread:$0]  %s11370_s12, 3200, %s80_s30, [#allocation11], %s8527_s9, %s8527_s9, %s8528_s4  }
  0x65   :  { %s8529_s6 = smov [#allocation15]   ;;  %s8530_s15 = smov [#allocation18]  }
  0x66   :  { %s102_s2 = sshll.u32 %s8529_s6, 4  ;;  %s123_s3 = sshll.u32 %s8530_s15, 4  ;;  %s103_s2 = int_to_ptr.vmem [resolvable:$true] %s102_s2  ;;  %s124_s3 = int_to_ptr.vmem [resolvable:$true] %s123_s3 }
  0x67   :  { %s8468_s29 = scalar_lea.hbm %s11372_s14, 32 }
  0x68   :  { %p8469_p12 = scmp.ne.s32.totalorder %s11372_s14, %s8468_s29  ;;  %p8472_p13 = scmp.lt.u32.totalorder %s8468_s29, %s11372_s14 }
  0x6a   :  { %p8474_p0 = pnand %p8472_p13, %p8469_p12 }
  0x6c   :  { %8477 = shalt.err (!%p8474_p0)
}
  0x6d   :  { %s8478_s12 = scalar_lea.vmem %s103_s2, 32  ;;  %p8483_p2 = scmp.lt.s32.totalorder %s103_s2, %s103_s2 }
  0x6e   :  { %p8479_p1 = scmp.ne.s32.totalorder %s103_s2, %s8478_s12  ;;  %p8484_p3 = scmp.lt.s32.totalorder %s8478_s12, %s8478_s12 }
  0x70   :  { %p8485_p4 = por %p8484_p3, %p8483_p2 }
  0x72   :  { %p8486_p5 = pnand %p8485_p4, %p8479_p1 }
  0x74   :  { %8489 = shalt.err (!%p8486_p5)
}
  0x75   :  { %105 = dma.hbm_to_vmem [thread:$0]  %s11372_s14, 32, %s103_s2, [#allocation14]  }
  0x76   :  { %s8490_s4 = scalar_lea.hbm %s11374_s16, 2048 }
  0x77   :  { %p8491_p6 = scmp.ne.s32.totalorder %s11374_s16, %s8490_s4  ;;  %p8494_p7 = scmp.lt.u32.totalorder %s8490_s4, %s11374_s16 }
  0x79   :  { %p8496_p8 = pnand %p8494_p7, %p8491_p6 }
  0x7b   :  { %8499 = shalt.err (!%p8496_p8)
}
  0x7c   :  { %s8500_s13 = scalar_lea.vmem %s124_s3, 2048  ;;  %p8505_p10 = scmp.lt.s32.totalorder %s124_s3, %s124_s3 }
  0x7d   :  { %p8501_p9 = scmp.ne.s32.totalorder %s124_s3, %s8500_s13  ;;  %p8506_p11 = scmp.lt.s32.totalorder %s8500_s13, %s8500_s13 }
  0x7f   :  { %p8507_p12 = por %p8506_p11, %p8505_p10 }
  0x81   :  { %p8508_p13 = pnand %p8507_p12, %p8501_p9 }
  0x83   :  { %8511 = shalt.err (!%p8508_p13)
}
  0x84   :  { %s8531_s14 = smov 1024   ;;  %s8532_s2 = smov 64  }
  0x85   :  { %129 = dma.hbm_to_vmem [thread:$0]  %s11374_s16, 2048, %s124_s3, [#allocation17], %s8531_s14, %s8531_s14, %s8532_s2  }
  0x86   :  { %8512 = dma.done.wait [#allocation9], 96  }
  0x87   :  { %8513 = vsyncadd [#allocation9], 4294967200 }
  0x88   :  { %8514 = dma.done.wait [#allocation11], 3296  }
  0x89   :  { %8515 = vsyncadd [#allocation11], 4294964000 }
  0x8a   :  { %8516 = dma.done.wait [#allocation14], 96  }
  0x8b   :  { %8517 = vsyncadd [#allocation14], 4294967200 }
  0x8c   :  { %8518 = dma.done.wait [#allocation17], 14336  }
  0x8d   :  { %8519 = vsyncadd [#allocation17], 4294952960  ;;  %s11448_s26 = sld [smem:[#allocation44_spill]]  ;;  %s8533_s30 = smov 127   ;;  %vm207_vm0 = vcmask 64512   ;;  %vm754_vm1 = vcmask 130048  }
  0x8e   :  { %s8534_s5 = smov 126   ;;  %s8535_s27 = smov 110   ;;  %vm251_vm2 = vcmask 1039360   ;;  %vm311_vm3 = vcmask 1031168   ;;  %vm371_vm4 = vcmask 900096   ;;  %vm431_vm5 = vcmask 891904  }
  0x8f   :  { %s8536_s6 = smov 109   ;;  %s8537_s15 = smov 108   ;;  %vm491_vm6 = vcmask 883712   ;;  %vm551_vm7 = vcmask 752640   ;;  %vm611_vm8 = vcmask 744448   ;;  %vm671_vm9 = vcmask 736256  }
  0x90   :  { %s8538_s13 = smov 92   ;;  %s8539_s14 = smov 91   ;;  %vm1281_vm10 = vcmask 1041408   ;;  %vm1274_vm11 = vcmask 15360   ;;  %vm2047_vm12 = vcmask 154624   ;;  %vm2049_vm13 = vcmask 376024  }
  0x91   :  { %s8540_s29 = smov 90   ;;  %s11449_s25 = sld [smem:[#allocation45_spill]]  ;;  %vm2087_vm14 = vcmask 1047704   ;;  %vm2093_vm15 = vcmask 220160  }
  0x92   :  { %s11450_s9 = sld [smem:[#allocation46_spill]]  ;;  %s8545_s16 = smov 19  }
  0x93   :  { %v8196_v0 = vld [vmem:[%s11448_s26 + $0x4] ss:$24 sps:$4 sm:$0xff]   ;;  %v8198_v1 = vld [vmem:[%s11448_s26] ss:$24 sps:$4 sm:$0xff]   ;;  %v8780_v4 = vld [vmem:[%s11448_s26 + $0x10] ss:$24 sps:$4 sm:$0xff]  }
  0x94   :  { %241 = vrot.lane.b32.xlu0 %v8196_v0, %s8533_s30  ;;  %v8199_v2 = vld [vmem:[%s11448_s26 + $0x8] ss:$24 sps:$4 sm:$0xff]   ;;  %v8201_v3 = vld [vmem:[%s11448_s26 + $0xc] ss:$24 sps:$4 sm:$0xff]   ;;  %758 = vmatprep.subr.bf16.mxu0 %v8196_v0  ;;  %s11487_s1 = sld [smem:[#allocation49_spill]]  ;;  %s11488_s4 = sld [smem:[#allocation50_spill]] }
  0x95   :  { %239 = vrot.lane.b32.xlu1 %v8198_v1, %s8533_s30  ;;  %759 = vmatpush1.bf16.msra.mxu0 %v8198_v1  ;;  %v8204_v5 = vld [vmem:[%s11448_s26 + $0x14] ss:$24 sps:$4 sm:$0xff]   ;;  %s11505_s28 = sld [smem:[#allocation51_spill]]  ;;  %s8548_s7 = smov 117  }
  0x96   :  { %801 = vmatprep.subr.bf16.mxu1 %v8201_v3  ;;  %208 = vst.msk [vmem:[#allocation2 + $0x28] sm:$0xff] %vm207_vm0, %v8204_v5  ;;  %s8550_s26 = smov 107   ;;  %s8551_s12 = smov 106  }
  0x97   :  { %802 = vmatpush1.bf16.msra.mxu1 %v8199_v2  ;;  %v8811_v6 = vld [vmem:[%s11449_s25 + $0x4] ss:$8 sps:$4 sm:$0xff]   ;;  %s11536_s3 = sld [smem:[#allocation43_spill]] }
  0x98   :  { %243 = vrot.lane.b32.xlu0 %v8199_v2, %s8533_s30  ;;  %6745 = vmatprep.mubr.msk.bf16.mxu0 %vm754_vm1, %v8811_v6  ;;  %v689_v43 = vld [vmem:[%s11449_s25] sm:$0xff]  ;;  %v690_v44 = vld [vmem:[%s11449_s25 + $0x8] sm:$0xff]  ;;  %s11463_s25 = sld [smem:[#allocation47_spill]] }
  0x99   :  { %301 = vrot.lane.b32.xlu1 %v8196_v0, %s8534_s5  ;;  %6746 = vmatprep.mubr.msk.bf16.mxu1 %vm754_vm1, %v8811_v6  ;;  %v8895_v50 = vcombine.low %v689_v43, %v690_v44 }
  0x9c   :  { %303 = vrot.lane.b32.xlu0 %v8199_v2, %s8534_s5 }
  0x9d   :  { %299 = vrot.lane.b32.xlu1 %v8198_v1, %s8534_s5  ;;  %v696_v48 = vld [vmem:[#allocation2 + $0x28] sm:$0xff] }
  0xa0   :  { %361 = vrot.lane.b32.xlu0 %v8196_v0, %s8535_s27 }
  0xa1   :  { %363 = vrot.lane.b32.xlu1 %v8199_v2, %s8535_s27 }
  0xa4   :  { %359 = vrot.lane.b32.xlu0 %v8198_v1, %s8535_s27 }
  0xa5   :  { %421 = vrot.lane.b32.xlu1 %v8196_v0, %s8536_s6 }
  0xa8   :  { %423 = vrot.lane.b32.xlu0 %v8199_v2, %s8536_s6 }
  0xa9   :  { %419 = vrot.lane.b32.xlu1 %v8198_v1, %s8536_s6 }
  0xac   :  { %481 = vrot.lane.b32.xlu0 %v8196_v0, %s8537_s15 }
  0xad   :  { %483 = vrot.lane.b32.xlu1 %v8199_v2, %s8537_s15 }
  0xb0   :  { %479 = vrot.lane.b32.xlu0 %v8198_v1, %s8537_s15 }
  0xb1   :  { %541 = vrot.lane.b32.xlu1 %v8196_v0, %s8538_s13 }
  0xb4   :  { %543 = vrot.lane.b32.xlu0 %v8199_v2, %s8538_s13 }
  0xb5   :  { %539 = vrot.lane.b32.xlu1 %v8198_v1, %s8538_s13 }
  0xb8   :  { %601 = vrot.lane.b32.xlu0 %v8196_v0, %s8539_s14 }
  0xb9   :  { %603 = vrot.lane.b32.xlu1 %v8199_v2, %s8539_s14 }
  0xbc   :  { %599 = vrot.lane.b32.xlu0 %v8198_v1, %s8539_s14 }
  0xbd   :  { %661 = vrot.lane.b32.xlu1 %v8196_v0, %s8540_s29 }
  0xc0   :  { %663 = vrot.lane.b32.xlu0 %v8199_v2, %s8540_s29 }
  0xc1   :  { %659 = vrot.lane.b32.xlu1 %v8198_v1, %s8540_s29 }
  0xc4   :  { %245 = vrot.lane.b32.xlu0 %v8201_v3, %s8533_s30 }
  0xc5   :  { %247 = vrot.lane.b32.xlu1 %v8780_v4, %s8533_s30 }
  0xc8   :  { %305 = vrot.lane.b32.xlu0 %v8201_v3, %s8534_s5 }
  0xc9   :  { %307 = vrot.lane.b32.xlu1 %v8780_v4, %s8534_s5 }
  0xcc   :  { %249 = vrot.lane.b32.xlu0 %v8204_v5, %s8533_s30 }
  0xcd   :  { %365 = vrot.lane.b32.xlu1 %v8201_v3, %s8535_s27 }
  0xd0   :  { %367 = vrot.lane.b32.xlu0 %v8780_v4, %s8535_s27 }
  0xd1   :  { %309 = vrot.lane.b32.xlu1 %v8204_v5, %s8534_s5 }
  0xd4   :  { %425 = vrot.lane.b32.xlu0 %v8201_v3, %s8536_s6 }
  0xd5   :  { %427 = vrot.lane.b32.xlu1 %v8780_v4, %s8536_s6 }
  0xd8   :  { %369 = vrot.lane.b32.xlu0 %v8204_v5, %s8535_s27 }
  0xd9   :  { %485 = vrot.lane.b32.xlu1 %v8201_v3, %s8537_s15 }
  0xdc   :  { %487 = vrot.lane.b32.xlu0 %v8780_v4, %s8537_s15 }
  0xdd   :  { %429 = vrot.lane.b32.xlu1 %v8204_v5, %s8536_s6 }
  0xe0   :  { %545 = vrot.lane.b32.xlu0 %v8201_v3, %s8538_s13 }
  0xe1   :  { %547 = vrot.lane.b32.xlu1 %v8780_v4, %s8538_s13 }
  0xe4   :  { %489 = vrot.lane.b32.xlu0 %v8204_v5, %s8537_s15 }
  0xe5   :  { %605 = vrot.lane.b32.xlu1 %v8201_v3, %s8539_s14 }
  0xe8   :  { %607 = vrot.lane.b32.xlu0 %v8780_v4, %s8539_s14 }
  0xe9   :  { %549 = vrot.lane.b32.xlu1 %v8204_v5, %s8538_s13 }
  0xec   :  { %665 = vrot.lane.b32.xlu0 %v8201_v3, %s8540_s29 }
  0xed   :  { %667 = vrot.lane.b32.xlu1 %v8780_v4, %s8540_s29 }
  0xf0   :  { %609 = vrot.lane.b32.xlu0 %v8204_v5, %s8539_s14 }
  0xf1   :  { %669 = vrot.lane.b32.xlu1 %v8204_v5, %s8540_s29 }
 0x106   :  { %v242_v7 = vpop.permute.xlu0 %241 }
 0x107   :  { %v240_v8 = vpop.permute.xlu1 %239 }
 0x108   :  { %v252_v9 = vsel %vm251_vm2, %v240_v8, %v242_v7 }
 0x10a   :  { %v8850_v10 = vpop.permute.xlu0 %243 }
 0x10b   :  { %v253_v11 = vsel %vm251_vm2, %v242_v7, %v8850_v10  ;;  %v302_v12 = vpop.permute.xlu1 %301 }
 0x10c   :  { %760 = vmatprep.subr.bf16.mxu0 %v253_v11 }
 0x10d   :  { %761 = vmatpush1.bf16.msra.mxu0 %v252_v9 }
 0x10e   :  { %v8854_v13 = vpop.permute.xlu0 %303 }
 0x10f   :  { %v313_v14 = vsel %vm311_vm3, %v302_v12, %v8854_v13  ;;  %v300_v15 = vpop.permute.xlu1 %299 }
 0x110   :  { %v312_v16 = vsel %vm311_vm3, %v300_v15, %v302_v12  ;;  %762 = vmatprep.subr.bf16.mxu0 %v313_v14 }
 0x111   :  { %763 = vmatpush1.bf16.msra.mxu0 %v312_v16 }
 0x112   :  { %v362_v17 = vpop.permute.xlu0 %361 }
 0x113   :  { %v8859_v18 = vpop.permute.xlu1 %363 }
 0x114   :  { %v373_v19 = vsel %vm371_vm4, %v362_v17, %v8859_v18 }
 0x115   :  { %764 = vmatprep.subr.bf16.mxu0 %v373_v19 }
 0x116   :  { %v360_v20 = vpop.permute.xlu0 %359 }
 0x117   :  { %v372_v21 = vsel %vm371_vm4, %v360_v20, %v362_v17  ;;  %v422_v22 = vpop.permute.xlu1 %421 }
 0x118   :  { %765 = vmatpush1.bf16.msra.mxu0 %v372_v21 }
 0x11a   :  { %v8864_v23 = vpop.permute.xlu0 %423 }
 0x11b   :  { %v433_v24 = vsel %vm431_vm5, %v422_v22, %v8864_v23  ;;  %v420_v25 = vpop.permute.xlu1 %419 }
 0x11c   :  { %v432_v26 = vsel %vm431_vm5, %v420_v25, %v422_v22  ;;  %766 = vmatprep.subr.bf16.mxu0 %v433_v24 }
 0x11d   :  { %767 = vmatpush1.bf16.msra.mxu0 %v432_v26 }
 0x11e   :  { %v482_v27 = vpop.permute.xlu0 %481 }
 0x11f   :  { %v8869_v28 = vpop.permute.xlu1 %483 }
 0x120   :  { %v493_v29 = vsel %vm491_vm6, %v482_v27, %v8869_v28 }
 0x121   :  { %768 = vmatprep.subr.bf16.mxu0 %v493_v29 }
 0x122   :  { %v480_v30 = vpop.permute.xlu0 %479 }
 0x123   :  { %v492_v31 = vsel %vm491_vm6, %v480_v30, %v482_v27  ;;  %v542_v32 = vpop.permute.xlu1 %541 }
 0x124   :  { %769 = vmatpush1.bf16.msra.mxu0 %v492_v31  ;;  %v903_v31 = vld [vmem:[%s11450_s9 + $0x80] sm:$0xff] }
 0x126   :  { %v8874_v33 = vpop.permute.xlu0 %543 }
 0x127   :  { %v553_v34 = vsel %vm551_vm7, %v542_v32, %v8874_v33  ;;  %v540_v35 = vpop.permute.xlu1 %539 }
 0x128   :  { %v552_v36 = vsel %vm551_vm7, %v540_v35, %v542_v32  ;;  %770 = vmatprep.subr.bf16.mxu0 %v553_v34  ;;  %v904_v32 = vld [vmem:[%s11450_s9 + $0x88] sm:$0xff] }
 0x129   :  { %771 = vmatpush1.bf16.msra.mxu0 %v552_v36 }
 0x12a   :  { %v602_v37 = vpop.permute.xlu0 %601 }
 0x12b   :  { %v8879_v38 = vpop.permute.xlu1 %603 }
 0x12c   :  { %v613_v39 = vsel %vm611_vm8, %v602_v37, %v8879_v38 }
 0x12d   :  { %772 = vmatprep.subr.bf16.mxu0 %v613_v39  ;;  %v888_v39 = vld [vmem:[%s11450_s9 + $0x8] sm:$0xff] }
 0x12e   :  { %v600_v40 = vpop.permute.xlu0 %599 }
 0x12f   :  { %v612_v41 = vsel %vm611_vm8, %v600_v40, %v602_v37  ;;  %v662_v42 = vpop.permute.xlu1 %661  ;;  %v8942_v37 = vpack.c.bf16 %v904_v32, %v903_v31  ;;  %v951_v31 = vld [vmem:[%s11450_s9 + $0x200] sm:$0xff]  ;;  %v952_v32 = vld [vmem:[%s11450_s9 + $0x208] sm:$0xff] }
 0x130   :  { %773 = vmatpush1.bf16.msra.mxu0 %v612_v41  ;;  %v905_v41 = vld [vmem:[%s11450_s9 + $0x90] sm:$0xff] }
 0x132   :  { %v8890_v45 = vpop.permute.xlu0 %663 }
 0x133   :  { %v673_v46 = vsel %vm671_vm9, %v662_v42, %v8890_v45  ;;  %v660_v47 = vpop.permute.xlu1 %659 }
 0x134   :  { %v672_v49 = vsel %vm671_vm9, %v660_v47, %v662_v42  ;;  %774 = vmatprep.subr.bf16.mxu0 %v673_v46  ;;  %v906_v42 = vld [vmem:[%s11450_s9 + $0x98] sm:$0xff] }
 0x135   :  { %775 = vmatpush1.bf16.msra.mxu0 %v672_v49  ;;  %v889_v49 = vld [vmem:[%s11450_s9 + $0x10] sm:$0xff] }
 0x136   :  { %v246_v51 = vpop.permute.xlu0 %245  ;;  %844 = vmatprep.subr.bf16.mxu0 %v696_v48  ;;  %v8962_v48 = vpack.c.bf16 %v906_v42, %v905_v41  ;;  %v957_v41 = vld [vmem:[%s11450_s9 + $0x230] sm:$0xff]  ;;  %v958_v42 = vld [vmem:[%s11450_s9 + $0x238] sm:$0xff] }
 0x137   :  { %v254_v52 = vsel %vm251_vm2, %v8850_v10, %v246_v51  ;;  %v248_v53 = vpop.permute.xlu1 %247 }
 0x138   :  { %v255_v54 = vsel %vm251_vm2, %v246_v51, %v248_v53  ;;  %791 = vmatmul.mubr.bf16.vlgmr.msra.gmra.mrb[0].mxu0 %v8895_v50  ;;  %v890_v51 = vld [vmem:[%s11450_s9 + $0x18] sm:$0xff] }
 0x139   :  { %803 = vmatprep.subr.bf16.mxu1 %v255_v54  ;;  %845 = vmatpush1.bf16.msra.mxu0 %v8780_v4  ;;  %v908_v54 = vld [vmem:[%s11450_s9 + $0xa8] sm:$0xff] }
 0x13a   :  { %v306_v55 = vpop.permute.xlu0 %305  ;;  %804 = vmatpush1.bf16.msra.mxu1 %v254_v52  ;;  %6747 = vmatprep.mubr.msk.bf16.mxu0 %vm754_vm1, %v8811_v6 }
 0x13b   :  { %v314_v56 = vsel %vm311_vm3, %v8854_v13, %v306_v55  ;;  %v308_v57 = vpop.permute.xlu1 %307 }
 0x13c   :  { %v315_v58 = vsel %vm311_vm3, %v306_v55, %v308_v57  ;;  %v8980_v55 = vpack.c.bf16 %v890_v51, %v889_v49  ;;  %v961_v49 = vld [vmem:[%s11450_s9 + $0x250] sm:$0xff]  ;;  %v962_v51 = vld [vmem:[%s11450_s9 + $0x258] sm:$0xff] }
 0x13d   :  { %805 = vmatprep.subr.bf16.mxu1 %v315_v58  ;;  %v892_v58 = vld [vmem:[%s11450_s9 + $0x28] sm:$0xff] }
 0x13e   :  { %v250_v59 = vpop.permute.xlu0 %249  ;;  %806 = vmatpush1.bf16.msra.mxu1 %v314_v56 }
 0x13f   :  { %v256_v60 = vsel %vm251_vm2, %v248_v53, %v250_v59  ;;  %268 = vst.msk [vmem:[#allocation2 + $0x58] sm:$0xff] %vm207_vm0, %v250_v59  ;;  %v366_v61 = vpop.permute.xlu1 %365  ;;  %v907_v53 = vld [vmem:[%s11450_s9 + $0xa0] sm:$0xff]  ;;  %v909_v59 = vld [vmem:[%s11450_s9 + $0xb0] sm:$0xff] }
 0x140   :  { %v374_v62 = vsel %vm371_vm4, %v8859_v18, %v366_v61  ;;  %v8983_v56 = vpack.c.bf16 %v908_v54, %v907_v53  ;;  %v963_v53 = vld [vmem:[%s11450_s9 + $0x260] sm:$0xff]  ;;  %v964_v54 = vld [vmem:[%s11450_s9 + $0x268] sm:$0xff] }
 0x142   :  { %v368_v63 = vpop.permute.xlu0 %367 }
 0x143   :  { %v375_v0 = vsel %vm371_vm4, %v366_v61, %v368_v63  ;;  %v310_v1 = vpop.permute.xlu1 %309 }
 0x144   :  { %v316_v2 = vsel %vm311_vm3, %v308_v57, %v310_v1  ;;  %328 = vst.msk [vmem:[#allocation2 + $0x88] sm:$0xff] %vm207_vm0, %v310_v1  ;;  %807 = vmatprep.subr.bf16.mxu1 %v375_v0  ;;  %v891_v57 = vld [vmem:[%s11450_s9 + $0x20] sm:$0xff]  ;;  %v893_v1 = vld [vmem:[%s11450_s9 + $0x30] sm:$0xff] }
 0x145   :  { %808 = vmatpush1.bf16.msra.mxu1 %v374_v62  ;;  %v8998_v62 = vpack.c.bf16 %v892_v58, %v891_v57  ;;  %v9163_v57 = vpack.c.bf16 %v964_v54, %v963_v53  ;;  %v965_v58 = vld [vmem:[%s11450_s9 + $0x270] sm:$0xff] }
 0x146   :  { %v426_v3 = vpop.permute.xlu0 %425  ;;  %v702_v4 = vld [vmem:[#allocation2 + $0x58] sm:$0xff] }
 0x147   :  { %v434_v5 = vsel %vm431_vm5, %v8864_v23, %v426_v3  ;;  %v428_v6 = vpop.permute.xlu1 %427  ;;  %846 = vmatprep.subr.bf16.mxu0 %v702_v4  ;;  %v912_v4 = vld [vmem:[%s11450_s9 + $0xc8] sm:$0xff]  ;;  %11457 = vst [vmem:[#allocation29_spill] sm:$0xff] %v9163_v57 }
 0x148   :  { %v435_v7 = vsel %vm431_vm5, %v426_v3, %v428_v6  ;;  %847 = vmatpush1.bf16.msra.mxu0 %v256_v60  ;;  %v910_v60 = vld [vmem:[%s11450_s9 + $0xb8] sm:$0xff]  ;;  %v911_v3 = vld [vmem:[%s11450_s9 + $0xc0] sm:$0xff] }
 0x149   :  { %809 = vmatprep.subr.bf16.mxu1 %v435_v7  ;;  %v9001_v0 = vpack.c.bf16 %v910_v60, %v909_v59  ;;  %v895_v7 = vld [vmem:[%s11450_s9 + $0x40] sm:$0xff]  ;;  %v966_v59 = vld [vmem:[%s11450_s9 + $0x278] sm:$0xff] }
 0x14a   :  { %v370_v8 = vpop.permute.xlu0 %369  ;;  %810 = vmatpush1.bf16.msra.mxu1 %v434_v5  ;;  %v9172_v60 = vpack.c.bf16 %v966_v59, %v965_v58  ;;  %v929_v58 = vld [vmem:[%s11450_s9 + $0x150] sm:$0xff]  ;;  %v930_v59 = vld [vmem:[%s11450_s9 + $0x158] sm:$0xff] }
 0x14b   :  { %v376_v9 = vsel %vm371_vm4, %v368_v63, %v370_v8  ;;  %388 = vst.msk [vmem:[#allocation2 + $0xb8] sm:$0xff] %vm207_vm0, %v370_v8  ;;  %v486_v10 = vpop.permute.xlu1 %485  ;;  %v708_v11 = vld [vmem:[#allocation2 + $0x88] sm:$0xff] }
 0x14c   :  { %v494_v12 = vsel %vm491_vm6, %v8869_v28, %v486_v10  ;;  %848 = vmatprep.subr.bf16.mxu0 %v708_v11  ;;  %v896_v8 = vld [vmem:[%s11450_s9 + $0x48] sm:$0xff]  ;;  %11458 = vst [vmem:[#allocation30_spill] sm:$0xff] %v9172_v60 }
 0x14d   :  { %849 = vmatpush1.bf16.msra.mxu0 %v316_v2  ;;  %v894_v2 = vld [vmem:[%s11450_s9 + $0x38] sm:$0xff]  ;;  %v9034_v11 = vpack.c.bf16 %v896_v8, %v895_v7 }
 0x14e   :  { %v488_v13 = vpop.permute.xlu0 %487  ;;  %v9016_v5 = vpack.c.bf16 %v894_v2, %v893_v1  ;;  %v919_v1 = vld [vmem:[%s11450_s9 + $0x100] sm:$0xff]  ;;  %v920_v2 = vld [vmem:[%s11450_s9 + $0x108] sm:$0xff] }
 0x14f   :  { %v495_v14 = vsel %vm491_vm6, %v486_v10, %v488_v13  ;;  %v430_v15 = vpop.permute.xlu1 %429  ;;  %v914_v10 = vld [vmem:[%s11450_s9 + $0xd8] sm:$0xff]  ;;  %v9197_v8 = vpack.c.bf16 %v920_v2, %v919_v1  ;;  %v947_v1 = vld [vmem:[%s11450_s9 + $0x1e0] sm:$0xff]  ;;  %v948_v2 = vld [vmem:[%s11450_s9 + $0x1e8] sm:$0xff] }
 0x150   :  { %v436_v16 = vsel %vm431_vm5, %v428_v6, %v430_v15  ;;  %448 = vst.msk [vmem:[#allocation2 + $0xe8] sm:$0xff] %vm207_vm0, %v430_v15  ;;  %811 = vmatprep.subr.bf16.mxu1 %v495_v14  ;;  %v9019_v6 = vpack.c.bf16 %v912_v4, %v911_v3  ;;  %v898_v14 = vld [vmem:[%s11450_s9 + $0x58] sm:$0xff]  ;;  %v915_v15 = vld [vmem:[%s11450_s9 + $0xe0] sm:$0xff]  ;;  %v937_v3 = vld [vmem:[%s11450_s9 + $0x190] sm:$0xff] }
 0x151   :  { %812 = vmatpush1.bf16.msra.mxu1 %v494_v12  ;;  %v938_v4 = vld [vmem:[%s11450_s9 + $0x198] sm:$0xff] }
 0x152   :  { %v546_v17 = vpop.permute.xlu0 %545  ;;  %v714_v18 = vld [vmem:[#allocation2 + $0xb8] sm:$0xff] }
 0x153   :  { %v554_v19 = vsel %vm551_vm7, %v8874_v33, %v546_v17  ;;  %v548_v20 = vpop.permute.xlu1 %547  ;;  %850 = vmatprep.subr.bf16.mxu0 %v714_v18  ;;  %v899_v18 = vld [vmem:[%s11450_s9 + $0x60] sm:$0xff] }
 0x154   :  { %v555_v21 = vsel %vm551_vm7, %v546_v17, %v548_v20  ;;  %851 = vmatpush1.bf16.msra.mxu0 %v376_v9  ;;  %v913_v9 = vld [vmem:[%s11450_s9 + $0xd0] sm:$0xff] }
 0x155   :  { %813 = vmatprep.subr.bf16.mxu1 %v555_v21  ;;  %v9038_v12 = vpack.c.bf16 %v914_v10, %v913_v9  ;;  %v918_v21 = vld [vmem:[%s11450_s9 + $0xf8] sm:$0xff]  ;;  %v9201_v10 = vpack.c.bf16 %v938_v4, %v937_v3  ;;  %v9296_v3 = vpack.c.bf16 %v930_v59, %v929_v58  ;;  %v9299_v4 = vpack.c.bf16 %v948_v2, %v947_v1 }
 0x156   :  { %v490_v22 = vpop.permute.xlu0 %489  ;;  %814 = vmatpush1.bf16.msra.mxu1 %v554_v19  ;;  %v900_v19 = vld [vmem:[%s11450_s9 + $0x68] sm:$0xff]  ;;  %v1203_v59 = vlaneseq  ;;  %v8543_v1 = vmov 1983009808  }
 0x157   :  { %v496_v23 = vsel %vm491_vm6, %v488_v13, %v490_v22  ;;  %508 = vst.msk [vmem:[#allocation2 + $0x118] sm:$0xff] %vm207_vm0, %v490_v22  ;;  %v606_v24 = vpop.permute.xlu1 %605  ;;  %v720_v25 = vld [vmem:[#allocation2 + $0xe8] sm:$0xff]  ;;  %v897_v13 = vld [vmem:[%s11450_s9 + $0x50] sm:$0xff]  ;;  %v9071_v22 = vpack.c.bf16 %v900_v19, %v899_v18  ;;  %v1251_v2 = vunpack.c.l.s4 %v8543_v1 }
 0x158   :  { %v614_v26 = vsel %vm611_vm8, %v8879_v38, %v606_v24  ;;  %852 = vmatprep.subr.bf16.mxu0 %v720_v25  ;;  %v887_v38 = vld [vmem:[%s11450_s9] sm:$0xff]  ;;  %v902_v25 = vld [vmem:[%s11450_s9 + $0x78] sm:$0xff]  ;;  %v940_v18 = vld [vmem:[%s11450_s9 + $0x1a8] sm:$0xff] }
 0x159   :  { %853 = vmatpush1.bf16.msra.mxu0 %v436_v16  ;;  %v8957_v44 = vpack.c.bf16 %v888_v39, %v887_v38  ;;  %v9053_v16 = vpack.c.bf16 %v898_v14, %v897_v13  ;;  %v955_v38 = vld [vmem:[%s11450_s9 + $0x220] sm:$0xff]  ;;  %v956_v39 = vld [vmem:[%s11450_s9 + $0x228] sm:$0xff]  ;;  %v921_v13 = vld [vmem:[%s11450_s9 + $0x110] sm:$0xff] }
 0x15a   :  { %v608_v27 = vpop.permute.xlu0 %607  ;;  %v922_v14 = vld [vmem:[%s11450_s9 + $0x118] sm:$0xff] }
 0x15b   :  { %v615_v28 = vsel %vm611_vm8, %v606_v24, %v608_v27  ;;  %v550_v29 = vpop.permute.xlu1 %549  ;;  %v901_v24 = vld [vmem:[%s11450_s9 + $0x70] sm:$0xff] }
 0x15c   :  { %v556_v30 = vsel %vm551_vm7, %v548_v20, %v550_v29  ;;  %568 = vst.msk [vmem:[#allocation2 + $0x148] sm:$0xff] %vm207_vm0, %v550_v29  ;;  %815 = vmatprep.subr.bf16.mxu1 %v615_v28  ;;  %v917_v20 = vld [vmem:[%s11450_s9 + $0xf0] sm:$0xff]  ;;  %v936_v28 = vld [vmem:[%s11450_s9 + $0x188] sm:$0xff] }
 0x15d   :  { %816 = vmatpush1.bf16.msra.mxu1 %v614_v26  ;;  %v9084_v26 = vpack.c.bf16 %v902_v25, %v901_v24  ;;  %v923_v24 = vld [vmem:[%s11450_s9 + $0x120] sm:$0xff]  ;;  %v924_v25 = vld [vmem:[%s11450_s9 + $0x128] sm:$0xff] }
 0x15e   :  { %v666_v33 = vpop.permute.xlu0 %665  ;;  %v726_v34 = vld [vmem:[#allocation2 + $0x118] sm:$0xff] }
 0x15f   :  { %v674_v35 = vsel %vm671_vm9, %v8890_v45, %v666_v33  ;;  %v668_v36 = vpop.permute.xlu1 %667  ;;  %854 = vmatprep.subr.bf16.mxu0 %v726_v34  ;;  %v953_v34 = vld [vmem:[%s11450_s9 + $0x210] sm:$0xff] }
 0x160   :  { %v675_v40 = vsel %vm671_vm9, %v666_v33, %v668_v36  ;;  %855 = vmatpush1.bf16.msra.mxu0 %v496_v23  ;;  %v9074_v23 = vpack.c.bf16 %v918_v21, %v917_v20  ;;  %v9103_v33 = vpack.c.bf16 %v952_v32, %v951_v31  ;;  %v9223_v20 = vpack.c.bf16 %v922_v14, %v921_v13  ;;  %v931_v13 = vld [vmem:[%s11450_s9 + $0x160] sm:$0xff]  ;;  %v932_v14 = vld [vmem:[%s11450_s9 + $0x168] sm:$0xff] }
 0x161   :  { %817 = vmatprep.subr.bf16.mxu1 %v675_v40  ;;  %v9122_v40 = vpack.c.bf16 %v956_v39, %v955_v38  ;;  %v9242_v31 = vpack.c.bf16 %v924_v25, %v923_v24  ;;  %v943_v38 = vld [vmem:[%s11450_s9 + $0x1c0] sm:$0xff]  ;;  %v944_v39 = vld [vmem:[%s11450_s9 + $0x1c8] sm:$0xff]  ;;  %v9314_v24 = vpack.c.bf16 %v932_v14, %v931_v13  ;;  %v9358_v13 = vshrl.u32 %v1203_v59, 7 }
 0x162   :  { %v610_v43 = vpop.permute.xlu0 %609  ;;  %818 = vmatpush1.bf16.msra.mxu1 %v674_v35  ;;  %11451 = vst [vmem:[#allocation23_spill] sm:$0xff] %v9103_v33  ;;  %v954_v35 = vld [vmem:[%s11450_s9 + $0x218] sm:$0xff]  ;;  %v1252_v14 = vunpack.c.0.s8 %v1251_v2  ;;  %v9392_v2 = vld.sshfl [vmem:[%s11463_s25 + $0x8] sm:$0x33 pattern:$0x76325410] }
 0x163   :  { %v616_v45 = vsel %vm611_vm8, %v608_v27, %v610_v43  ;;  %628 = vst.msk [vmem:[#allocation2 + $0x178] sm:$0xff] %vm207_vm0, %v610_v43  ;;  %v670_v46 = vpop.permute.xlu1 %669  ;;  %v732_v47 = vld [vmem:[#allocation2 + $0x148] sm:$0xff]  ;;  %7520 = vmatprep.subr.bf16.mxu1 %v8942_v37  ;;  %v935_v27 = vld [vmem:[%s11450_s9 + $0x180] sm:$0xff]  ;;  %11453 = vst [vmem:[#allocation25_spill] sm:$0xff] %v9122_v40  ;;  %v9132_v43 = vpack.c.bf16 %v958_v42, %v957_v41  ;;  %v9263_v42 = vpack.c.bf16 %v944_v39, %v943_v38 }
 0x164   :  { %v676_v52 = vsel %vm671_vm9, %v668_v36, %v670_v46  ;;  %688 = vst.msk [vmem:[#allocation2 + $0x1a8] sm:$0xff] %vm207_vm0, %v670_v46  ;;  %856 = vmatprep.subr.bf16.mxu0 %v732_v47  ;;  %v9093_v29 = vpack.c.bf16 %v936_v28, %v935_v27  ;;  %v9112_v36 = vpack.c.bf16 %v954_v35, %v953_v34  ;;  %v960_v46 = vld [vmem:[%s11450_s9 + $0x248] sm:$0xff]  ;;  %v941_v27 = vld [vmem:[%s11450_s9 + $0x1b0] sm:$0xff]  ;;  %v942_v28 = vld [vmem:[%s11450_s9 + $0x1b8] sm:$0xff] }
 0x165   :  { %857 = vmatpush1.bf16.msra.mxu0 %v556_v30  ;;  %834 = vmatmul.mubr.bf16.vlgmr.msra.gmra.mrb[0].mxu1 %v8895_v50  ;;  %v11391_v30 = vmov 0.0|0.0   ;;  %11454 = vst [vmem:[#allocation26_spill] sm:$0xff] %v9132_v43  ;;  %v9245_v32 = vpack.c.bf16 %v942_v28, %v941_v27  ;;  %v925_v34 = vld [vmem:[%s11450_s9 + $0x130] sm:$0xff]  ;;  %v926_v35 = vld [vmem:[%s11450_s9 + $0x138] sm:$0xff] }
 0x166   :  { %7522 = vmatpush3.bf16.msra.mxu1 %v8957_v44  ;;  %11452 = vst [vmem:[#allocation24_spill] sm:$0xff] %v9112_v36  ;;  %v9260_v41 = vpack.c.bf16 %v926_v35, %v925_v34  ;;  %v933_v27 = vld [vmem:[%s11450_s9 + $0x170] sm:$0xff]  ;;  %v934_v28 = vld [vmem:[%s11450_s9 + $0x178] sm:$0xff] }
 0x167   :  { %7524 = vmatprep.subr.bf16.mxu1 %v8962_v48  ;;  %v9326_v34 = vpack.c.bf16 %v934_v28, %v933_v27 }
 0x16a   :  { %v738_v61 = vld [vmem:[#allocation2 + $0x178] sm:$0xff]  ;;  %7526 = vmatpush3.bf16.msra.mxu1 %v8980_v55 }
 0x16b   :  { %858 = vmatprep.subr.bf16.mxu0 %v738_v61  ;;  %v744_v63 = vld [vmem:[#allocation2 + $0x1a8] sm:$0xff]  ;;  %7528 = vmatprep.subr.bf16.mxu1 %v8983_v56  ;;  %v11393_v61 = vmov 0.0  }
 0x16c   :  { %859 = vmatpush1.bf16.msra.mxu0 %v616_v45  ;;  %v959_v45 = vld [vmem:[%s11450_s9 + $0x240] sm:$0xff] }
 0x16d   :  { %860 = vmatprep.subr.bf16.mxu0 %v744_v63  ;;  %v9142_v47 = vpack.c.bf16 %v960_v46, %v959_v45  ;;  %v9180_v63 = vld [vmem:[%s11450_s9 + $0x280] sm:$0xff]  ;;  %v928_v46 = vld [vmem:[%s11450_s9 + $0x148] sm:$0xff] }
 0x16e   :  { %7530 = vmatpush3.bf16.msra.mxu1 %v8998_v62  ;;  %11459 = vst [vmem:[#allocation31_spill] sm:$0xff] %v9180_v63  ;;  %v927_v45 = vld [vmem:[%s11450_s9 + $0x140] sm:$0xff] }
 0x16f   :  { %7532 = vmatprep.subr.bf16.mxu1 %v9001_v0  ;;  %11455 = vst [vmem:[#allocation27_spill] sm:$0xff] %v9142_v47  ;;  %v9278_v53 = vpack.c.bf16 %v928_v46, %v927_v45 }
 0x170   :  { %861 = vmatpush1.bf16.msra.mxu0 %v676_v52  ;;  %v9152_v52 = vpack.c.bf16 %v962_v51, %v961_v49  ;;  %v945_v49 = vld [vmem:[%s11450_s9 + $0x1d0] sm:$0xff]  ;;  %v946_v51 = vld [vmem:[%s11450_s9 + $0x1d8] sm:$0xff] }
 0x171   :  { %7583 = vmatprep.subr.bf16.mxu0 %v11391_v30  ;;  %v9281_v54 = vpack.c.bf16 %v946_v51, %v945_v49 }
 0x172   :  { %7534 = vmatpush3.bf16.msra.mxu1 %v9016_v5  ;;  %11456 = vst [vmem:[#allocation28_spill] sm:$0xff] %v9152_v52 }
 0x173   :  { %877 = vmatmul.mubr.bf16.vlgmr.msra.gmra.mrb[4].mxu0 %v8895_v50  ;;  %7536 = vmatprep.subr.bf16.mxu1 %v9019_v6  ;;  %v916_v50 = vld [vmem:[%s11450_s9 + $0xe8] sm:$0xff] }
 0x174   :  { %v9056_v17 = vpack.c.bf16 %v916_v50, %v915_v15  ;;  %7585 = vmatpush1.bf16.msra.mxu0 %v9103_v33  ;;  %v939_v50 = vld [vmem:[%s11450_s9 + $0x1a0] sm:$0xff] }
 0x175   :  { %7586 = vmatprep.subr.bf16.mxu0 %v11391_v30  ;;  %v9226_v21 = vpack.c.bf16 %v940_v18, %v939_v50  ;;  %v949_v50 = vld [vmem:[%s11450_s9 + $0x1f0] sm:$0xff]  ;;  %v950_v18 = vld [vmem:[%s11450_s9 + $0x1f8] sm:$0xff] }
 0x176   :  { %7538 = vmatpush3.bf16.msra.mxu1 %v9034_v11  ;;  %v9317_v25 = vpack.c.bf16 %v950_v18, %v949_v50  ;;  %v1245_v50 = vld [vmem:[%s11463_s25] sm:$0xff]  ;;  %v9364_v18 = vsub.s32 %v1252_v14, %v9358_v13  ;;  %v9396_v14 = vcombine.high %v9392_v2, %v9392_v2  ;;  %s8549_s25 = smov 116  }
 0x177   :  { %7540 = vmatprep.subr.bf16.mxu1 %v9038_v12  ;;  %v1249_v27 = vcombine.high %v1245_v50, %v1245_v50 }
 0x178   :  { %7588 = vmatpush1.bf16.msra.mxu0 %v9112_v36  ;;  %11464 = vst [vmem:[#allocation35_spill] sm:$0xff] %v9364_v18  ;;  %v9367_v28 = vrot.slane %v1245_v50, %v9364_v18  ;;  %11468 = vst [vmem:[#allocation39_spill] sm:$0xff] %v9396_v14 }
 0x179   :  { %7589 = vmatprep.subr.bf16.mxu0 %v11391_v30 }
 0x17a   :  { %7542 = vmatpush3.bf16.msra.mxu1 %v9053_v16  ;;  %11465 = vst [vmem:[#allocation36_spill] sm:$0xff] %v9367_v28  ;;  %v9374_v1 = vcombine.high %v9367_v28, %v9367_v28 }
 0x17b   :  { %7544 = vmatprep.subr.bf16.mxu1 %v9056_v17 }
 0x17c   :  { %7591 = vmatpush1.bf16.msra.mxu0 %v9122_v40 }
 0x17d   :  { %7592 = vmatprep.subr.bf16.mxu0 %v11391_v30 }
 0x17e   :  { %7546 = vmatpush3.bf16.msra.mxu1 %v9071_v22 }
 0x17f   :  { %7548 = vmatprep.subr.bf16.mxu1 %v9074_v23 }
 0x180   :  { %7594 = vmatpush1.bf16.msra.mxu0 %v9132_v43 }
 0x181   :  { %7595 = vmatprep.subr.bf16.mxu0 %v11391_v30 }
 0x182   :  { %7550 = vmatpush3.bf16.msra.mxu1 %v9084_v26 }
 0x183   :  { %7552 = vmatprep.subr.bf16.mxu1 %v9093_v29 }
 0x184   :  { %7597 = vmatpush1.bf16.msra.mxu0 %v9142_v47 }
 0x185   :  { %7598 = vmatprep.subr.bf16.mxu0 %v11391_v30 }
 0x188   :  { %7600 = vmatpush1.bf16.msra.mxu0 %v9152_v52 }
 0x189   :  { %7601 = vmatprep.subr.bf16.mxu0 %v11391_v30 }
 0x18c   :  { %7603 = vmatpush1.bf16.msra.mxu0 %v9163_v57 }
 0x18d   :  { %7604 = vmatprep.subr.bf16.mxu0 %v11391_v30  ;;  %v9370_v30 = vrot.slane %v1249_v27, %v9364_v18 }
 0x18f   :  { %11466 = vst [vmem:[#allocation37_spill] sm:$0xff] %v9370_v30  ;;  %v9378_v59 = vcombine.high %v9370_v30, %v9370_v30 }
 0x190   :  { %7606 = vmatpush1.bf16.msra.mxu0 %v9172_v60 }
 0x191   :  { %1156 = vmatprep.subr.mxu0 %v11393_v61  ;;  %11467 = vst [vmem:[#allocation38_spill] sm:$0xff] %v9378_v59 }
 0x194   :  { %1157 = vmatpush1.msra.mxu0 %v9180_v63 }
 0x195   :  { %6755 = vmatprep.subr.msk.mxu0 %vm1281_vm10, %v9378_v59 }
 0x20b   :  { %v9195_v7 = vpop.f32.mrb[0].mxu0 }
 0x20c   :  { %v9199_v9 = vpop.f32.mrb[1].mxu0 }
 0x20d   :  { %1038 = vmatprep.mubr.f32.mxu1 %v9199_v9  ;;  %v9210_v15 = vpop.f32.mrb[2].mxu0 }
 0x20e   :  { %1039 = vmatmul.mubr.f32.vlgmr.msra.gmra.mrb[4].mxu1 %v9195_v7  ;;  %v9219_v19 = vpop.f32.mrb[3].mxu0 }
 0x20f   :  { %1043 = vmatprep.mubr.f32.mxu1 %v9219_v19  ;;  %7554 = vmatpush3.bf16.msra.mxu1 %v9197_v8 }
 0x210   :  { %7556 = vmatprep.subr.bf16.mxu1 %v9201_v10 }
 0x212   :  { %1044 = vmatmul.mubr.f32.gmra.mrb[6].mxu1 %v9210_v15 }
 0x213   :  { %7558 = vmatpush3.bf16.msra.mxu1 %v9223_v20 }
 0x214   :  { %7560 = vmatprep.subr.bf16.mxu1 %v9226_v21 }
 0x217   :  { %7562 = vmatpush3.bf16.msra.mxu1 %v9242_v31 }
 0x218   :  { %7564 = vmatprep.subr.bf16.mxu1 %v9245_v32 }
 0x21b   :  { %7566 = vmatpush3.bf16.msra.mxu1 %v9260_v41 }
 0x21c   :  { %7568 = vmatprep.subr.bf16.mxu1 %v9263_v42 }
 0x21f   :  { %7570 = vmatpush3.bf16.msra.mxu1 %v9278_v53 }
 0x220   :  { %7572 = vmatprep.subr.bf16.mxu1 %v9281_v54 }
 0x223   :  { %7574 = vmatpush3.bf16.msra.mxu1 %v9296_v3 }
 0x224   :  { %7576 = vmatprep.subr.bf16.mxu1 %v9299_v4 }
 0x227   :  { %7578 = vmatpush3.bf16.msra.mxu1 %v9314_v24 }
 0x228   :  { %7580 = vmatprep.subr.bf16.mxu1 %v9317_v25 }
 0x22b   :  { %7582 = vmatpush3.bf16.msra.mxu1 %v9326_v34 }
 0x22c   :  { %6751 = vmatprep.subr.msk.mxu1 %vm1281_vm10, %v9374_v1 }
 0x238   :  { %v9330_v35 = vpop.f32.mrb[0].mxu1 }
 0x239   :  { %v9332_v38 = vpop.f32.mrb[1].mxu1 }
 0x23a   :  { %v9334_v39 = vpop.f32.mrb[2].mxu1  ;;  %1113 = vmatprep.mubr.f32.mxu1 %v9332_v38 }
 0x23b   :  { %v9337_v45 = vpop.f32.mrb[3].mxu1  ;;  %1114 = vmatmul.mubr.f32.vlgmr.msra.gmra.mrb[8].mxu1 %v9330_v35 }
 0x23c   :  { %1118 = vmatprep.mubr.f32.mxu1 %v9337_v45  ;;  %6752 = vmatpush1.msk.msra.mxu1 %vm1281_vm10, %v9367_v28 }
 0x23d   :  { %6759 = vmatprep.subr.msk.mxu1 %vm1281_vm10, %v9396_v14 }
 0x23f   :  { %1119 = vmatmul.mubr.f32.gmra.mrb[10].mxu1 %v9334_v39 }
 0x240   :  { %1358 = vmatprep.mubr.f32.mxu1 %v11393_v61 }
 0x246   :  { %v9343_v46 = vpop.f32.mrb[4].mxu0 }
 0x247   :  { %v9345_v49 = vpop.f32.mrb[5].mxu0 }
 0x248   :  { %11460 = vst [vmem:[#allocation32_spill] sm:$0xff] %v9345_v49  ;;  %v9347_v51 = vpop.f32.mrb[6].mxu0  ;;  %6748 = vmatprep.mubr.msk.f32.mxu0 %vm207_vm0, %v9345_v49 }
 0x249   :  { %11461 = vst [vmem:[#allocation33_spill] sm:$0xff] %v9347_v51  ;;  %v9351_v58 = vpop.f32.mrb[7].mxu0  ;;  %1189 = vmatmul.mubr.f32.vlgmr.msra.gmra.mrb[8].mxu0 %v9343_v46 }
 0x24a   :  { %11462 = vst [vmem:[#allocation34_spill] sm:$0xff] %v9351_v58  ;;  %6749 = vmatprep.mubr.msk.f32.mxu0 %vm207_vm0, %v9351_v58  ;;  %6756 = vmatpush1.msk.msra.mxu0 %vm1281_vm10, %v9370_v30 }
 0x24b   :  { %7608 = vmatprep.subr.bf16.mxu0 %v8942_v37 }
 0x24d   :  { %1194 = vmatmul.mubr.f32.gmra.mrb[10].mxu0 %v9347_v51 }
 0x24e   :  { %1435 = vmatprep.mubr.f32.mxu0 %v11393_v61 }
 0x2e1   :  { %v7051_v50 = vpop.f32.mrb[4].mxu1 }
 0x2e2   :  { %v7052_v27 = vpop.f32.mrb[5].mxu1 }
 0x2e3   :  { %v7053_v61 = vadd.f32 %v7052_v27, %v7051_v50  ;;  %v11476_v27 = vld [vmem:[#allocation34_spill] sm:$0xff] }
 0x2e5   :  { %v7054_v18 = vpop.f32.mrb[6].mxu1 }
 0x2e6   :  { %v7055_v63 = vpop.f32.mrb[7].mxu1 }
 0x2e7   :  { %v7056_v30 = vadd.f32 %v7055_v63, %v7054_v18  ;;  %v11469_v63 = vmov 0.0  }
 0x30e   :  { %v7089_v60 = vpop.f32.mrb[8].mxu1 }
 0x30f   :  { %v7090_v37 = vpop.f32.mrb[9].mxu1 }
 0x310   :  { %v7091_v57 = vadd.f32 %v7090_v37, %v7089_v60 }
 0x312   :  { %v7092_v52 = vpop.f32.mrb[10].mxu1  ;;  %v1116_v47 = vadd.f32 %v7091_v57, %v7053_v61 }
 0x313   :  { %v7093_v43 = vpop.f32.mrb[11].mxu1 }
 0x314   :  { %v7094_v40 = vadd.f32 %v7093_v43, %v7092_v52 }
 0x316   :  { %v1121_v36 = vadd.f32 %v7094_v40, %v7056_v30 }
 0x31c   :  { %v1190_v58 = vpop.f32.mrb[8].mxu0 }
 0x31d   :  { %v1191_v51 = vadd.f32 %v1190_v58, %v1116_v47  ;;  %v1192_v59 = vpop.f32.mrb[9].mxu0 }
 0x31f   :  { %v1199_v28 = vmul.f32 0.00390625, %v1191_v51  ;;  %v11473_v51 = vld [vmem:[#allocation36_spill] sm:$0xff] }
 0x320   :  { %v1195_v14 = vpop.f32.mrb[10].mxu0 }
 0x321   :  { %v1196_v33 = vadd.f32 %v1195_v14, %v1121_v36  ;;  %v1197_v49 = vpop.f32.mrb[11].mxu0  ;;  %6753 = vmatmul.mubr.msk.f32.vlgmr.msra.gmra.mrb[12].mxu1 %vm1274_vm11, %v1199_v28  ;;  %6757 = vmatmul.mubr.msk.f32.vlgmr.msra.gmra.mrb[12].mxu0 %vm1274_vm11, %v1199_v28  ;;  %v11475_v14 = vld [vmem:[#allocation33_spill] sm:$0xff] }
 0x322   :  { %1364 = vmatprep.mubr.f32.mxu1 %v11469_v63  ;;  %1441 = vmatprep.mubr.f32.mxu0 %v11469_v63 }
 0x323   :  { %v1200_v57 = vmul.f32 0.00390625, %v1196_v33  ;;  %6760 = vmatpush1.msk.msra.mxu1 %vm1281_vm10, %v9392_v2  ;;  %7610 = vmatpush3.bf16.msra.mxu0 %v8957_v44  ;;  %v11470_v44 = vmov 0.0|0.0  }
 0x324   :  { %7640 = vmatprep.subr.bf16.mxu1 %v9093_v29  ;;  %7612 = vmatprep.subr.bf16.mxu0 %v8962_v48  ;;  %v9447_v48 = vsub.s32 0, %v9358_v13 }
 0x325   :  { %6754 = vmatmul.mubr.msk.f32.gmra.mrb[14].mxu1 %vm1274_vm11, %v1200_v57  ;;  %6758 = vmatmul.mubr.msk.f32.gmra.mrb[14].mxu0 %vm1274_vm11, %v1200_v57 }
 0x326   :  { %1512 = vmatprep.mubr.f32.mxu1 %v11469_v63 }
 0x327   :  { %7614 = vmatpush3.bf16.msra.mxu0 %v8980_v55  ;;  %v11417_v55 = vsub.s32 2, %v9358_v13 }
 0x328   :  { %7616 = vmatprep.subr.bf16.mxu0 %v8983_v56  ;;  %v1201_v56 = vld [vmem:[#allocation8] sm:$0x3f] }
 0x329   :  { %6761 = vmatmul.mubr.msk.f32.vlgmr.msra.gmra.mrb[16].mxu1 %vm1274_vm11, %v1199_v28 }
 0x32a   :  { %1518 = vmatprep.mubr.f32.mxu1 %v11469_v63  ;;  %7642 = vmatpush3.bf16.msra.mxu1 %v9197_v8 }
 0x32b   :  { %7644 = vmatprep.subr.bf16.mxu1 %v9201_v10  ;;  %7618 = vmatpush3.bf16.msra.mxu0 %v8998_v62  ;;  %v9451_v62 = vsub.s32 1, %v9358_v13 }
 0x32c   :  { %7620 = vmatprep.subr.bf16.mxu0 %v9001_v0  ;;  %v11416_v0 = vsub.s32 3, %v9358_v13 }
 0x32d   :  { %6762 = vmatmul.mubr.msk.f32.gmra.mrb[18].mxu1 %vm1274_vm11, %v1200_v57 }
 0x32e   :  { %7646 = vmatpush3.bf16.msra.mxu1 %v9223_v20 }
 0x32f   :  { %7648 = vmatprep.subr.bf16.mxu1 %v9226_v21  ;;  %7622 = vmatpush3.bf16.msra.mxu0 %v9016_v5  ;;  %v1206_v5 = vrot.slane %v1201_v56, %v9447_v48 }
 0x330   :  { %7624 = vmatprep.subr.bf16.mxu0 %v9019_v6  ;;  %v1214_v6 = vrot.slane %v1201_v56, %v11417_v55 }
 0x331   :  { %v1239_v61 = vmul.f32 %v1206_v5, %v9210_v15 }
 0x332   :  { %7650 = vmatpush3.bf16.msra.mxu1 %v9242_v31 }
 0x333   :  { %7652 = vmatprep.subr.bf16.mxu1 %v9245_v32  ;;  %7626 = vmatpush3.bf16.msra.mxu0 %v9034_v11  ;;  %v1210_v11 = vrot.slane %v1201_v56, %v9451_v62 }
 0x334   :  { %7628 = vmatprep.subr.bf16.mxu0 %v9038_v12  ;;  %v1218_v12 = vrot.slane %v1201_v56, %v11416_v0 }
 0x335   :  { %v1240_v10 = vmul.f32 %v1210_v11, %v9219_v19 }
 0x336   :  { %7654 = vmatpush3.bf16.msra.mxu1 %v9260_v41  ;;  %v1236_v29 = vmul.f32 %v1218_v12, %v9332_v38  ;;  %v1242_v20 = vmul.f32 %v1218_v12, %v9337_v45  ;;  %v11472_v45 = vld [vmem:[#allocation23_spill] sm:$0xff] }
 0x337   :  { %7656 = vmatprep.subr.bf16.mxu1 %v9263_v42  ;;  %7630 = vmatpush3.bf16.msra.mxu0 %v9053_v16  ;;  %v1233_v16 = vmul.f32 %v1206_v5, %v9195_v7  ;;  %v1241_v7 = vmul.f32 %v1214_v6, %v9334_v39 }
 0x338   :  { %7632 = vmatprep.subr.bf16.mxu0 %v9056_v17  ;;  %v1235_v17 = vmul.f32 %v1214_v6, %v9330_v35 }
 0x33a   :  { %7658 = vmatpush3.bf16.msra.mxu1 %v9278_v53 }
 0x33b   :  { %7660 = vmatprep.subr.bf16.mxu1 %v9281_v54  ;;  %7634 = vmatpush3.bf16.msra.mxu0 %v9071_v22  ;;  %v11415_v22 = vsub.s32 4, %v9358_v13 }
 0x33c   :  { %7636 = vmatprep.subr.bf16.mxu0 %v9074_v23  ;;  %v11414_v23 = vsub.s32 5, %v9358_v13 }
 0x33d   :  { %v1222_v8 = vrot.slane %v1201_v56, %v11415_v22 }
 0x33e   :  { %7662 = vmatpush3.bf16.msra.mxu1 %v9296_v3 }
 0x33f   :  { %7664 = vmatprep.subr.bf16.mxu1 %v9299_v4  ;;  %7638 = vmatpush3.bf16.msra.mxu0 %v9084_v26  ;;  %v1234_v26 = vmul.f32 %v1210_v11, %v9199_v9  ;;  %v1226_v9 = vrot.slane %v1201_v56, %v11414_v23  ;;  %v1243_v50 = vmul.f32 %v1222_v8, %v11475_v14  ;;  %v11477_v56 = vld [vmem:[#allocation24_spill] sm:$0xff]  ;;  %v11506_v23 = vld [vmem:[#allocation35_spill] sm:$0xff] }
 0x340   :  { %7671 = vmatprep.subr.bf16.mxu0 %v11470_v44 }
 0x341   :  { %v1244_v37 = vmul.f32 %v1226_v9, %v11476_v27  ;;  %v11486_v27 = vld [vmem:[#allocation39_spill] sm:$0xff] }
 0x342   :  { %7666 = vmatpush3.bf16.msra.mxu1 %v9314_v24 }
 0x343   :  { %7668 = vmatprep.subr.bf16.mxu1 %v9317_v25  ;;  %v1237_v25 = vmul.f32 %v1222_v8, %v9343_v46 }
 0x346   :  { %7670 = vmatpush3.bf16.msra.mxu1 %v9326_v34  ;;  %v11471_v34 = vld [vmem:[#allocation32_spill] sm:$0xff] }
 0x347   :  { %6765 = vmatprep.subr.msk.mxu1 %vm1281_vm10, %v9374_v1  ;;  %v1238_v35 = vmul.f32 %v1226_v9, %v11471_v34  ;;  %v11474_v1 = vld [vmem:[#allocation38_spill] sm:$0xff] }
 0x3f4   :  { %v1360_v30 = vpop.f32.mrb[12].mxu1  ;;  %v1437_v33 = vpop.f32.mrb[12].mxu0 }
 0x3f5   :  { %v9466_v36 = vsub.f32 %v1233_v16, %v1360_v30  ;;  %v9468_v40 = vsub.f32 %v1235_v17, %v1437_v33  ;;  %v1362_v43 = vpop.f32.mrb[13].mxu1  ;;  %v1439_v47 = vpop.f32.mrb[13].mxu0  ;;  %v11478_v16 = vld [vmem:[#allocation25_spill] sm:$0xff]  ;;  %v11479_v17 = vld [vmem:[#allocation26_spill] sm:$0xff] }
 0x3f6   :  { %v9470_v52 = vsub.f32 %v1234_v26, %v1362_v43  ;;  %v9472_v60 = vsub.f32 %v1236_v29, %v1439_v47  ;;  %v11480_v26 = vld [vmem:[#allocation27_spill] sm:$0xff]  ;;  %v11481_v29 = vld [vmem:[#allocation28_spill] sm:$0xff]  ;;  %v11482_v30 = vld [vmem:[#allocation29_spill] sm:$0xff] }
 0x3f7   :  { %v1537_v41 = vmul.f32 %v9466_v36, %v9466_v36  ;;  %v1539_v42 = vmul.f32 %v9468_v40, %v9468_v40  ;;  %v11483_v33 = vld [vmem:[#allocation30_spill] sm:$0xff] }
 0x3f8   :  { %v1538_v21 = vmul.f32 %v9470_v52, %v9470_v52  ;;  %v1540_v31 = vmul.f32 %v9472_v60, %v9472_v60  ;;  %v1366_v32 = vpop.f32.mrb[14].mxu1  ;;  %v1443_v15 = vpop.f32.mrb[14].mxu0 }
 0x3f9   :  { %v9490_v53 = vsub.f32 %v1239_v61, %v1366_v32  ;;  %v9492_v54 = vsub.f32 %v1241_v7, %v1443_v15  ;;  %v1368_v19 = vpop.f32.mrb[15].mxu1  ;;  %v1445_v3 = vpop.f32.mrb[15].mxu0  ;;  %v11484_v61 = vld [vmem:[#allocation31_spill] sm:$0xff] }
 0x3fa   :  { %v9494_v4 = vsub.f32 %v1240_v10, %v1368_v19  ;;  %v9496_v24 = vsub.f32 %v1242_v20, %v1445_v3  ;;  %1619 = vmatprep.mubr.f32.mxu0 %v1538_v21  ;;  %1694 = vmatprep.mubr.f32.mxu1 %v1540_v31 }
 0x3fb   :  { %1620 = vmatmul.mubr.f32.vlgmr.msra.gmra.mrb[16].mxu0 %v1537_v41  ;;  %1695 = vmatmul.mubr.f32.vlgmr.msra.gmra.mrb[20].mxu1 %v1539_v42  ;;  %v1543_v58 = vmul.f32 %v9490_v53, %v9490_v53  ;;  %v1545_v46 = vmul.f32 %v9492_v54, %v9492_v54 }
 0x3fc   :  { %v1544_v38 = vmul.f32 %v9494_v4, %v9494_v4  ;;  %v1546_v39 = vmul.f32 %v9496_v24, %v9496_v24  ;;  %7673 = vmatpush1.bf16.msra.mxu0 %v11472_v45  ;;  %v1514_v49 = vpop.f32.mrb[16].mxu1  ;;  %6766 = vmatpush1.msk.msra.mxu1 %vm1281_vm10, %v11473_v51 }
 0x3fd   :  { %v9511_v18 = vsub.f32 %v1237_v25, %v1514_v49  ;;  %v1516_v28 = vpop.f32.mrb[17].mxu1  ;;  %7674 = vmatprep.subr.bf16.mxu0 %v11470_v44  ;;  %6769 = vmatprep.subr.msk.mxu1 %vm1281_vm10, %v11474_v1 }
 0x3fe   :  { %v9516_v59 = vsub.f32 %v1238_v35, %v1516_v28  ;;  %1624 = vmatprep.mubr.f32.mxu0 %v1544_v38  ;;  %1699 = vmatprep.mubr.f32.mxu1 %v1546_v39 }
 0x3ff   :  { %1625 = vmatmul.mubr.f32.gmra.mrb[18].mxu0 %v1543_v58  ;;  %1700 = vmatmul.mubr.f32.gmra.mrb[22].mxu1 %v1545_v46  ;;  %v1541_v43 = vmul.f32 %v9511_v18, %v9511_v18 }
 0x400   :  { %v1542_v57 = vmul.f32 %v9516_v59, %v9516_v59  ;;  %7676 = vmatpush1.bf16.msra.mxu0 %v11477_v56  ;;  %v1520_v5 = vpop.f32.mrb[18].mxu1  ;;  %1856 = vmatprep.mubr.f32.mxu1 %v11469_v63 }
 0x401   :  { %v9524_v6 = vsub.f32 %v1243_v50, %v1520_v5  ;;  %v1522_v11 = vpop.f32.mrb[19].mxu1  ;;  %7677 = vmatprep.subr.bf16.mxu0 %v11470_v44  ;;  %v11485_v50 = vld [vmem:[#allocation37_spill] sm:$0xff] }
 0x402   :  { %v9527_v12 = vsub.f32 %v1244_v37, %v1522_v11  ;;  %6763 = vmatprep.mubr.msk.f32.mxu0 %vm207_vm0, %v1542_v57  ;;  %v11413_v57 = vmov 0  }
 0x403   :  { %v1547_v7 = vmul.f32 %v9524_v6, %v9524_v6  ;;  %2048 = vst.msk [vmem:[#allocation5] sm:$0xff] %vm2047_vm12, %v11413_v57 }
 0x404   :  { %7679 = vmatpush1.bf16.msra.mxu0 %v11478_v16  ;;  %v1548_v47 = vmul.f32 %v9527_v12, %v9527_v12  ;;  %2050 = vst.msk [vmem:[#allocation5 + $0x28] sm:$0xff] %vm2049_vm13, %v11413_v57  ;;  %vm6544_vm13 = vcmask 523264  }
 0x405   :  { %7680 = vmatprep.subr.bf16.mxu0 %v11470_v44 }
 0x408   :  { %7682 = vmatpush1.bf16.msra.mxu0 %v11479_v17 }
 0x409   :  { %7683 = vmatprep.subr.bf16.mxu0 %v11470_v44 }
 0x40c   :  { %7685 = vmatpush1.bf16.msra.mxu0 %v11480_v26 }
 0x40d   :  { %7686 = vmatprep.subr.bf16.mxu0 %v11470_v44 }
 0x410   :  { %7688 = vmatpush1.bf16.msra.mxu0 %v11481_v29 }
 0x411   :  { %7689 = vmatprep.subr.bf16.mxu0 %v11470_v44 }
 0x414   :  { %7691 = vmatpush1.bf16.msra.mxu0 %v11482_v30 }
 0x415   :  { %7692 = vmatprep.subr.bf16.mxu0 %v11470_v44 }
 0x418   :  { %7694 = vmatpush1.bf16.msra.mxu0 %v11483_v33 }
 0x419   :  { %1737 = vmatprep.subr.mxu0 %v11469_v63 }
 0x41c   :  { %1738 = vmatpush1.msra.mxu0 %v11484_v61 }
 0x41d   :  { %1770 = vmatmul.mubr.f32.vlgmr.msra.gmra.mrb[20].mxu0 %v1541_v43 }
 0x41e   :  { %6764 = vmatprep.mubr.msk.f32.mxu0 %vm207_vm0, %v1548_v47 }
 0x421   :  { %1775 = vmatmul.mubr.f32.gmra.mrb[22].mxu0 %v1547_v7 }
 0x4ce   :  { %v7127_v8 = vpop.f32.mrb[16].mxu0  ;;  %v7165_v9 = vpop.f32.mrb[20].mxu1 }
 0x4cf   :  { %v7128_v10 = vpop.f32.mrb[17].mxu0  ;;  %v7166_v20 = vpop.f32.mrb[21].mxu1 }
 0x4d0   :  { %v7129_v21 = vadd.f32 %v7128_v10, %v7127_v8  ;;  %v7167_v31 = vadd.f32 %v7166_v20, %v7165_v9 }
 0x4d2   :  { %v7130_v32 = vpop.f32.mrb[18].mxu0  ;;  %v7168_v15 = vpop.f32.mrb[22].mxu1  ;;  %v1697_v41 = vadd.f32 %v7167_v31, %v7129_v21 }
 0x4d3   :  { %v7131_v42 = vpop.f32.mrb[19].mxu0  ;;  %v7169_v19 = vpop.f32.mrb[23].mxu1 }
 0x4d4   :  { %v7132_v3 = vadd.f32 %v7131_v42, %v7130_v32  ;;  %v7170_v25 = vadd.f32 %v7169_v19, %v7168_v15 }
 0x4d6   :  { %v1702_v34 = vadd.f32 %v7170_v25, %v7132_v3 }
 0x4f0   :  { %v1771_v35 = vpop.f32.mrb[20].mxu0 }
 0x4f1   :  { %v1772_v38 = vadd.f32 %v1771_v35, %v1697_v41  ;;  %v1773_v39 = vpop.f32.mrb[21].mxu0 }
 0x4f3   :  { %v1780_v45 = vmul.f32 0.00390625, %v1772_v38 }
 0x4f4   :  { %v1776_v49 = vpop.f32.mrb[22].mxu0 }
 0x4f5   :  { %v1782_v51 = vadd.f32 1e-05, %v1780_v45  ;;  %v1777_v58 = vadd.f32 %v1776_v49, %v1702_v34  ;;  %v1778_v46 = vpop.f32.mrb[23].mxu0 }
 0x4f7   :  { %8342 = vrsqrt.f32 %v1782_v51  ;;  %v1781_v28 = vmul.f32 0.00390625, %v1777_v58 }
 0x4f9   :  { %v1783_v1 = vadd.f32 1e-05, %v1781_v28 }
 0x4fb   :  { %8344 = vrsqrt.f32 %v1783_v1 }
 0x501   :  { %v8343_v14 = vpop.eup %8342 }
 0x502   :  { %6767 = vmatmul.mubr.msk.f32.vlgmr.msra.gmra.mrb[24].mxu1 %vm1274_vm11, %v8343_v14 }
 0x503   :  { %1862 = vmatprep.mubr.f32.mxu1 %v11469_v63  ;;  %6770 = vmatpush1.msk.msra.mxu1 %vm1281_vm10, %v11485_v50 }
 0x504   :  { %6773 = vmatprep.subr.msk.mxu1 %vm1281_vm10, %v11486_v27 }
 0x505   :  { %v8345_v37 = vpop.eup %8344 }
 0x506   :  { %6768 = vmatmul.mubr.msk.f32.gmra.mrb[26].mxu1 %vm1274_vm11, %v8345_v37 }
 0x507   :  { %1933 = vmatprep.mubr.f32.mxu1 %v11469_v63 }
 0x50a   :  { %6771 = vmatmul.mubr.msk.f32.vlgmr.msra.gmra.mrb[28].mxu1 %vm1274_vm11, %v8343_v14 }
 0x50b   :  { %1939 = vmatprep.mubr.f32.mxu1 %v11469_v63  ;;  %6774 = vmatpush1.msk.msra.mxu1 %vm1281_vm10, %v9392_v2 }
 0x50e   :  { %6772 = vmatmul.mubr.msk.f32.gmra.mrb[30].mxu1 %vm1274_vm11, %v8345_v37 }
 0x50f   :  { %2010 = vmatprep.mubr.f32.mxu1 %v11469_v63 }
 0x512   :  { %6775 = vmatmul.mubr.msk.f32.vlgmr.msra.gmra.mrb[32].mxu1 %vm1274_vm11, %v8343_v14 }
 0x513   :  { %2016 = vmatprep.mubr.f32.mxu1 %v11469_v63 }
 0x516   :  { %6776 = vmatmul.mubr.msk.f32.gmra.mrb[34].mxu1 %vm1274_vm11, %v8345_v37 }
 0x5d5   :  { %v1858_v56 = vpop.f32.mrb[24].mxu1 }
 0x5d6   :  { %v1860_v5 = vpop.f32.mrb[25].mxu1  ;;  %v2023_v11 = vmul.f32 %v1858_v56, %v9466_v36 }
 0x5d7   :  { %v2024_v2 = vmul.f32 %v1860_v5, %v9470_v52  ;;  %v9623_v5 = vld [vmem:[%s11487_s1 + $0x4] ss:$8 sps:$4 sm:$0xff]  }
 0x5d8   :  { %v2035_v30 = vmax.f32 %v2023_v11, 0.0  ;;  %6779 = vmatprep.mubr.msk.bf16.mxu1 %vm754_vm1, %v9623_v5  ;;  %6780 = vmatprep.mubr.msk.bf16.mxu0 %vm754_vm1, %v9623_v5 }
 0x5d9   :  { %v1864_v16 = vpop.f32.mrb[26].mxu1  ;;  %v2036_v43 = vmax.f32 %v2024_v2, 0.0 }
 0x5da   :  { %v2029_v17 = vmul.f32 %v1864_v16, %v9490_v53  ;;  %v1866_v26 = vpop.f32.mrb[27].mxu1 }
 0x5db   :  { %v2030_v29 = vmul.f32 %v1866_v26, %v9494_v4 }
 0x5dc   :  { %v2041_v33 = vmax.f32 %v2029_v17, 0.0 }
 0x5dd   :  { %v2042_v47 = vmax.f32 %v2030_v29, 0.0  ;;  %v1935_v61 = vpop.f32.mrb[28].mxu1 }
 0x5de   :  { %v2051_v7 = vpack.c.bf16 %v2041_v33, %v2035_v30  ;;  %v1937_v8 = vpop.f32.mrb[29].mxu1  ;;  %v2025_v10 = vmul.f32 %v1935_v61, %v9468_v40 }
 0x5df   :  { %v2052_v9 = vpack.c.bf16 %v2042_v47, %v2036_v43  ;;  %v2026_v36 = vmul.f32 %v1937_v8, %v9472_v60 }
 0x5e0   :  { %2063 = vrot.lane.b32.xlu0 %v2051_v7, %s8545_s16  ;;  %v2037_v21 = vmax.f32 %v2025_v10, 0.0 }
 0x5e1   :  { %2065 = vrot.lane.b32.xlu1 %v2052_v9, %s8545_s16  ;;  %v1941_v52 = vpop.f32.mrb[30].mxu1  ;;  %v2038_v32 = vmax.f32 %v2026_v36, 0.0 }
 0x5e2   :  { %v2031_v53 = vmul.f32 %v1941_v52, %v9492_v54  ;;  %v1943_v4 = vpop.f32.mrb[31].mxu1 }
 0x5e3   :  { %v2032_v20 = vmul.f32 %v1943_v4, %v9496_v24 }
 0x5e4   :  { %v2043_v31 = vmax.f32 %v2031_v53, 0.0 }
 0x5e5   :  { %v2044_v40 = vmax.f32 %v2032_v20, 0.0  ;;  %v2012_v15 = vpop.f32.mrb[32].mxu1 }
 0x5e6   :  { %v2053_v41 = vpack.c.bf16 %v2043_v31, %v2037_v21  ;;  %v2014_v42 = vpop.f32.mrb[33].mxu1  ;;  %v2027_v60 = vmul.f32 %v2012_v15, %v9511_v18 }
 0x5e7   :  { %v2054_v19 = vpack.c.bf16 %v2044_v40, %v2038_v32  ;;  %v2028_v54 = vmul.f32 %v2014_v42, %v9516_v59 }
 0x5e8   :  { %2067 = vrot.lane.b32.xlu0 %v2053_v41, %s8545_s16  ;;  %v2039_v35 = vmax.f32 %v2027_v60, 0.0 }
 0x5e9   :  { %2069 = vrot.lane.b32.xlu1 %v2054_v19, %s8545_s16  ;;  %v2018_v24 = vpop.f32.mrb[34].mxu1  ;;  %v2040_v39 = vmax.f32 %v2028_v54, 0.0 }
 0x5ea   :  { %v2033_v3 = vmul.f32 %v2018_v24, %v9524_v6  ;;  %v2020_v25 = vpop.f32.mrb[35].mxu1 }
 0x5eb   :  { %v2034_v34 = vmul.f32 %v2020_v25, %v9527_v12 }
 0x5ec   :  { %v2045_v38 = vmax.f32 %v2033_v3, 0.0 }
 0x5ed   :  { %v2046_v45 = vmax.f32 %v2034_v34, 0.0 }
 0x5ee   :  { %v2055_v49 = vpack.c.bf16 %v2045_v38, %v2039_v35 }
 0x5ef   :  { %v2056_v51 = vpack.c.bf16 %v2046_v45, %v2040_v39 }
 0x5f0   :  { %2071 = vrot.lane.b32.xlu0 %v2055_v49, %s8545_s16 }
 0x5f1   :  { %2073 = vrot.lane.b32.xlu1 %v2056_v51, %s8545_s16 }
 0x652   :  { %v2064_v18 = vpop.permute.xlu0 %2063 }
 0x653   :  { %2088 = vst.msk [vmem:[#allocation5] sm:$0xff] %vm2087_vm14, %v2064_v18  ;;  %v2066_v59 = vpop.permute.xlu1 %2065 }
 0x654   :  { %v2076_v58 = vsel %vm2047_vm12, %v2064_v18, %v2066_v59 }
 0x655   :  { %2503 = vmatprep.subr.bf16.mxu1 %v2076_v58 }
 0x65a   :  { %v2095_v6 = vld [vmem:[#allocation5] sm:$0xff]  ;;  %v2068_v46 = vpop.permute.xlu0 %2067 }
 0x65b   :  { %v2077_v12 = vsel %vm2047_vm12, %v2066_v59, %v2068_v46  ;;  %v2070_v28 = vpop.permute.xlu1 %2069  ;;  %2119 = vrot.lane.b32.xlu0 %v2095_v6, %s8533_s30  ;;  %2160 = vrot.lane.b32.xlu1 %v2095_v6, %s8534_s5 }
 0x65c   :  { %v2078_v1 = vsel %vm2047_vm12, %v2068_v46, %v2070_v28  ;;  %2504 = vmatpush1.bf16.msra.mxu1 %v2095_v6 }
 0x65d   :  { %2546 = vmatprep.subr.bf16.mxu0 %v2078_v1 }
 0x65e   :  { %2547 = vmatpush1.bf16.msra.mxu0 %v2077_v12 }
 0x65f   :  { %2201 = vrot.lane.b32.xlu0 %v2095_v6, %s8535_s27  ;;  %2242 = vrot.lane.b32.xlu1 %v2095_v6, %s8536_s6 }
 0x662   :  { %v2072_v14 = vpop.permute.xlu0 %2071 }
 0x663   :  { %v9596_v50 = vsel %vm2047_vm12, %v2070_v28, %v2072_v14  ;;  %2283 = vrot.lane.b32.xlu0 %v2095_v6, %s8537_s15  ;;  %2324 = vrot.lane.b32.xlu1 %v2095_v6, %s8538_s13  ;;  %v2074_v27 = vpop.permute.xlu1 %2073 }
 0x664   :  { %v2080_v37 = vsel %vm2047_vm12, %v2072_v14, %v2074_v27  ;;  %vm4666_vm12 = vcmask 867328  }
 0x665   :  { %2094 = vst.msk [vmem:[#allocation5 + $0x28] sm:$0xff] %vm2093_vm15, %v2080_v37  ;;  %vm6679_vm15 = vcmask 253952  }
 0x667   :  { %2365 = vrot.lane.b32.xlu0 %v2095_v6, %s8539_s14  ;;  %2162 = vrot.lane.b32.xlu1 %v2076_v58, %s8534_s5 }
 0x66b   :  { %2121 = vrot.lane.b32.xlu0 %v2076_v58, %s8533_s30  ;;  %2244 = vrot.lane.b32.xlu1 %v2076_v58, %s8536_s6 }
 0x66c   :  { %v2153_v56 = vld [vmem:[#allocation5 + $0x28] sm:$0xff] }
 0x66d   :  { %2106 = vst.msk [vmem:[#allocation3 + $0x28] sm:$0xff] %vm207_vm0, %v2153_v56 }
 0x66f   :  { %2203 = vrot.lane.b32.xlu0 %v2076_v58, %s8535_s27  ;;  %2326 = vrot.lane.b32.xlu1 %v2076_v58, %s8538_s13 }
 0x673   :  { %2285 = vrot.lane.b32.xlu0 %v2076_v58, %s8537_s15  ;;  %2408 = vrot.lane.b32.xlu1 %v2076_v58, %s8540_s29 }
 0x677   :  { %2367 = vrot.lane.b32.xlu0 %v2076_v58, %s8539_s14  ;;  %2123 = vrot.lane.b32.xlu1 %v2077_v12, %s8533_s30 }
 0x67b   :  { %2164 = vrot.lane.b32.xlu0 %v2077_v12, %s8534_s5  ;;  %2406 = vrot.lane.b32.xlu1 %v2095_v6, %s8540_s29 }
 0x67f   :  { %2246 = vrot.lane.b32.xlu0 %v2077_v12, %s8536_s6  ;;  %2205 = vrot.lane.b32.xlu1 %v2077_v12, %s8535_s27 }
 0x683   :  { %2328 = vrot.lane.b32.xlu0 %v2077_v12, %s8538_s13  ;;  %2287 = vrot.lane.b32.xlu1 %v2077_v12, %s8537_s15 }
 0x687   :  { %2410 = vrot.lane.b32.xlu0 %v2077_v12, %s8540_s29  ;;  %2369 = vrot.lane.b32.xlu1 %v2077_v12, %s8539_s14 }
 0x68b   :  { %2125 = vrot.lane.b32.xlu0 %v2078_v1, %s8533_s30  ;;  %2207 = vrot.lane.b32.xlu1 %v2078_v1, %s8535_s27 }
 0x68f   :  { %2166 = vrot.lane.b32.xlu0 %v2078_v1, %s8534_s5  ;;  %2289 = vrot.lane.b32.xlu1 %v2078_v1, %s8537_s15 }
 0x693   :  { %2248 = vrot.lane.b32.xlu0 %v2078_v1, %s8536_s6  ;;  %2127 = vrot.lane.b32.xlu1 %v9596_v50, %s8533_s30 }
 0x697   :  { %2209 = vrot.lane.b32.xlu0 %v9596_v50, %s8535_s27  ;;  %2168 = vrot.lane.b32.xlu1 %v9596_v50, %s8534_s5 }
 0x69b   :  { %2291 = vrot.lane.b32.xlu0 %v9596_v50, %s8537_s15  ;;  %2250 = vrot.lane.b32.xlu1 %v9596_v50, %s8536_s6 }
 0x69f   :  { %2170 = vrot.lane.b32.xlu1 %v2153_v56, %s8534_s5  ;;  %2129 = vrot.lane.b32.xlu0 %v2153_v56, %s8533_s30 }
 0x6a3   :  { %2332 = vrot.lane.b32.xlu1 %v9596_v50, %s8538_s13  ;;  %2330 = vrot.lane.b32.xlu0 %v2078_v1, %s8538_s13 }
 0x6a7   :  { %2252 = vrot.lane.b32.xlu1 %v2153_v56, %s8536_s6  ;;  %2211 = vrot.lane.b32.xlu0 %v2153_v56, %s8535_s27 }
 0x6ab   :  { %2371 = vrot.lane.b32.xlu1 %v2078_v1, %s8539_s14  ;;  %2373 = vrot.lane.b32.xlu0 %v9596_v50, %s8539_s14 }
 0x6af   :  { %2334 = vrot.lane.b32.xlu1 %v2153_v56, %s8538_s13  ;;  %2293 = vrot.lane.b32.xlu0 %v2153_v56, %s8537_s15 }
 0x6b3   :  { %2414 = vrot.lane.b32.xlu1 %v9596_v50, %s8540_s29  ;;  %2412 = vrot.lane.b32.xlu0 %v2078_v1, %s8540_s29 }
 0x6b7   :  { %2416 = vrot.lane.b32.xlu1 %v2153_v56, %s8540_s29  ;;  %2375 = vrot.lane.b32.xlu0 %v2153_v56, %s8539_s14 }
 0x6cd   :  { %v2120_v11 = vpop.permute.xlu0 %2119  ;;  %v2161_v2 = vpop.permute.xlu1 %2160 }
 0x6d1   :  { %v2202_v16 = vpop.permute.xlu0 %2201  ;;  %v2243_v17 = vpop.permute.xlu1 %2242 }
 0x6d5   :  { %v2284_v26 = vpop.permute.xlu0 %2283  ;;  %v2325_v29 = vpop.permute.xlu1 %2324 }
 0x6d9   :  { %v2366_v30 = vpop.permute.xlu0 %2365  ;;  %v2163_v33 = vpop.permute.xlu1 %2162 }
 0x6da   :  { %v2172_v43 = vsel %vm311_vm3, %v2161_v2, %v2163_v33  ;;  %v2442_v2 = vld [vmem:[#allocation3 + $0x28] sm:$0xff] }
 0x6dd   :  { %v2122_v47 = vpop.permute.xlu0 %2121  ;;  %v2245_v61 = vpop.permute.xlu1 %2244 }
 0x6de   :  { %v2131_v7 = vsel %vm251_vm2, %v2120_v11, %v2122_v47  ;;  %v2254_v8 = vsel %vm431_vm5, %v2243_v17, %v2245_v61  ;;  %v9692_v11 = vld [vmem:[%s11487_s1] ss:$8 sps:$4 sm:$0xff]  }
 0x6e1   :  { %v2204_v9 = vpop.permute.xlu0 %2203  ;;  %v2327_v10 = vpop.permute.xlu1 %2326 }
 0x6e2   :  { %v2213_v36 = vsel %vm371_vm4, %v2202_v16, %v2204_v9  ;;  %v2336_v52 = vsel %vm551_vm7, %v2325_v29, %v2327_v10 }
 0x6e5   :  { %v2286_v53 = vpop.permute.xlu0 %2285  ;;  %v2409_v4 = vpop.permute.xlu1 %2408 }
 0x6e6   :  { %v2295_v20 = vsel %vm491_vm6, %v2284_v26, %v2286_v53 }
 0x6e9   :  { %v2368_v21 = vpop.permute.xlu0 %2367  ;;  %v2124_v31 = vpop.permute.xlu1 %2123 }
 0x6ea   :  { %v2377_v32 = vsel %vm611_vm8, %v2366_v30, %v2368_v21  ;;  %v2132_v40 = vsel %vm251_vm2, %v2122_v47, %v2124_v31 }
 0x6eb   :  { %2505 = vmatprep.subr.bf16.mxu1 %v2132_v40 }
 0x6ec   :  { %2506 = vmatpush1.bf16.msra.mxu1 %v2131_v7 }
 0x6ed   :  { %v2165_v15 = vpop.permute.xlu0 %2164  ;;  %v2407_v41 = vpop.permute.xlu1 %2406 }
 0x6ee   :  { %v2173_v42 = vsel %vm311_vm3, %v2163_v33, %v2165_v15  ;;  %v2418_v19 = vsel %vm671_vm9, %v2407_v41, %v2409_v4 }
 0x6ef   :  { %2507 = vmatprep.subr.bf16.mxu1 %v2173_v42 }
 0x6f0   :  { %2508 = vmatpush1.bf16.msra.mxu1 %v2172_v43 }
 0x6f1   :  { %v2247_v60 = vpop.permute.xlu0 %2246  ;;  %v2206_v54 = vpop.permute.xlu1 %2205 }
 0x6f2   :  { %v2255_v24 = vsel %vm431_vm5, %v2245_v61, %v2247_v60  ;;  %v2214_v3 = vsel %vm371_vm4, %v2204_v9, %v2206_v54 }
 0x6f3   :  { %2509 = vmatprep.subr.bf16.mxu1 %v2214_v3  ;;  %v2648_v3 = vld [vmem:[%s11488_s4 + $0x80] sm:$0xff] }
 0x6f4   :  { %2510 = vmatpush1.bf16.msra.mxu1 %v2213_v36 }
 0x6f5   :  { %v2329_v25 = vpop.permute.xlu0 %2328  ;;  %v2288_v34 = vpop.permute.xlu1 %2287  ;;  %2511 = vmatprep.subr.bf16.mxu1 %v2255_v24 }
 0x6f6   :  { %v2337_v35 = vsel %vm551_vm7, %v2327_v10, %v2329_v25  ;;  %v2296_v38 = vsel %vm491_vm6, %v2286_v53, %v2288_v34 }
 0x6f8   :  { %2512 = vmatpush1.bf16.msra.mxu1 %v2254_v8 }
 0x6f9   :  { %v9675_v39 = vpop.permute.xlu0 %2410  ;;  %v9677_v45 = vpop.permute.xlu1 %2369  ;;  %2513 = vmatprep.subr.bf16.mxu1 %v2296_v38 }
 0x6fa   :  { %v2419_v49 = vsel %vm671_vm9, %v2409_v4, %v9675_v39  ;;  %v2378_v51 = vsel %vm611_vm8, %v2368_v21, %v9677_v45 }
 0x6fc   :  { %2514 = vmatpush1.bf16.msra.mxu1 %v2295_v20 }
 0x6fd   :  { %v2126_v18 = vpop.permute.xlu0 %2125  ;;  %v2208_v59 = vpop.permute.xlu1 %2207  ;;  %2515 = vmatprep.subr.bf16.mxu1 %v2337_v35 }
 0x6fe   :  { %v2133_v58 = vsel %vm251_vm2, %v2124_v31, %v2126_v18  ;;  %v2215_v6 = vsel %vm371_vm4, %v2206_v54, %v2208_v59 }
 0x700   :  { %2516 = vmatpush1.bf16.msra.mxu1 %v2336_v52 }
 0x701   :  { %v2167_v46 = vpop.permute.xlu0 %2166  ;;  %v2290_v12 = vpop.permute.xlu1 %2289  ;;  %2517 = vmatprep.subr.bf16.mxu1 %v2378_v51  ;;  %v2633_v51 = vld [vmem:[%s11488_s4 + $0x8] sm:$0xff] }
 0x702   :  { %v2174_v28 = vsel %vm311_vm3, %v2165_v15, %v2167_v46  ;;  %v2297_v1 = vsel %vm491_vm6, %v2288_v34, %v2290_v12 }
 0x704   :  { %2518 = vmatpush1.bf16.msra.mxu1 %v2377_v32 }
 0x705   :  { %v2249_v14 = vpop.permute.xlu0 %2248  ;;  %v2128_v27 = vpop.permute.xlu1 %2127  ;;  %2519 = vmatprep.subr.bf16.mxu1 %v2419_v49  ;;  %v2632_v49 = vld [vmem:[%s11488_s4] sm:$0xff] }
 0x706   :  { %v2256_v37 = vsel %vm431_vm5, %v2247_v60, %v2249_v14  ;;  %v2134_v56 = vsel %vm251_vm2, %v2126_v18, %v2128_v27 }
 0x707   :  { %2548 = vmatprep.subr.bf16.mxu0 %v2134_v56 }
 0x708   :  { %2520 = vmatpush1.bf16.msra.mxu1 %v2418_v19  ;;  %2549 = vmatpush1.bf16.msra.mxu0 %v2133_v58  ;;  %v2650_v58 = vld [vmem:[%s11488_s4 + $0x90] sm:$0xff] }
 0x709   :  { %v2210_v16 = vpop.permute.xlu0 %2209  ;;  %v2169_v17 = vpop.permute.xlu1 %2168  ;;  %2589 = vmatprep.subr.bf16.mxu1 %v2442_v2  ;;  %v2652_v2 = vld [vmem:[%s11488_s4 + $0xa0] sm:$0xff] }
 0x70a   :  { %v2216_v26 = vsel %vm371_vm4, %v2208_v59, %v2210_v16  ;;  %v2175_v29 = vsel %vm311_vm3, %v2167_v46, %v2169_v17  ;;  %v9742_v46 = vpack.c.bf16 %v2633_v51, %v2632_v49  ;;  %v2647_v49 = vld [vmem:[%s11488_s4 + $0x78] sm:$0xff]  ;;  %v2680_v51 = vld [vmem:[%s11488_s4 + $0x180] sm:$0xff] }
 0x70b   :  { %2536 = vmatmul.mubr.bf16.vlgmr.msra.gmra.mrb[36].mxu1 %v9692_v11  ;;  %2550 = vmatprep.subr.bf16.mxu0 %v2175_v29 }
 0x70c   :  { %2551 = vmatpush1.bf16.msra.mxu0 %v2174_v28  ;;  %2590 = vmatpush1.bf16.msra.mxu1 %v9596_v50 }
 0x70d   :  { %v2292_v30 = vpop.permute.xlu0 %2291  ;;  %v2251_v33 = vpop.permute.xlu1 %2250  ;;  %2552 = vmatprep.subr.bf16.mxu0 %v2216_v26  ;;  %6781 = vmatprep.mubr.msk.bf16.mxu1 %vm754_vm1, %v9623_v5 }
 0x70e   :  { %v2298_v43 = vsel %vm491_vm6, %v2290_v12, %v2292_v30  ;;  %v2257_v47 = vsel %vm431_vm5, %v2249_v14, %v2251_v33  ;;  %v2634_v14 = vld [vmem:[%s11488_s4 + $0x10] sm:$0xff] }
 0x710   :  { %2553 = vmatpush1.bf16.msra.mxu0 %v2215_v6  ;;  %v2651_v6 = vld [vmem:[%s11488_s4 + $0x98] sm:$0xff] }
 0x711   :  { %v2130_v61 = vpop.permute.xlu0 %2129  ;;  %v2171_v7 = vpop.permute.xlu1 %2170  ;;  %2554 = vmatprep.subr.bf16.mxu0 %v2257_v47  ;;  %v2655_v47 = vld [vmem:[%s11488_s4 + $0xb8] sm:$0xff] }
 0x712   :  { %v2135_v8 = vsel %vm251_vm2, %v2128_v27, %v2130_v61  ;;  %2147 = vst.msk [vmem:[#allocation3 + $0x58] sm:$0xff] %vm207_vm0, %v2130_v61  ;;  %v2176_v50 = vsel %vm311_vm3, %v2169_v17, %v2171_v7  ;;  %2188 = vst.msk [vmem:[#allocation3 + $0x88] sm:$0xff] %vm207_vm0, %v2171_v7  ;;  %v2635_v27 = vld [vmem:[%s11488_s4 + $0x18] sm:$0xff] }
 0x713   :  { %v9765_v26 = vpack.c.bf16 %v2635_v27, %v2634_v14  ;;  %v2683_v14 = vld [vmem:[%s11488_s4 + $0x198] sm:$0xff] }
 0x714   :  { %2555 = vmatpush1.bf16.msra.mxu0 %v2256_v37 }
 0x715   :  { %v2331_v9 = vpop.permute.xlu0 %2330  ;;  %v2333_v10 = vpop.permute.xlu1 %2332  ;;  %2556 = vmatprep.subr.bf16.mxu0 %v2298_v43  ;;  %v2654_v43 = vld [vmem:[%s11488_s4 + $0xb0] sm:$0xff] }
 0x716   :  { %v2338_v5 = vsel %vm551_vm7, %v2329_v25, %v2331_v9  ;;  %v2339_v36 = vsel %vm551_vm7, %v2331_v9, %v2333_v10  ;;  %v2649_v25 = vld [vmem:[%s11488_s4 + $0x88] sm:$0xff]  ;;  %v2639_v9 = vld [vmem:[%s11488_s4 + $0x38] sm:$0xff] }
 0x718   :  { %2557 = vmatpush1.bf16.msra.mxu0 %v2297_v1 }
 0x719   :  { %v2212_v52 = vpop.permute.xlu0 %2211  ;;  %v2253_v53 = vpop.permute.xlu1 %2252  ;;  %v2448_v4 = vld [vmem:[#allocation3 + $0x58] sm:$0xff]  ;;  %2558 = vmatprep.subr.bf16.mxu0 %v2339_v36  ;;  %v2454_v31 = vld [vmem:[#allocation3 + $0x88] sm:$0xff] }
 0x71a   :  { %v2217_v20 = vsel %vm371_vm4, %v2210_v16, %v2212_v52  ;;  %2229 = vst.msk [vmem:[#allocation3 + $0xb8] sm:$0xff] %vm207_vm0, %v2212_v52  ;;  %v2258_v21 = vsel %vm431_vm5, %v2251_v33, %v2253_v53  ;;  %2270 = vst.msk [vmem:[#allocation3 + $0xe8] sm:$0xff] %vm207_vm0, %v2253_v53  ;;  %2591 = vmatprep.subr.bf16.mxu1 %v2448_v4  ;;  %v2653_v16 = vld [vmem:[%s11488_s4 + $0xa8] sm:$0xff]  ;;  %v2640_v4 = vld [vmem:[%s11488_s4 + $0x40] sm:$0xff]  ;;  %vm4556_vm5 = vcmask 769024  }
 0x71b   :  { %2592 = vmatpush1.bf16.msra.mxu1 %v2135_v8  ;;  %v9768_v29 = vpack.c.bf16 %v2653_v16, %v2652_v2  ;;  %v2637_v33 = vld [vmem:[%s11488_s4 + $0x28] sm:$0xff]  ;;  %v9786_v8 = vpack.c.bf16 %v2655_v47, %v2654_v43  ;;  %v2684_v16 = vld [vmem:[%s11488_s4 + $0x1a0] sm:$0xff]  ;;  %v2686_v47 = vld [vmem:[%s11488_s4 + $0x1b0] sm:$0xff] }
 0x71c   :  { %2593 = vmatprep.subr.bf16.mxu1 %v2454_v31  ;;  %2559 = vmatpush1.bf16.msra.mxu0 %v2338_v5  ;;  %v2657_v5 = vld [vmem:[%s11488_s4 + $0xc8] sm:$0xff]  ;;  %v2659_v31 = vld [vmem:[%s11488_s4 + $0xd8] sm:$0xff] }
 0x71d   :  { %v2374_v32 = vpop.permute.xlu0 %2373  ;;  %v2372_v40 = vpop.permute.xlu1 %2371 }
 0x71e   :  { %v2379_v15 = vsel %vm611_vm8, %v9677_v45, %v2372_v40  ;;  %v2380_v41 = vsel %vm611_vm8, %v2372_v40, %v2374_v32  ;;  %v9725_v45 = vpack.c.bf16 %v2649_v25, %v2648_v3  ;;  %v2662_v3 = vld [vmem:[%s11488_s4 + $0xf0] sm:$0xff]  ;;  %v2663_v25 = vld [vmem:[%s11488_s4 + $0xf8] sm:$0xff] }
 0x71f   :  { %2594 = vmatpush1.bf16.msra.mxu1 %v2176_v50  ;;  %2560 = vmatprep.subr.bf16.mxu0 %v2380_v41  ;;  %v2638_v50 = vld [vmem:[%s11488_s4 + $0x30] sm:$0xff]  ;;  %v2643_v41 = vld [vmem:[%s11488_s4 + $0x58] sm:$0xff] }
 0x720   :  { %2561 = vmatpush1.bf16.msra.mxu0 %v2379_v15  ;;  %v9801_v52 = vpack.c.bf16 %v2639_v9, %v2638_v50  ;;  %v2642_v15 = vld [vmem:[%s11488_s4 + $0x50] sm:$0xff]  ;;  %v2687_v50 = vld [vmem:[%s11488_s4 + $0x1b8] sm:$0xff] }
 0x721   :  { %v2294_v42 = vpop.permute.xlu0 %2293  ;;  %v2335_v19 = vpop.permute.xlu1 %2334  ;;  %v2460_v60 = vld [vmem:[#allocation3 + $0xb8] sm:$0xff]  ;;  %v2466_v34 = vld [vmem:[#allocation3 + $0xe8] sm:$0xff]  ;;  %v9932_v9 = vpack.c.bf16 %v2687_v50, %v2686_v47 }
 0x722   :  { %v2299_v54 = vsel %vm491_vm6, %v2292_v30, %v2294_v42  ;;  %2311 = vst.msk [vmem:[#allocation3 + $0x118] sm:$0xff] %vm207_vm0, %v2294_v42  ;;  %v2340_v24 = vsel %vm551_vm7, %v2333_v10, %v2335_v19  ;;  %2352 = vst.msk [vmem:[#allocation3 + $0x148] sm:$0xff] %vm207_vm0, %v2335_v19  ;;  %2595 = vmatprep.subr.bf16.mxu1 %v2460_v60  ;;  %v2636_v30 = vld [vmem:[%s11488_s4 + $0x20] sm:$0xff]  ;;  %v2661_v19 = vld [vmem:[%s11488_s4 + $0xe8] sm:$0xff]  ;;  %v9838_v60 = vpack.c.bf16 %v2643_v41, %v2642_v15  ;;  %vm4561_vm7 = vcmask 588800  }
 0x723   :  { %2596 = vmatpush1.bf16.msra.mxu1 %v2217_v20  ;;  %v9783_v61 = vpack.c.bf16 %v2637_v33, %v2636_v30  ;;  %v2656_v10 = vld [vmem:[%s11488_s4 + $0xc0] sm:$0xff]  ;;  %v2641_v20 = vld [vmem:[%s11488_s4 + $0x48] sm:$0xff]  ;;  %v2690_v41 = vld [vmem:[%s11488_s4 + $0x1d0] sm:$0xff] }
 0x724   :  { %2597 = vmatprep.subr.bf16.mxu1 %v2466_v34  ;;  %v9804_v53 = vpack.c.bf16 %v2657_v5, %v2656_v10  ;;  %v2660_v42 = vld [vmem:[%s11488_s4 + $0xe0] sm:$0xff]  ;;  %v2669_v33 = vld [vmem:[%s11488_s4 + $0x128] sm:$0xff]  ;;  %v2670_v10 = vld [vmem:[%s11488_s4 + $0x130] sm:$0xff] }
 0x725   :  { %v2413_v35 = vpop.permute.xlu0 %2412  ;;  %v2415_v38 = vpop.permute.xlu1 %2414  ;;  %v2668_v30 = vld [vmem:[%s11488_s4 + $0x120] sm:$0xff]  ;;  %v2671_v5 = vld [vmem:[%s11488_s4 + $0x138] sm:$0xff]  ;;  %v2673_v15 = vld [vmem:[%s11488_s4 + $0x148] sm:$0xff] }
 0x726   :  { %v2420_v18 = vsel %vm671_vm9, %v9675_v39, %v2413_v35  ;;  %v2421_v59 = vsel %vm671_vm9, %v2413_v35, %v2415_v38  ;;  %v9745_v39 = vpack.c.bf16 %v2651_v6, %v2650_v58  ;;  %v9859_v35 = vpack.c.bf16 %v2663_v25, %v2662_v3  ;;  %v2664_v58 = vld [vmem:[%s11488_s4 + $0x100] sm:$0xff]  ;;  %v2665_v6 = vld [vmem:[%s11488_s4 + $0x108] sm:$0xff]  ;;  %v2675_v3 = vld [vmem:[%s11488_s4 + $0x158] sm:$0xff] }
 0x727   :  { %2598 = vmatpush1.bf16.msra.mxu1 %v2258_v21  ;;  %2562 = vmatprep.subr.bf16.mxu0 %v2421_v59  ;;  %v2658_v21 = vld [vmem:[%s11488_s4 + $0xd0] sm:$0xff]  ;;  %v2681_v59 = vld [vmem:[%s11488_s4 + $0x188] sm:$0xff]  ;;  %v2692_v25 = vld [vmem:[%s11488_s4 + $0x1e0] sm:$0xff] }
 0x728   :  { %2563 = vmatpush1.bf16.msra.mxu0 %v2420_v18  ;;  %v9822_v40 = vpack.c.bf16 %v2659_v31, %v2658_v21  ;;  %v2672_v31 = vld [vmem:[%s11488_s4 + $0x140] sm:$0xff] }
 0x729   :  { %v2376_v12 = vpop.permute.xlu0 %2375  ;;  %v2417_v28 = vpop.permute.xlu1 %2416  ;;  %v2472_v1 = vld [vmem:[#allocation3 + $0x118] sm:$0xff]  ;;  %7696 = vmatprep.subr.bf16.mxu0 %v9725_v45  ;;  %v2478_v17 = vld [vmem:[#allocation3 + $0x148] sm:$0xff] }
 0x72a   :  { %v2381_v37 = vsel %vm611_vm8, %v2374_v32, %v2376_v12  ;;  %2393 = vst.msk [vmem:[#allocation3 + $0x178] sm:$0xff] %vm207_vm0, %v2376_v12  ;;  %v2422_v56 = vsel %vm671_vm9, %v2415_v38, %v2417_v28  ;;  %2434 = vst.msk [vmem:[#allocation3 + $0x1a8] sm:$0xff] %vm207_vm0, %v2417_v28  ;;  %2599 = vmatprep.subr.bf16.mxu1 %v2472_v1  ;;  %v9819_v32 = vpack.c.bf16 %v2641_v20, %v2640_v4  ;;  %v2646_v38 = vld [vmem:[%s11488_s4 + $0x70] sm:$0xff]  ;;  %v2689_v4 = vld [vmem:[%s11488_s4 + $0x1c8] sm:$0xff]  ;;  %vm4597_vm8 = vcmask 965632  }
 0x72b   :  { %2600 = vmatpush1.bf16.msra.mxu1 %v2299_v54  ;;  %2579 = vmatmul.mubr.bf16.vlgmr.msra.gmra.mrb[24].mxu0 %v9692_v11  ;;  %v9841_v54 = vpack.c.bf16 %v2661_v19, %v2660_v42  ;;  %v9872_v18 = vpack.c.bf16 %v2647_v49, %v2646_v38  ;;  %v9883_v12 = vpack.c.bf16 %v2681_v59, %v2680_v51  ;;  %v2682_v1 = vld [vmem:[%s11488_s4 + $0x190] sm:$0xff]  ;;  %v2691_v42 = vld [vmem:[%s11488_s4 + $0x1d8] sm:$0xff]  ;;  %v2693_v38 = vld [vmem:[%s11488_s4 + $0x1e8] sm:$0xff]  ;;  %vm4652_vm9 = vcmask 875520  }
 0x72c   :  { %2601 = vmatprep.subr.bf16.mxu1 %v2478_v17  ;;  %7698 = vmatpush3.bf16.msra.mxu0 %v9742_v46  ;;  %v9885_v28 = vpack.c.bf16 %v2665_v6, %v2664_v58  ;;  %v9897_v27 = vpack.c.bf16 %v2683_v14, %v2682_v1  ;;  %v2685_v17 = vld [vmem:[%s11488_s4 + $0x1a8] sm:$0xff]  ;;  %v9947_v20 = vpack.c.bf16 %v2671_v5, %v2670_v10  ;;  %v2676_v59 = vld [vmem:[%s11488_s4 + $0x160] sm:$0xff]  ;;  %v2694_v6 = vld [vmem:[%s11488_s4 + $0x1f0] sm:$0xff] }
 0x72d   :  { %7700 = vmatprep.subr.bf16.mxu0 %v9745_v39  ;;  %v9920_v43 = vpack.c.bf16 %v2685_v17, %v2684_v16  ;;  %v9965_v19 = vpack.c.bf16 %v2673_v15, %v2672_v31  ;;  %v9986_v51 = vpack.c.bf16 %v2693_v38, %v2692_v25  ;;  %v2677_v58 = vld [vmem:[%s11488_s4 + $0x168] sm:$0xff]  ;;  %v2695_v1 = vld [vmem:[%s11488_s4 + $0x1f8] sm:$0xff]  ;;  %v2698_v5 = vld [vmem:[%s11488_s4 + $0x210] sm:$0xff] }
 0x72e   :  { %v10001_v14 = vpack.c.bf16 %v2677_v58, %v2676_v59  ;;  %v2679_v16 = vld [vmem:[%s11488_s4 + $0x178] sm:$0xff]  ;;  %v2704_v59 = vld [vmem:[%s11488_s4 + $0x240] sm:$0xff]  ;;  %v2705_v58 = vld [vmem:[%s11488_s4 + $0x248] sm:$0xff] }
 0x72f   :  { %2602 = vmatpush1.bf16.msra.mxu1 %v2340_v24  ;;  %v2645_v24 = vld [vmem:[%s11488_s4 + $0x68] sm:$0xff]  ;;  %v2703_v25 = vld [vmem:[%s11488_s4 + $0x238] sm:$0xff] }
 0x730   :  { %7702 = vmatpush3.bf16.msra.mxu0 %v9765_v26 }
 0x731   :  { %v2484_v7 = vld [vmem:[#allocation3 + $0x178] sm:$0xff]  ;;  %7704 = vmatprep.subr.bf16.mxu0 %v9768_v29  ;;  %v2490_v36 = vld [vmem:[#allocation3 + $0x1a8] sm:$0xff] }
 0x732   :  { %2603 = vmatprep.subr.bf16.mxu1 %v2484_v7  ;;  %v9926_v7 = vpack.c.bf16 %v2669_v33, %v2668_v30  ;;  %v2696_v30 = vld [vmem:[%s11488_s4 + $0x200] sm:$0xff]  ;;  %v2697_v33 = vld [vmem:[%s11488_s4 + $0x208] sm:$0xff] }
 0x733   :  { %2604 = vmatpush1.bf16.msra.mxu1 %v2381_v37  ;;  %v2666_v37 = vld [vmem:[%s11488_s4 + $0x110] sm:$0xff]  ;;  %v10025_v50 = vpack.c.bf16 %v2697_v33, %v2696_v30  ;;  %v2708_v30 = vld [vmem:[%s11488_s4 + $0x260] sm:$0xff]  ;;  %v2709_v33 = vld [vmem:[%s11488_s4 + $0x268] sm:$0xff] }
 0x734   :  { %2605 = vmatprep.subr.bf16.mxu1 %v2490_v36  ;;  %7706 = vmatpush3.bf16.msra.mxu0 %v9783_v61  ;;  %v2688_v36 = vld [vmem:[%s11488_s4 + $0x1c0] sm:$0xff] }
 0x735   :  { %7708 = vmatprep.subr.bf16.mxu0 %v9786_v8  ;;  %v9950_v21 = vpack.c.bf16 %v2689_v4, %v2688_v36  ;;  %11489 = vst [vmem:[#allocation32_spill] sm:$0xff] %v10025_v50  ;;  %v2699_v36 = vld [vmem:[%s11488_s4 + $0x218] sm:$0xff] }
 0x736   :  { %v10043_v15 = vpack.c.bf16 %v2699_v36, %v2698_v5  ;;  %v10094_v5 = vpack.c.bf16 %v2709_v33, %v2708_v30  ;;  %v2710_v36 = vld [vmem:[%s11488_s4 + $0x270] sm:$0xff] }
 0x737   :  { %2606 = vmatpush1.bf16.msra.mxu1 %v2422_v56  ;;  %v2667_v56 = vld [vmem:[%s11488_s4 + $0x118] sm:$0xff] }
 0x738   :  { %7710 = vmatpush3.bf16.msra.mxu0 %v9801_v52  ;;  %7728 = vmatprep.subr.bf16.mxu1 %v9883_v12  ;;  %v9905_v2 = vpack.c.bf16 %v2667_v56, %v2666_v37  ;;  %v10004_v37 = vpack.c.bf16 %v2695_v1, %v2694_v6  ;;  %v2678_v56 = vld [vmem:[%s11488_s4 + $0x170] sm:$0xff]  ;;  %11491 = vst [vmem:[#allocation36_spill] sm:$0xff] %v10043_v15  ;;  %11496 = vst [vmem:[#allocation25_spill] sm:$0xff] %v10094_v5 }
 0x739   :  { %7712 = vmatprep.subr.bf16.mxu0 %v9804_v53  ;;  %v10014_v17 = vpack.c.bf16 %v2679_v16, %v2678_v56  ;;  %v10074_v6 = vpack.c.bf16 %v2705_v58, %v2704_v59  ;;  %v2706_v1 = vld [vmem:[%s11488_s4 + $0x250] sm:$0xff]  ;;  %v2707_v56 = vld [vmem:[%s11488_s4 + $0x258] sm:$0xff]  ;;  %v10116_v59 = vld [vmem:[%s11488_s4 + $0x280] sm:$0xff] }
 0x73a   :  { %2622 = vmatmul.mubr.bf16.vlgmr.msra.gmra.mrb[40].mxu1 %v9692_v11  ;;  %v2644_v11 = vld [vmem:[%s11488_s4 + $0x60] sm:$0xff]  ;;  %v10084_v16 = vpack.c.bf16 %v2707_v56, %v2706_v1  ;;  %11498 = vst [vmem:[#allocation27_spill] sm:$0xff] %v10116_v59 }
 0x73b   :  { %v9856_v34 = vpack.c.bf16 %v2645_v24, %v2644_v11  ;;  %7730 = vmatpush3.bf16.msra.mxu1 %v9885_v28  ;;  %v9968_v11 = vpack.c.bf16 %v2691_v42, %v2690_v41  ;;  %v2674_v24 = vld [vmem:[%s11488_s4 + $0x150] sm:$0xff]  ;;  %v2700_v41 = vld [vmem:[%s11488_s4 + $0x220] sm:$0xff]  ;;  %v2701_v42 = vld [vmem:[%s11488_s4 + $0x228] sm:$0xff]  ;;  %11494 = vst [vmem:[#allocation34_spill] sm:$0xff] %v10074_v6 }
 0x73c   :  { %7714 = vmatpush3.bf16.msra.mxu0 %v9819_v32  ;;  %7732 = vmatprep.subr.bf16.mxu1 %v9897_v27  ;;  %v9983_v49 = vpack.c.bf16 %v2675_v3, %v2674_v24  ;;  %v10054_v24 = vpack.c.bf16 %v2701_v42, %v2700_v41  ;;  %v2702_v3 = vld [vmem:[%s11488_s4 + $0x230] sm:$0xff]  ;;  %11495 = vst [vmem:[#allocation24_spill] sm:$0xff] %v10084_v16  ;;  %v2711_v41 = vld [vmem:[%s11488_s4 + $0x278] sm:$0xff] }
 0x73d   :  { %7716 = vmatprep.subr.bf16.mxu0 %v9822_v40  ;;  %v10064_v38 = vpack.c.bf16 %v2703_v25, %v2702_v3  ;;  %v10104_v42 = vpack.c.bf16 %v2711_v41, %v2710_v36  ;;  %v2990_v41 = vld [vmem:[%s11505_s28] sm:$0xff] }
 0x73e   :  { %11492 = vst [vmem:[#allocation38_spill] sm:$0xff] %v10054_v24  ;;  %v2994_v57 = vcombine.high %v2990_v41, %v2990_v41  ;;  %v10147_v22 = vrot.slane %v2990_v41, %v11506_v23 }
 0x73f   :  { %7734 = vmatpush3.bf16.msra.mxu1 %v9905_v2  ;;  %11493 = vst [vmem:[#allocation33_spill] sm:$0xff] %v10064_v38  ;;  %11497 = vst [vmem:[#allocation26_spill] sm:$0xff] %v10104_v42 }
 0x740   :  { %7718 = vmatpush3.bf16.msra.mxu0 %v9838_v60  ;;  %7736 = vmatprep.subr.bf16.mxu1 %v9920_v43  ;;  %11507 = vst [vmem:[#allocation35_spill] sm:$0xff] %v10147_v22  ;;  %v10150_v0 = vrot.slane %v2994_v57, %v11506_v23  ;;  %v10154_v55 = vcombine.high %v10147_v22, %v10147_v22  ;;  %v10172_v23 = vld.sshfl [vmem:[%s11505_s28 + $0x8] sm:$0x33 pattern:$0x76325410] }
 0x741   :  { %7720 = vmatprep.subr.bf16.mxu0 %v9841_v54  ;;  %v10176_v57 = vcombine.high %v10172_v23, %v10172_v23 }
 0x742   :  { %11508 = vst [vmem:[#allocation40_spill] sm:$0xff] %v10150_v0 }
 0x743   :  { %7738 = vmatpush3.bf16.msra.mxu1 %v9926_v7  ;;  %11510 = vst [vmem:[#allocation42_spill] sm:$0xff] %v10176_v57 }
 0x744   :  { %7722 = vmatpush3.bf16.msra.mxu0 %v9856_v34  ;;  %7740 = vmatprep.subr.bf16.mxu1 %v9932_v9 }
 0x745   :  { %7724 = vmatprep.subr.bf16.mxu0 %v9859_v35 }
 0x747   :  { %7742 = vmatpush3.bf16.msra.mxu1 %v9947_v20 }
 0x748   :  { %7726 = vmatpush3.bf16.msra.mxu0 %v9872_v18  ;;  %7744 = vmatprep.subr.bf16.mxu1 %v9950_v21 }
 0x749   :  { %7759 = vmatprep.subr.bf16.mxu0 %v11470_v44 }
 0x74b   :  { %7746 = vmatpush3.bf16.msra.mxu1 %v9965_v19 }
 0x74c   :  { %7748 = vmatprep.subr.bf16.mxu1 %v9968_v11 }
 0x74f   :  { %7750 = vmatpush3.bf16.msra.mxu1 %v9983_v49 }
 0x750   :  { %7752 = vmatprep.subr.bf16.mxu1 %v9986_v51 }
 0x753   :  { %7754 = vmatpush3.bf16.msra.mxu1 %v10001_v14 }
 0x754   :  { %7756 = vmatprep.subr.bf16.mxu1 %v10004_v37 }
 0x757   :  { %7758 = vmatpush3.bf16.msra.mxu1 %v10014_v17 }
 0x758   :  { %6785 = vmatprep.subr.msk.mxu1 %vm1281_vm10, %v10154_v55 }
 0x7de   :  { %v10023_v47 = vpop.f32.mrb[36].mxu1 }
 0x7df   :  { %v10027_v10 = vpop.f32.mrb[37].mxu1 }
 0x7e0   :  { %2783 = vmatprep.mubr.f32.mxu0 %v10027_v10  ;;  %v10036_v4 = vpop.f32.mrb[38].mxu1 }
 0x7e1   :  { %2784 = vmatmul.mubr.f32.vlgmr.msra.gmra.mrb[28].mxu0 %v10023_v47  ;;  %v10039_v31 = vpop.f32.mrb[39].mxu1 }
 0x7e2   :  { %11490 = vst [vmem:[#allocation23_spill] sm:$0xff] %v10039_v31  ;;  %2788 = vmatprep.mubr.f32.mxu0 %v10039_v31  ;;  %7761 = vmatpush1.bf16.msra.mxu0 %v10025_v50 }
 0x7e3   :  { %7762 = vmatprep.subr.bf16.mxu0 %v11470_v44 }
 0x7e5   :  { %2789 = vmatmul.mubr.f32.gmra.mrb[30].mxu0 %v10036_v4 }
 0x7e6   :  { %7764 = vmatpush1.bf16.msra.mxu0 %v10043_v15 }
 0x7e7   :  { %7765 = vmatprep.subr.bf16.mxu0 %v11470_v44 }
 0x7ea   :  { %7767 = vmatpush1.bf16.msra.mxu0 %v10054_v24 }
 0x7eb   :  { %7768 = vmatprep.subr.bf16.mxu0 %v11470_v44 }
 0x7ee   :  { %7770 = vmatpush1.bf16.msra.mxu0 %v10064_v38 }
 0x7ef   :  { %7771 = vmatprep.subr.bf16.mxu0 %v11470_v44 }
 0x7f2   :  { %7773 = vmatpush1.bf16.msra.mxu0 %v10074_v6 }
 0x7f3   :  { %7774 = vmatprep.subr.bf16.mxu0 %v11470_v44 }
 0x7f6   :  { %7776 = vmatpush1.bf16.msra.mxu0 %v10084_v16 }
 0x7f7   :  { %7777 = vmatprep.subr.bf16.mxu0 %v11470_v44 }
 0x7fa   :  { %7779 = vmatpush1.bf16.msra.mxu0 %v10094_v5 }
 0x7fb   :  { %7780 = vmatprep.subr.bf16.mxu0 %v11470_v44 }
 0x7fe   :  { %v10107_v3 = vpop.f32.mrb[24].mxu0  ;;  %7782 = vmatpush1.bf16.msra.mxu0 %v10104_v42 }
 0x7ff   :  { %v10110_v25 = vpop.f32.mrb[25].mxu0  ;;  %2901 = vmatprep.subr.mxu0 %v11469_v63 }
 0x800   :  { %v10118_v58 = vpop.f32.mrb[26].mxu0  ;;  %2858 = vmatprep.mubr.f32.mxu1 %v10110_v25 }
 0x801   :  { %11499 = vst [vmem:[#allocation28_spill] sm:$0xff] %v10118_v58  ;;  %v10121_v1 = vpop.f32.mrb[27].mxu0  ;;  %2859 = vmatmul.mubr.f32.vlgmr.msra.gmra.mrb[44].mxu1 %v10107_v3 }
 0x802   :  { %11500 = vst [vmem:[#allocation29_spill] sm:$0xff] %v10121_v1  ;;  %2863 = vmatprep.mubr.f32.mxu1 %v10121_v1  ;;  %2902 = vmatpush1.msra.mxu0 %v10116_v59  ;;  %v10158_v59 = vcombine.high %v10150_v0, %v10150_v0 }
 0x803   :  { %6786 = vmatpush1.msk.msra.mxu1 %vm1281_vm10, %v10147_v22 }
 0x804   :  { %11509 = vst [vmem:[#allocation41_spill] sm:$0xff] %v10158_v59  ;;  %6789 = vmatprep.subr.msk.mxu0 %vm1281_vm10, %v10158_v59  ;;  %6793 = vmatprep.subr.msk.mxu1 %vm1281_vm10, %v10176_v57 }
 0x805   :  { %2864 = vmatmul.mubr.f32.gmra.mrb[46].mxu1 %v10118_v58 }
 0x806   :  { %3101 = vmatprep.mubr.f32.mxu1 %v11469_v63 }
 0x80d   :  { %v10128_v56 = vpop.f32.mrb[40].mxu1 }
 0x80e   :  { %11501 = vst [vmem:[#allocation30_spill] sm:$0xff] %v10128_v56  ;;  %v10130_v30 = vpop.f32.mrb[41].mxu1 }
 0x80f   :  { %11502 = vst [vmem:[#allocation31_spill] sm:$0xff] %v10130_v30  ;;  %v10132_v33 = vpop.f32.mrb[42].mxu1  ;;  %6782 = vmatprep.mubr.msk.f32.mxu0 %vm207_vm0, %v10130_v30 }
 0x810   :  { %11503 = vst [vmem:[#allocation37_spill] sm:$0xff] %v10132_v33  ;;  %v10136_v36 = vpop.f32.mrb[43].mxu1  ;;  %2934 = vmatmul.mubr.f32.vlgmr.msra.gmra.mrb[32].mxu0 %v10128_v56 }
 0x811   :  { %11504 = vst [vmem:[#allocation39_spill] sm:$0xff] %v10136_v36  ;;  %6783 = vmatprep.mubr.msk.f32.mxu0 %vm207_vm0, %v10136_v36  ;;  %6790 = vmatpush1.msk.msra.mxu0 %vm1281_vm10, %v10150_v0 }
 0x812   :  { %7784 = vmatprep.subr.bf16.mxu0 %v9725_v45 }
 0x814   :  { %2939 = vmatmul.mubr.f32.gmra.mrb[34].mxu0 %v10132_v33 }
 0x815   :  { %3178 = vmatprep.mubr.f32.mxu0 %v11469_v63 }
 0x8b4   :  { %v7203_v41 = vpop.f32.mrb[28].mxu0 }
 0x8b5   :  { %v7204_v42 = vpop.f32.mrb[29].mxu0 }
 0x8b6   :  { %v7205_v5 = vadd.f32 %v7204_v42, %v7203_v41 }
 0x8b8   :  { %v7206_v16 = vpop.f32.mrb[30].mxu0 }
 0x8b9   :  { %v7207_v6 = vpop.f32.mrb[31].mxu0 }
 0x8ba   :  { %v7208_v0 = vadd.f32 %v7207_v6, %v7206_v16  ;;  %v11518_v6 = vld [vmem:[#allocation30_spill] sm:$0xff] }
 0x8d4   :  { %v7241_v38 = vpop.f32.mrb[44].mxu1 }
 0x8d5   :  { %v7242_v45 = vpop.f32.mrb[45].mxu1 }
 0x8d6   :  { %v7243_v24 = vadd.f32 %v7242_v45, %v7241_v38  ;;  %v11523_v45 = vld [vmem:[#allocation37_spill] sm:$0xff] }
 0x8d8   :  { %v7244_v15 = vpop.f32.mrb[46].mxu1  ;;  %v2861_v36 = vadd.f32 %v7243_v24, %v7205_v5  ;;  %v11519_v5 = vld [vmem:[#allocation31_spill] sm:$0xff] }
 0x8d9   :  { %v7245_v33 = vpop.f32.mrb[47].mxu1 }
 0x8da   :  { %v7246_v59 = vadd.f32 %v7245_v33, %v7244_v15 }
 0x8dc   :  { %v2866_v22 = vadd.f32 %v7246_v59, %v7208_v0  ;;  %v2946_v0 = vld [vmem:[#allocation10] sm:$0x3f] }
 0x8dd   :  { %v11520_v59 = vld [vmem:[#allocation32_spill] sm:$0xff] }
 0x8e3   :  { %v2935_v50 = vpop.f32.mrb[32].mxu0 }
 0x8e4   :  { %v2936_v30 = vadd.f32 %v2935_v50, %v2861_v36  ;;  %v2937_v56 = vpop.f32.mrb[33].mxu0 }
 0x8e6   :  { %v2944_v1 = vmul.f32 0.00390625, %v2936_v30 }
 0x8e7   :  { %v2940_v31 = vpop.f32.mrb[34].mxu0 }
 0x8e8   :  { %v2941_v57 = vadd.f32 %v2940_v31, %v2866_v22  ;;  %v2942_v58 = vpop.f32.mrb[35].mxu0  ;;  %6787 = vmatmul.mubr.msk.f32.vlgmr.msra.gmra.mrb[48].mxu1 %vm1274_vm11, %v2944_v1  ;;  %6791 = vmatmul.mubr.msk.f32.vlgmr.msra.gmra.mrb[36].mxu0 %vm1274_vm11, %v2944_v1  ;;  %v2951_v22 = vrot.slane %v2946_v0, %v9447_v48 }
 0x8e9   :  { %3107 = vmatprep.mubr.f32.mxu1 %v11469_v63  ;;  %3184 = vmatprep.mubr.f32.mxu0 %v11469_v63 }
 0x8ea   :  { %v2945_v38 = vmul.f32 0.00390625, %v2941_v57  ;;  %6794 = vmatpush1.msk.msra.mxu1 %vm1281_vm10, %v10172_v23  ;;  %7786 = vmatpush3.bf16.msra.mxu0 %v9742_v46  ;;  %v11511_v46 = vsub.s32 2, %v9358_v13  ;;  %v11522_v57 = vld [vmem:[#allocation41_spill] sm:$0xff] }
 0x8eb   :  { %7816 = vmatprep.subr.bf16.mxu1 %v9883_v12  ;;  %7788 = vmatprep.subr.bf16.mxu0 %v9745_v39 }
 0x8ec   :  { %6788 = vmatmul.mubr.msk.f32.gmra.mrb[50].mxu1 %vm1274_vm11, %v2945_v38  ;;  %6792 = vmatmul.mubr.msk.f32.gmra.mrb[38].mxu0 %vm1274_vm11, %v2945_v38  ;;  %v2959_v39 = vrot.slane %v2946_v0, %v11511_v46 }
 0x8ed   :  { %3255 = vmatprep.mubr.f32.mxu1 %v11469_v63 }
 0x8ee   :  { %7790 = vmatpush3.bf16.msra.mxu0 %v9765_v26  ;;  %v2955_v26 = vrot.slane %v2946_v0, %v9451_v62 }
 0x8ef   :  { %7792 = vmatprep.subr.bf16.mxu0 %v9768_v29  ;;  %v11512_v29 = vsub.s32 3, %v9358_v13 }
 0x8f0   :  { %6795 = vmatmul.mubr.msk.f32.vlgmr.msra.gmra.mrb[52].mxu1 %vm1274_vm11, %v2944_v1  ;;  %v11521_v1 = vld [vmem:[#allocation35_spill] sm:$0xff] }
 0x8f1   :  { %3261 = vmatprep.mubr.f32.mxu1 %v11469_v63  ;;  %7818 = vmatpush3.bf16.msra.mxu1 %v9885_v28  ;;  %v2984_v28 = vmul.f32 %v2951_v22, %v10036_v4 }
 0x8f2   :  { %7820 = vmatprep.subr.bf16.mxu1 %v9897_v27  ;;  %7794 = vmatpush3.bf16.msra.mxu0 %v9783_v61  ;;  %v2963_v61 = vrot.slane %v2946_v0, %v11512_v29  ;;  %v11513_v27 = vld [vmem:[#allocation28_spill] sm:$0xff] }
 0x8f3   :  { %7796 = vmatprep.subr.bf16.mxu0 %v9786_v8  ;;  %v2978_v8 = vmul.f32 %v2951_v22, %v10023_v47 }
 0x8f4   :  { %6796 = vmatmul.mubr.msk.f32.gmra.mrb[54].mxu1 %vm1274_vm11, %v2945_v38 }
 0x8f5   :  { %7822 = vmatpush3.bf16.msra.mxu1 %v9905_v2  ;;  %v2986_v2 = vmul.f32 %v2959_v39, %v11513_v27  ;;  %v11532_v27 = vld [vmem:[#allocation27_spill] sm:$0xff] }
 0x8f6   :  { %7824 = vmatprep.subr.bf16.mxu1 %v9920_v43  ;;  %7798 = vmatpush3.bf16.msra.mxu0 %v9801_v52  ;;  %v2980_v52 = vmul.f32 %v2959_v39, %v10107_v3  ;;  %v11514_v43 = vsub.s32 4, %v9358_v13  ;;  %v11525_v39 = vld [vmem:[#allocation36_spill] sm:$0xff] }
 0x8f7   :  { %7800 = vmatprep.subr.bf16.mxu0 %v9804_v53  ;;  %v2979_v53 = vmul.f32 %v2955_v26, %v10027_v10 }
 0x8f9   :  { %7826 = vmatpush3.bf16.msra.mxu1 %v9926_v7  ;;  %v2967_v7 = vrot.slane %v2946_v0, %v11514_v43 }
 0x8fa   :  { %7828 = vmatprep.subr.bf16.mxu1 %v9932_v9  ;;  %7802 = vmatpush3.bf16.msra.mxu0 %v9819_v32  ;;  %v2981_v32 = vmul.f32 %v2963_v61, %v10110_v25  ;;  %v11515_v9 = vsub.s32 5, %v9358_v13 }
 0x8fb   :  { %7804 = vmatprep.subr.bf16.mxu0 %v9822_v40  ;;  %v2982_v16 = vmul.f32 %v2967_v7, %v11518_v6  ;;  %v2988_v38 = vmul.f32 %v2967_v7, %v11523_v45 }
 0x8fd   :  { %7830 = vmatpush3.bf16.msra.mxu1 %v9947_v20  ;;  %v2971_v20 = vrot.slane %v2946_v0, %v11515_v9  ;;  %v11524_v0 = vld [vmem:[#allocation39_spill] sm:$0xff] }
 0x8fe   :  { %7832 = vmatprep.subr.bf16.mxu1 %v9950_v21  ;;  %7806 = vmatpush3.bf16.msra.mxu0 %v9838_v60  ;;  %v11516_v21 = vld [vmem:[#allocation23_spill] sm:$0xff] }
 0x8ff   :  { %7808 = vmatprep.subr.bf16.mxu0 %v9841_v54  ;;  %v2983_v42 = vmul.f32 %v2971_v20, %v11519_v5  ;;  %v2989_v22 = vmul.f32 %v2971_v20, %v11524_v0 }
 0x901   :  { %7834 = vmatpush3.bf16.msra.mxu1 %v9965_v19  ;;  %v2985_v19 = vmul.f32 %v2955_v26, %v11516_v21 }
 0x902   :  { %7836 = vmatprep.subr.bf16.mxu1 %v9968_v11  ;;  %7810 = vmatpush3.bf16.msra.mxu0 %v9856_v34  ;;  %v11517_v11 = vld [vmem:[#allocation29_spill] sm:$0xff] }
 0x903   :  { %7812 = vmatprep.subr.bf16.mxu0 %v9859_v35 }
 0x905   :  { %7838 = vmatpush3.bf16.msra.mxu1 %v9983_v49  ;;  %v2987_v49 = vmul.f32 %v2963_v61, %v11517_v11 }
 0x906   :  { %7840 = vmatprep.subr.bf16.mxu1 %v9986_v51  ;;  %7814 = vmatpush3.bf16.msra.mxu0 %v9872_v18 }
 0x907   :  { %7847 = vmatprep.subr.bf16.mxu0 %v11470_v44 }
 0x909   :  { %7842 = vmatpush3.bf16.msra.mxu1 %v10001_v14 }
 0x90a   :  { %7844 = vmatprep.subr.bf16.mxu1 %v10004_v37 }
 0x90d   :  { %7846 = vmatpush3.bf16.msra.mxu1 %v10014_v17 }
 0x90e   :  { %6799 = vmatprep.subr.msk.mxu1 %vm1281_vm10, %v10154_v55 }
 0x9bb   :  { %v3103_v55 = vpop.f32.mrb[48].mxu1  ;;  %v3180_v40 = vpop.f32.mrb[36].mxu0 }
 0x9bc   :  { %v10236_v60 = vsub.f32 %v2978_v8, %v3103_v55  ;;  %v10238_v54 = vsub.f32 %v2980_v52, %v3180_v40  ;;  %v3105_v34 = vpop.f32.mrb[49].mxu1  ;;  %v3182_v35 = vpop.f32.mrb[37].mxu0  ;;  %v11526_v52 = vld [vmem:[#allocation38_spill] sm:$0xff]  ;;  %v11529_v55 = vld [vmem:[#allocation24_spill] sm:$0xff]  ;;  %v11530_v40 = vld [vmem:[#allocation25_spill] sm:$0xff] }
 0x9bd   :  { %v10240_v18 = vsub.f32 %v2979_v53, %v3105_v34  ;;  %v10242_v12 = vsub.f32 %v2981_v32, %v3182_v35  ;;  %v11527_v53 = vld [vmem:[#allocation33_spill] sm:$0xff]  ;;  %v11528_v32 = vld [vmem:[#allocation34_spill] sm:$0xff] }
 0x9be   :  { %v3280_v47 = vmul.f32 %v10236_v60, %v10236_v60  ;;  %v3282_v50 = vmul.f32 %v10238_v54, %v10238_v54  ;;  %v11531_v34 = vld [vmem:[#allocation26_spill] sm:$0xff] }
 0x9bf   :  { %v3281_v51 = vmul.f32 %v10240_v18, %v10240_v18  ;;  %v3283_v14 = vmul.f32 %v10242_v12, %v10242_v12  ;;  %v3109_v37 = vpop.f32.mrb[50].mxu1  ;;  %v3186_v17 = vpop.f32.mrb[38].mxu0 }
 0x9c0   :  { %v10260_v13 = vsub.f32 %v2984_v28, %v3109_v37  ;;  %v10262_v10 = vsub.f32 %v2986_v2, %v3186_v17  ;;  %v3111_v4 = vpop.f32.mrb[51].mxu1  ;;  %v3188_v31 = vpop.f32.mrb[39].mxu0 }
 0x9c1   :  { %v10264_v15 = vsub.f32 %v2985_v19, %v3111_v4  ;;  %v10266_v24 = vsub.f32 %v2987_v49, %v3188_v31  ;;  %3362 = vmatprep.mubr.f32.mxu0 %v3281_v51  ;;  %3437 = vmatprep.mubr.f32.mxu1 %v3283_v14 }
 0x9c2   :  { %3363 = vmatmul.mubr.f32.vlgmr.msra.gmra.mrb[40].mxu0 %v3280_v47  ;;  %3438 = vmatmul.mubr.f32.vlgmr.msra.gmra.mrb[56].mxu1 %v3282_v50  ;;  %v3286_v56 = vmul.f32 %v10260_v13, %v10260_v13  ;;  %v3288_v30 = vmul.f32 %v10262_v10, %v10262_v10 }
 0x9c3   :  { %v3287_v3 = vmul.f32 %v10264_v15, %v10264_v15  ;;  %v3289_v25 = vmul.f32 %v10266_v24, %v10266_v24  ;;  %7849 = vmatpush1.bf16.msra.mxu0 %v11520_v59  ;;  %v3257_v58 = vpop.f32.mrb[52].mxu1  ;;  %6800 = vmatpush1.msk.msra.mxu1 %vm1281_vm10, %v11521_v1 }
 0x9c4   :  { %v10281_v33 = vsub.f32 %v2982_v16, %v3257_v58  ;;  %v3259_v36 = vpop.f32.mrb[53].mxu1  ;;  %7850 = vmatprep.subr.bf16.mxu0 %v11470_v44  ;;  %6803 = vmatprep.subr.msk.mxu1 %vm1281_vm10, %v11522_v57 }
 0x9c5   :  { %v10286_v41 = vsub.f32 %v2983_v42, %v3259_v36  ;;  %3367 = vmatprep.mubr.f32.mxu0 %v3287_v3  ;;  %3442 = vmatprep.mubr.f32.mxu1 %v3289_v25 }
 0x9c6   :  { %3368 = vmatmul.mubr.f32.gmra.mrb[42].mxu0 %v3286_v56  ;;  %3443 = vmatmul.mubr.f32.gmra.mrb[58].mxu1 %v3288_v30  ;;  %v3284_v35 = vmul.f32 %v10281_v33, %v10281_v33  ;;  %v11533_v56 = vld [vmem:[#allocation40_spill] sm:$0xff]  ;;  %v11534_v30 = vld [vmem:[#allocation42_spill] sm:$0xff] }
 0x9c7   :  { %v3285_v46 = vmul.f32 %v10286_v41, %v10286_v41  ;;  %7852 = vmatpush1.bf16.msra.mxu0 %v11525_v39  ;;  %v3263_v26 = vpop.f32.mrb[54].mxu1  ;;  %3599 = vmatprep.mubr.f32.mxu1 %v11469_v63 }
 0x9c8   :  { %v10294_v29 = vsub.f32 %v2988_v38, %v3263_v26  ;;  %v3265_v61 = vpop.f32.mrb[55].mxu1  ;;  %7853 = vmatprep.subr.bf16.mxu0 %v11470_v44 }
 0x9c9   :  { %v10297_v8 = vsub.f32 %v2989_v22, %v3265_v61  ;;  %6797 = vmatprep.mubr.msk.f32.mxu0 %vm207_vm0, %v3285_v46 }
 0x9ca   :  { %v3290_v2 = vmul.f32 %v10294_v29, %v10294_v29 }
 0x9cb   :  { %7855 = vmatpush1.bf16.msra.mxu0 %v11526_v52  ;;  %v3291_v28 = vmul.f32 %v10297_v8, %v10297_v8 }
 0x9cc   :  { %7856 = vmatprep.subr.bf16.mxu0 %v11470_v44 }
 0x9cf   :  { %7858 = vmatpush1.bf16.msra.mxu0 %v11527_v53 }
 0x9d0   :  { %7859 = vmatprep.subr.bf16.mxu0 %v11470_v44 }
 0x9d3   :  { %7861 = vmatpush1.bf16.msra.mxu0 %v11528_v32 }
 0x9d4   :  { %7862 = vmatprep.subr.bf16.mxu0 %v11470_v44 }
 0x9d7   :  { %7864 = vmatpush1.bf16.msra.mxu0 %v11529_v55 }
 0x9d8   :  { %7865 = vmatprep.subr.bf16.mxu0 %v11470_v44 }
 0x9db   :  { %7867 = vmatpush1.bf16.msra.mxu0 %v11530_v40 }
 0x9dc   :  { %7868 = vmatprep.subr.bf16.mxu0 %v11470_v44 }
 0x9df   :  { %7870 = vmatpush1.bf16.msra.mxu0 %v11531_v34 }
 0x9e0   :  { %3480 = vmatprep.subr.mxu0 %v11469_v63 }
 0x9e3   :  { %3481 = vmatpush1.msra.mxu0 %v11532_v27 }
 0x9e4   :  { %3513 = vmatmul.mubr.f32.vlgmr.msra.gmra.mrb[44].mxu0 %v3284_v35 }
 0x9e5   :  { %6798 = vmatprep.mubr.msk.f32.mxu0 %vm207_vm0, %v3291_v28  ;;  %vm4415_vm0 = vcmask 1042432  }
 0x9e8   :  { %3518 = vmatmul.mubr.f32.gmra.mrb[46].mxu0 %v3290_v2 }
 0xa95   :  { %v7279_v43 = vpop.f32.mrb[40].mxu0  ;;  %v7317_v7 = vpop.f32.mrb[56].mxu1 }
 0xa96   :  { %v7280_v9 = vpop.f32.mrb[41].mxu0  ;;  %v7318_v20 = vpop.f32.mrb[57].mxu1 }
 0xa97   :  { %v7281_v21 = vadd.f32 %v7280_v9, %v7279_v43  ;;  %v7319_v19 = vadd.f32 %v7318_v20, %v7317_v7 }
 0xa99   :  { %v7282_v11 = vpop.f32.mrb[42].mxu0  ;;  %v7320_v49 = vpop.f32.mrb[58].mxu1  ;;  %v3440_v51 = vadd.f32 %v7319_v19, %v7281_v21  ;;  %v8212_v21 = vld [vmem:[%s11368_s10] ss:$8 sps:$4 sm:$0xff]   ;;  %v8214_v19 = vld [vmem:[%s11368_s10 + $0x4] ss:$8 sps:$4 sm:$0xff]  }
 0xa9a   :  { %v7283_v14 = vpop.f32.mrb[43].mxu0  ;;  %v7321_v37 = vpop.f32.mrb[59].mxu1 }
 0xa9b   :  { %v7284_v17 = vadd.f32 %v7283_v14, %v7282_v11  ;;  %v7322_v47 = vadd.f32 %v7321_v37, %v7320_v49  ;;  %v8217_v11 = vld [vmem:[%s11368_s10 + $0x14] ss:$8 sps:$4 sm:$0xff]   ;;  %v8215_v49 = vld [vmem:[%s11368_s10 + $0x10] ss:$8 sps:$4 sm:$0xff]   ;;  %v8218_v14 = vld [vmem:[%s11368_s10 + $0x20] ss:$8 sps:$4 sm:$0xff]  }
 0xa9c   :  { %v8223_v37 = vld [vmem:[%s11368_s10 + $0x34] ss:$8 sps:$4 sm:$0xff]  }
 0xa9d   :  { %v3445_v50 = vadd.f32 %v7322_v47, %v7284_v17  ;;  %v8221_v17 = vld [vmem:[%s11368_s10 + $0x30] ss:$8 sps:$4 sm:$0xff]   ;;  %v8226_v47 = vld [vmem:[%s11368_s10 + $0x44] ss:$8 sps:$4 sm:$0xff]  }
 0xab7   :  { %v3514_v4 = vpop.f32.mrb[44].mxu0 }
 0xab8   :  { %v3515_v31 = vadd.f32 %v3514_v4, %v3440_v51  ;;  %v3516_v6 = vpop.f32.mrb[45].mxu0  ;;  %v8220_v51 = vld [vmem:[%s11368_s10 + $0x24] ss:$8 sps:$4 sm:$0xff]   ;;  %v8229_v4 = vld [vmem:[%s11368_s10 + $0x54] ss:$8 sps:$4 sm:$0xff]  }
 0xab9   :  { %v8232_v6 = vld [vmem:[%s11368_s10 + $0x64] ss:$8 sps:$4 sm:$0xff]  }
 0xaba   :  { %v3523_v16 = vmul.f32 0.00390625, %v3515_v31  ;;  %v8227_v31 = vld [vmem:[%s11368_s10 + $0x50] ss:$8 sps:$4 sm:$0xff]  }
 0xabb   :  { %v3519_v5 = vpop.f32.mrb[46].mxu0 }
 0xabc   :  { %v3525_v42 = vadd.f32 1e-05, %v3523_v16  ;;  %v3520_v3 = vadd.f32 %v3519_v5, %v3445_v50  ;;  %v3521_v25 = vpop.f32.mrb[47].mxu0  ;;  %v8224_v50 = vld [vmem:[%s11368_s10 + $0x40] ss:$8 sps:$4 sm:$0xff]  }
 0xabd   :  { %v8230_v16 = vld [vmem:[%s11368_s10 + $0x60] ss:$8 sps:$4 sm:$0xff]   ;;  %v8235_v5 = vld [vmem:[%s11368_s10 + $0x74] ss:$8 sps:$4 sm:$0xff]  }
 0xabe   :  { %8346 = vrsqrt.f32 %v3525_v42  ;;  %v3524_v59 = vmul.f32 0.00390625, %v3520_v3  ;;  %v8233_v42 = vld [vmem:[%s11368_s10 + $0x70] ss:$8 sps:$4 sm:$0xff]   ;;  %v8238_v3 = vld [vmem:[%s11368_s10 + $0x84] ss:$8 sps:$4 sm:$0xff]  }
 0xabf   :  { %v8236_v25 = vld [vmem:[%s11368_s10 + $0x80] ss:$8 sps:$4 sm:$0xff]  }
 0xac0   :  { %v3526_v58 = vadd.f32 1e-05, %v3524_v59  ;;  %v8241_v59 = vld [vmem:[%s11368_s10 + $0x94] ss:$8 sps:$4 sm:$0xff]  }
 0xac2   :  { %8348 = vrsqrt.f32 %v3526_v58  ;;  %v8239_v58 = vld [vmem:[%s11368_s10 + $0x90] ss:$8 sps:$4 sm:$0xff]  }
 0xac8   :  { %v8347_v1 = vpop.eup %8346 }
 0xac9   :  { %6801 = vmatmul.mubr.msk.f32.vlgmr.msra.gmra.mrb[60].mxu1 %vm1274_vm11, %v8347_v1 }
 0xaca   :  { %3605 = vmatprep.mubr.f32.mxu1 %v11469_v63  ;;  %6804 = vmatpush1.msk.msra.mxu1 %vm1281_vm10, %v11533_v56  ;;  %v8242_v56 = vld [vmem:[%s11368_s10 + $0xa0] ss:$8 sps:$4 sm:$0xff]  }
 0xacb   :  { %6807 = vmatprep.subr.msk.mxu1 %vm1281_vm10, %v11534_v30  ;;  %v8247_v30 = vld [vmem:[%s11368_s10 + $0xb4] ss:$8 sps:$4 sm:$0xff]  }
 0xacc   :  { %v8349_v36 = vpop.eup %8348 }
 0xacd   :  { %6802 = vmatmul.mubr.msk.f32.gmra.mrb[62].mxu1 %vm1274_vm11, %v8349_v36 }
 0xace   :  { %3676 = vmatprep.mubr.f32.mxu1 %v11469_v63 }
 0xad1   :  { %6805 = vmatmul.mubr.msk.f32.vlgmr.msra.gmra.mrb[64].mxu1 %vm1274_vm11, %v8347_v1 }
 0xad2   :  { %3682 = vmatprep.mubr.f32.mxu1 %v11469_v63  ;;  %6808 = vmatpush1.msk.msra.mxu1 %vm1281_vm10, %v10172_v23 }
 0xad3   :  { %4424 = vmatprep.subr.bf16.mxu1 %v8214_v19 }
 0xad5   :  { %6806 = vmatmul.mubr.msk.f32.gmra.mrb[66].mxu1 %vm1274_vm11, %v8349_v36 }
 0xad6   :  { %3753 = vmatprep.mubr.f32.mxu1 %v11469_v63 }
 0xad9   :  { %6809 = vmatmul.mubr.msk.f32.vlgmr.msra.gmra.mrb[68].mxu1 %vm1274_vm11, %v8347_v1  ;;  %v8244_v1 = vld [vmem:[%s11368_s10 + $0xa4] ss:$8 sps:$4 sm:$0xff]  }
 0xada   :  { %3759 = vmatprep.mubr.f32.mxu1 %v11469_v63  ;;  %4425 = vmatpush1.bf16.msra.mxu1 %v8212_v21 }
 0xadb   :  { %4426 = vmatprep.subr.bf16.mxu1 %v8217_v11 }
 0xadd   :  { %6810 = vmatmul.mubr.msk.f32.gmra.mrb[70].mxu1 %vm1274_vm11, %v8349_v36  ;;  %v8245_v36 = vld [vmem:[%s11368_s10 + $0xb0] ss:$8 sps:$4 sm:$0xff]  }
 0xade   :  { %4427 = vmatpush1.bf16.msra.mxu1 %v8215_v49 }
 0xadf   :  { %4428 = vmatprep.subr.bf16.mxu1 %v8220_v51 }
 0xae2   :  { %4429 = vmatpush1.bf16.msra.mxu1 %v8218_v14 }
 0xae3   :  { %4430 = vmatprep.subr.bf16.mxu1 %v8223_v37 }
 0xae6   :  { %4431 = vmatpush1.bf16.msra.mxu1 %v8221_v17 }
 0xae7   :  { %4432 = vmatprep.subr.bf16.mxu1 %v8226_v47 }
 0xaea   :  { %4433 = vmatpush1.bf16.msra.mxu1 %v8224_v50 }
 0xaeb   :  { %4434 = vmatprep.subr.bf16.mxu1 %v8229_v4 }
 0xaee   :  { %4435 = vmatpush1.bf16.msra.mxu1 %v8227_v31 }
 0xaef   :  { %4436 = vmatprep.subr.bf16.mxu1 %v8232_v6 }
 0xaf2   :  { %4437 = vmatpush1.bf16.msra.mxu1 %v8230_v16 }
 0xaf3   :  { %4438 = vmatprep.subr.bf16.mxu1 %v8235_v5 }
 0xaf6   :  { %4439 = vmatpush1.bf16.msra.mxu1 %v8233_v42 }
 0xaf7   :  { %4440 = vmatprep.subr.bf16.mxu1 %v8238_v3 }
 0xafa   :  { %4441 = vmatpush1.bf16.msra.mxu1 %v8236_v25 }
 0xafb   :  { %4442 = vmatprep.subr.bf16.mxu1 %v8241_v59 }
 0xafe   :  { %4443 = vmatpush1.bf16.msra.mxu1 %v8239_v58 }
 0xaff   :  { %4444 = vmatprep.subr.bf16.mxu1 %v8244_v1 }
 0xb02   :  { %4445 = vmatpush1.bf16.msra.mxu1 %v8242_v56 }
 0xb03   :  { %4446 = vmatprep.subr.bf16.mxu1 %v8247_v30 }
 0xb06   :  { %4447 = vmatpush1.bf16.msra.mxu1 %v8245_v36 }
 0xb9c   :  { %v3601_v57 = vpop.f32.mrb[60].mxu1 }
 0xb9d   :  { %v3603_v45 = vpop.f32.mrb[61].mxu1 }
 0xb9e   :  { %v10338_v22 = vmul.f32 %v3603_v45, %v10240_v18  ;;  %v10355_v18 = vmul.f32 %v3601_v57, %v10236_v60  ;;  %v8250_v57 = vld [vmem:[%s11368_s10 + $0xc4] ss:$8 sps:$4 sm:$0xff]   ;;  %v8248_v45 = vld [vmem:[%s11368_s10 + $0xc0] ss:$8 sps:$4 sm:$0xff]  }
 0xb9f   :  { %4448 = vmatprep.subr.bf16.mxu1 %v8250_v57 }
 0xba0   :  { %v3607_v38 = vpop.f32.mrb[62].mxu1  ;;  %v3779_v53 = vmax.f32 %v10338_v22, 0.0  ;;  %v3778_v27 = vmax.f32 %v10355_v18, 0.0  ;;  %4449 = vmatpush1.bf16.msra.mxu1 %v8248_v45 }
 0xba1   :  { %v3609_v0 = vpop.f32.mrb[63].mxu1  ;;  %v10347_v61 = vmul.f32 %v3607_v38, %v10260_v13  ;;  %v8253_v38 = vld [vmem:[%s11368_s10 + $0xd4] ss:$8 sps:$4 sm:$0xff]  }
 0xba2   :  { %v10341_v46 = vmul.f32 %v3609_v0, %v10264_v15  ;;  %v8251_v0 = vld [vmem:[%s11368_s10 + $0xd0] ss:$8 sps:$4 sm:$0xff]   ;;  %4450 = vmatprep.subr.bf16.mxu1 %v8253_v38 }
 0xba3   :  { %v3784_v34 = vmax.f32 %v10347_v61, 0.0 }
 0xba4   :  { %v3678_v23 = vpop.f32.mrb[64].mxu1  ;;  %v3785_v15 = vmax.f32 %v10341_v46, 0.0  ;;  %4451 = vmatpush1.bf16.msra.mxu1 %v8251_v0 }
 0xba5   :  { %v10344_v39 = vmul.f32 %v3678_v23, %v10238_v54  ;;  %v3680_v26 = vpop.f32.mrb[65].mxu1 }
 0xba6   :  { %v10350_v52 = vmul.f32 %v3680_v26, %v10242_v12 }
 0xba7   :  { %v3780_v32 = vmax.f32 %v10344_v39, 0.0 }
 0xba8   :  { %v3781_v55 = vmax.f32 %v10350_v52, 0.0  ;;  %v3684_v54 = vpop.f32.mrb[66].mxu1  ;;  %v8265_v52 = vld [vmem:[%s11368_s10 + $0x114] ss:$8 sps:$4 sm:$0xff]  }
 0xba9   :  { %v8116_v13 = vpack.i.bf16 %v3780_v32, %v3779_v53  ;;  %v10364_v12 = vmul.f32 %v3684_v54, %v10262_v10  ;;  %v3686_v40 = vpop.f32.mrb[67].mxu1 }
 0xbaa   :  { %v8121_v60 = vpack.i.bf16 %v3785_v15, %v3781_v55  ;;  %v10372_v35 = vmul.f32 %v3686_v40, %v10266_v24  ;;  %v8131_v24 = vpack.i.bf16 %v3784_v34, %v3778_v27 }
 0xbab   :  { %v3786_v28 = vmax.f32 %v10364_v12, 0.0  ;;  %8117 = vrot.lane.b32.xlu0 %v8116_v13, %s8533_s30 }
 0xbac   :  { %v3787_v10 = vmax.f32 %v10372_v35, 0.0  ;;  %8122 = vrot.lane.b32.xlu1 %v8121_v60, %s8533_s30  ;;  %v10379_v2 = vpop.f32.mrb[68].mxu1  ;;  %v8256_v60 = vld [vmem:[%s11368_s10 + $0xe4] ss:$8 sps:$4 sm:$0xff]   ;;  %v8260_v35 = vld [vmem:[%s11368_s10 + $0x100] ss:$8 sps:$4 sm:$0xff]  }
 0xbad   :  { %v10381_v43 = vpop.f32.mrb[69].mxu1  ;;  %4452 = vmatprep.subr.bf16.mxu1 %v8256_v60  ;;  %v3770_v17 = vmul.f32 %v10379_v2, %v10281_v33  ;;  %v8257_v33 = vld [vmem:[%s11368_s10 + $0xf0] ss:$8 sps:$4 sm:$0xff]  }
 0xbae   :  { %v8126_v7 = vpack.i.bf16 %v3787_v10, %v3786_v28 }
 0xbaf   :  { %v10530_v12 = vmax.f32 %v3770_v17, 0.0 }
 0xbb0   :  { %8132 = vrot.lane.b32.xlu1 %v8131_v24, %s8533_s30  ;;  %8127 = vrot.lane.b32.xlu0 %v8126_v7, %s8533_s30  ;;  %v10393_v9 = vpop.f32.mrb[70].mxu1  ;;  %v8254_v24 = vld [vmem:[%s11368_s10 + $0xe0] ss:$8 sps:$4 sm:$0xff]  }
 0xbb1   :  { %v10395_v20 = vpop.f32.mrb[71].mxu1  ;;  %v3776_v7 = vmul.f32 %v10393_v9, %v10294_v29  ;;  %4453 = vmatpush1.bf16.msra.mxu1 %v8254_v24  ;;  %v8259_v29 = vld [vmem:[%s11368_s10 + $0xf4] ss:$8 sps:$4 sm:$0xff]  }
 0xbb2   :  { %4454 = vmatprep.subr.bf16.mxu1 %v8259_v29  ;;  %v3777_v25 = vmul.f32 %v10395_v20, %v10297_v8 }
 0xbb3   :  { %v10519_v3 = vmax.f32 %v3776_v7, 0.0 }
 0xbb4   :  { %v3789_v22 = vmax.f32 %v3777_v25, 0.0  ;;  %v8274_v25 = vld [vmem:[%s11368_s10 + $0x144] ss:$8 sps:$4 sm:$0xff]  }
 0xbb5   :  { %4455 = vmatpush1.bf16.msra.mxu1 %v8257_v33  ;;  %v8151_v8 = vpack.i.bf16 %v10519_v3, %v10530_v12  ;;  %v8268_v33 = vld [vmem:[%s11368_s10 + $0x124] ss:$8 sps:$4 sm:$0xff]  }
 0xc1d   :  { %v8118_v23 = vpop.permute.xlu0 %8117 }
 0xc1e   :  { %v10481_v26 = vpop.permute.xlu1 %8122  ;;  %v8120_v54 = vunpack.i.h.bf16 %v8118_v23  ;;  %v8119_v13 = vunpack.i.l.bf16 %v8118_v23 }
 0xc1f   :  { %v8124_v40 = vunpack.i.l.bf16 %v10481_v26  ;;  %v8125_v21 = vunpack.i.h.bf16 %v10481_v26 }
 0xc20   :  { %v3822_v47 = vsel %vm251_vm2, %v8119_v13, %v8120_v54 }
 0xc21   :  { %v3823_v50 = vsel %vm251_vm2, %v8120_v54, %v8124_v40  ;;  %v3840_v18 = vmax.f32 %v3779_v53, %v3822_v47 }
 0xc22   :  { %v8133_v19 = vpop.permute.xlu1 %8132  ;;  %v8128_v11 = vpop.permute.xlu0 %8127  ;;  %v10527_v61 = vmax.f32 %v3780_v32, %v3823_v50 }
 0xc23   :  { %v8135_v49 = vunpack.i.h.bf16 %v8133_v19  ;;  %v8134_v51 = vunpack.i.l.bf16 %v8133_v19  ;;  %v8130_v14 = vunpack.i.h.bf16 %v8128_v11  ;;  %v8129_v37 = vunpack.i.l.bf16 %v8128_v11 }
 0xc24   :  { %v8141_v39 = vpack.i.bf16 %v10527_v61, %v3840_v18 }
 0xc25   :  { %v3821_v9 = vsel %vm251_vm2, %v8134_v51, %v8119_v13  ;;  %v3825_v4 = vsel %vm251_vm2, %v8135_v49, %v8125_v21  ;;  %v3826_v31 = vsel %vm251_vm2, %v8125_v21, %v8129_v37  ;;  %v3827_v6 = vsel %vm251_vm2, %v8129_v37, %v8130_v14 }
 0xc26   :  { %v3839_v2 = vmax.f32 %v3778_v27, %v3821_v9  ;;  %v3844_v16 = vmax.f32 %v3784_v34, %v3825_v4  ;;  %v3845_v5 = vmax.f32 %v3785_v15, %v3826_v31  ;;  %v10517_v42 = vmax.f32 %v3786_v28, %v3827_v6 }
 0xc27   :  { %v3771_v34 = vmul.f32 %v10381_v43, %v10286_v41  ;;  %v8262_v41 = vld [vmem:[%s11368_s10 + $0x104] ss:$8 sps:$4 sm:$0xff]  }
 0xc28   :  { %v8136_v46 = vpack.i.bf16 %v3844_v16, %v3839_v2  ;;  %v8146_v15 = vpack.i.bf16 %v10517_v42, %v3845_v5  ;;  %4467 = vmatprep.subr.bf16.mxu1 %v8262_v41  ;;  %v8289_v41 = vld [vmem:[%s11368_s10 + $0x194] ss:$8 sps:$4 sm:$0xff]  }
 0xc29   :  { %v3783_v53 = vmax.f32 %v3771_v34, 0.0  ;;  %v8280_v34 = vld [vmem:[%s11368_s10 + $0x164] ss:$8 sps:$4 sm:$0xff]  }
 0xc2a   :  { %8137 = vrot.lane.b32.xlu0 %v8136_v46, %s8535_s27  ;;  %8147 = vrot.lane.b32.xlu1 %v8146_v15, %s8535_s27  ;;  %v8277_v46 = vld [vmem:[%s11368_s10 + $0x154] ss:$8 sps:$4 sm:$0xff]   ;;  %v8275_v15 = vld [vmem:[%s11368_s10 + $0x150] ss:$8 sps:$4 sm:$0xff]  }
 0xc2b   :  { %v8156_v32 = vpack.i.bf16 %v3789_v22, %v3783_v53 }
 0xc2e   :  { %8142 = vrot.lane.b32.xlu0 %v8141_v39, %s8535_s27  ;;  %8152 = vrot.lane.b32.xlu1 %v8151_v8, %s8533_s30  ;;  %v8278_v8 = vld [vmem:[%s11368_s10 + $0x160] ss:$8 sps:$4 sm:$0xff]   ;;  %v8281_v39 = vld [vmem:[%s11368_s10 + $0x170] ss:$8 sps:$4 sm:$0xff]  }
 0xc32   :  { %8157 = vrot.lane.b32.xlu0 %v8156_v32, %s8533_s30  ;;  %v8284_v32 = vld [vmem:[%s11368_s10 + $0x180] ss:$8 sps:$4 sm:$0xff]  }
 0xc9c   :  { %v8138_v28 = vpop.permute.xlu0 %8137  ;;  %v10545_v27 = vpop.permute.xlu1 %8147 }
 0xc9d   :  { %v8140_v43 = vunpack.i.h.bf16 %v8138_v28  ;;  %v8149_v20 = vunpack.i.l.bf16 %v10545_v27  ;;  %v8150_v59 = vunpack.i.h.bf16 %v10545_v27  ;;  %v8139_v58 = vunpack.i.l.bf16 %v8138_v28  ;;  %v8287_v28 = vld [vmem:[%s11368_s10 + $0x190] ss:$8 sps:$4 sm:$0xff]  }
 0xc9f   :  { %v3907_v1 = vsel %vm371_vm4, %v8140_v43, %v8149_v20  ;;  %v3908_v0 = vsel %vm371_vm4, %v8149_v20, %v8150_v59  ;;  %v8292_v43 = vld [vmem:[%s11368_s10 + $0x1a4] ss:$8 sps:$4 sm:$0xff]   ;;  %v8290_v20 = vld [vmem:[%s11368_s10 + $0x1a0] ss:$8 sps:$4 sm:$0xff]  }
 0xca0   :  { %v10550_v56 = vpop.permute.xlu0 %8142  ;;  %v8153_v30 = vpop.permute.xlu1 %8152  ;;  %v3927_v13 = vmax.f32 %v3844_v16, %v3907_v1  ;;  %v3928_v51 = vmax.f32 %v3845_v5, %v3908_v0  ;;  %v8271_v16 = vld [vmem:[%s11368_s10 + $0x134] ss:$8 sps:$4 sm:$0xff]   ;;  %v8269_v5 = vld [vmem:[%s11368_s10 + $0x130] ss:$8 sps:$4 sm:$0xff]  }
 0xca1   :  { %v8145_v36 = vunpack.i.h.bf16 %v10550_v56  ;;  %v8144_v57 = vunpack.i.l.bf16 %v10550_v56  ;;  %v10554_v45 = vunpack.i.h.bf16 %v8153_v30  ;;  %v10556_v38 = vunpack.i.l.bf16 %v8153_v30  ;;  %v8293_v1 = vld [vmem:[%s11368_s10 + $0x1b0] ss:$8 sps:$4 sm:$0xff]   ;;  %v8298_v30 = vld [vmem:[%s11368_s10 + $0x1c4] ss:$8 sps:$4 sm:$0xff]   ;;  %v8301_v0 = vld [vmem:[%s11368_s10 + $0x1d4] ss:$8 sps:$4 sm:$0xff]  }
 0xca3   :  { %v3902_v23 = vsel %vm371_vm4, %v8139_v58, %v8144_v57  ;;  %v3903_v54 = vsel %vm371_vm4, %v8144_v57, %v8145_v36  ;;  %v3828_v24 = vsel %vm251_vm2, %v8130_v14, %v10554_v45  ;;  %v3824_v21 = vsel %vm251_vm2, %v8124_v40, %v10556_v38  ;;  %v8295_v58 = vld [vmem:[%s11368_s10 + $0x1b4] ss:$8 sps:$4 sm:$0xff]   ;;  %v8296_v57 = vld [vmem:[%s11368_s10 + $0x1c0] ss:$8 sps:$4 sm:$0xff]  }
 0xca4   :  { %v3922_v60 = vmax.f32 %v3839_v2, %v3902_v23  ;;  %v8158_v7 = vpop.permute.xlu0 %8157  ;;  %v3923_v49 = vmax.f32 %v3840_v18, %v3903_v54  ;;  %v10573_v17 = vmax.f32 %v3787_v10, %v3828_v24  ;;  %v10581_v26 = vmax.f32 %v3781_v55, %v3824_v21  ;;  %v8263_v55 = vld [vmem:[%s11368_s10 + $0x110] ss:$8 sps:$4 sm:$0xff]   ;;  %v8266_v2 = vld [vmem:[%s11368_s10 + $0x120] ss:$8 sps:$4 sm:$0xff]   ;;  %v8304_v54 = vld [vmem:[%s11368_s10 + $0x1e4] ss:$8 sps:$4 sm:$0xff]  }
 0xca5   :  { %v8160_v19 = vunpack.i.h.bf16 %v8158_v7  ;;  %v8159_v11 = vunpack.i.l.bf16 %v8158_v7  ;;  %v8272_v18 = vld [vmem:[%s11368_s10 + $0x140] ss:$8 sps:$4 sm:$0xff]   ;;  %v8299_v23 = vld [vmem:[%s11368_s10 + $0x1d0] ss:$8 sps:$4 sm:$0xff]   ;;  %v8310_v7 = vld [vmem:[%s11368_s10 + $0x204] ss:$8 sps:$4 sm:$0xff]   ;;  %v3843_v56 = vmax.f32 %v10530_v12, %v10556_v38 }
 0xca6   :  { %v3932_v37 = vpack.c.bf16 %v3927_v13, %v3922_v60  ;;  %v3933_v29 = vpack.c.bf16 %v3928_v51, %v3923_v49  ;;  %v8302_v13 = vld [vmem:[%s11368_s10 + $0x1e0] ss:$8 sps:$4 sm:$0xff]   ;;  %v8307_v60 = vld [vmem:[%s11368_s10 + $0x1f4] ss:$8 sps:$4 sm:$0xff]   ;;  %v8305_v24 = vld [vmem:[%s11368_s10 + $0x1f0] ss:$8 sps:$4 sm:$0xff]  }
 0xca7   :  { %v3856_v47 = vsel %vm251_vm2, %v10554_v45, %v8160_v19  ;;  %v3855_v14 = vsel %vm251_vm2, %v10556_v38, %v8159_v11  ;;  %v3864_v10 = vmax.f32 %v3789_v22, %v8160_v19  ;;  %v3862_v9 = vmax.f32 %v3783_v53, %v8159_v11  ;;  %v8283_v22 = vld [vmem:[%s11368_s10 + $0x174] ss:$8 sps:$4 sm:$0xff]   ;;  %v8286_v53 = vld [vmem:[%s11368_s10 + $0x184] ss:$8 sps:$4 sm:$0xff]  }
 0xca8   :  { %v3863_v40 = vmax.f32 %v10519_v3, %v3856_v47  ;;  %v3861_v50 = vmax.f32 %v10530_v12, %v3855_v14  ;;  %4456 = vmatprep.mubr.bf16.mxu1 %v3933_v29  ;;  %v8311_v12 = vld [vmem:[%s11368_s10 + $0x210] ss:$8 sps:$4 sm:$0xff]   ;;  %v8316_v38 = vld [vmem:[%s11368_s10 + $0x224] ss:$8 sps:$4 sm:$0xff]  }
 0xca9   :  { %4457 = vmatmul.mubr.bf16.vlgmr.msra.gmra.mrb[72].mxu1 %v3932_v37  ;;  %v8171_v6 = vpack.i.bf16 %v3864_v10, %v3862_v9 }
 0xcaa   :  { %v8166_v4 = vpack.i.bf16 %v3863_v40, %v10573_v17  ;;  %v8161_v31 = vpack.i.bf16 %v3861_v50, %v10581_v26  ;;  %4468 = vmatpush1.bf16.msra.mxu1 %v8260_v35 }
 0xcab   :  { %4469 = vmatprep.subr.bf16.mxu1 %v8265_v52 }
 0xcac   :  { %8167 = vrot.lane.b32.xlu0 %v8166_v4, %s8535_s27  ;;  %8162 = vrot.lane.b32.xlu1 %v8161_v31, %s8535_s27 }
 0xcae   :  { %4470 = vmatpush1.bf16.msra.mxu1 %v8263_v55 }
 0xcaf   :  { %4471 = vmatprep.subr.bf16.mxu1 %v8268_v33  ;;  %v8314_v33 = vld [vmem:[%s11368_s10 + $0x220] ss:$8 sps:$4 sm:$0xff]  }
 0xcb0   :  { %8172 = vrot.lane.b32.xlu1 %v8171_v6, %s8535_s27 }
 0xcb2   :  { %4472 = vmatpush1.bf16.msra.mxu1 %v8266_v2  ;;  %v8319_v2 = vld [vmem:[%s11368_s10 + $0x234] ss:$8 sps:$4 sm:$0xff]  }
 0xcb3   :  { %4473 = vmatprep.subr.bf16.mxu1 %v8271_v16  ;;  %v8317_v16 = vld [vmem:[%s11368_s10 + $0x230] ss:$8 sps:$4 sm:$0xff]  }
 0xcb6   :  { %4474 = vmatpush1.bf16.msra.mxu1 %v8269_v5  ;;  %v8322_v5 = vld [vmem:[%s11368_s10 + $0x244] ss:$8 sps:$4 sm:$0xff]  }
 0xcb7   :  { %4475 = vmatprep.subr.bf16.mxu1 %v8274_v25  ;;  %v8320_v25 = vld [vmem:[%s11368_s10 + $0x240] ss:$8 sps:$4 sm:$0xff]  }
 0xcba   :  { %4476 = vmatpush1.bf16.msra.mxu1 %v8272_v18  ;;  %v8325_v18 = vld [vmem:[%s11368_s10 + $0x254] ss:$8 sps:$4 sm:$0xff]  }
 0xcbb   :  { %4477 = vmatprep.subr.bf16.mxu1 %v8277_v46  ;;  %v4015_v46 = vld [vmem:[%s11368_s10 + $0x270] sm:$0x77] }
 0xcbe   :  { %4478 = vmatpush1.bf16.msra.mxu1 %v8275_v15  ;;  %v8546_v15 = vmov 65535  }
 0xcbf   :  { %4479 = vmatprep.subr.bf16.mxu1 %v8280_v34  ;;  %v4416_v34 = vsel %vm1281_vm10, 4294967295, %v8546_v15 }
 0xcc2   :  { %4480 = vmatpush1.bf16.msra.mxu1 %v8278_v8  ;;  %v8323_v8 = vld [vmem:[%s11368_s10 + $0x250] ss:$8 sps:$4 sm:$0xff]  }
 0xcc3   :  { %4481 = vmatprep.subr.bf16.mxu1 %v8283_v22  ;;  %v8328_v22 = vld [vmem:[%s11368_s10 + $0x264] ss:$8 sps:$4 sm:$0xff]  }
 0xcc6   :  { %4482 = vmatpush1.bf16.msra.mxu1 %v8281_v39  ;;  %v6890_v39 = vcombine.high %v4015_v46, %v4015_v46 }
 0xcc7   :  { %4483 = vmatprep.subr.bf16.mxu1 %v8286_v53  ;;  %v4417_v53 = vsel %vm4415_vm0, %v4416_v34, 0 }
 0xcca   :  { %4484 = vmatpush1.bf16.msra.mxu1 %v8284_v32  ;;  %v8326_v32 = vld [vmem:[%s11368_s10 + $0x260] ss:$8 sps:$4 sm:$0xff]  }
 0xccb   :  { %4485 = vmatprep.subr.bf16.mxu1 %v8289_v41  ;;  %v6889_v41 = vcombine.low %v4015_v46, %v4015_v46  ;;  %v4752_v46 = vld [vmem:[#allocation12 + $0x28] sm:$0xff] }
 0xcce   :  { %4486 = vmatpush1.bf16.msra.mxu1 %v8287_v28  ;;  %v4422_v28 = vand.u32 %v6890_v39, %v4417_v53 }
 0xccf   :  { %4487 = vmatprep.subr.bf16.mxu1 %v8292_v43  ;;  %v4419_v43 = vand.u32 %v6889_v41, %v4417_v53  ;;  %v4755_v53 = vld [vmem:[#allocation12 + $0x40] sm:$0xff] }
 0xcd2   :  { %4488 = vmatpush1.bf16.msra.mxu1 %v8290_v20 }
 0xcd3   :  { %4489 = vmatprep.subr.bf16.mxu1 %v8295_v58 }
 0xcd6   :  { %4490 = vmatpush1.bf16.msra.mxu1 %v8293_v1 }
 0xcd7   :  { %4491 = vmatprep.subr.bf16.mxu1 %v8298_v30 }
 0xcda   :  { %4492 = vmatpush1.bf16.msra.mxu1 %v8296_v57 }
 0xcdb   :  { %4493 = vmatprep.subr.bf16.mxu1 %v8301_v0 }
 0xcde   :  { %4494 = vmatpush1.bf16.msra.mxu1 %v8299_v23 }
 0xcdf   :  { %4495 = vmatprep.subr.bf16.mxu1 %v8304_v54 }
 0xce2   :  { %4496 = vmatpush1.bf16.msra.mxu1 %v8302_v13  ;;  %v8333_v13 = vld [vmem:[%s11369_s11 + $0x4] ss:$8 sps:$4 sm:$0xff]  }
 0xce3   :  { %4497 = vmatprep.subr.bf16.mxu1 %v8307_v60  ;;  %6894 = vmatprep.mubr.msk.bf16.mxu0 %vm754_vm1, %v8333_v13  ;;  %v4764_v13 = vld [vmem:[#allocation12 + $0x88] sm:$0xff] }
 0xce6   :  { %4498 = vmatpush1.bf16.msra.mxu1 %v8305_v24 }
 0xce7   :  { %4510 = vmatprep.subr.bf16.mxu1 %v8310_v7 }
 0xd1e   :  { %v8168_v21 = vpop.permute.xlu0 %8167  ;;  %v8163_v19 = vpop.permute.xlu1 %8162 }
 0xd1f   :  { %v8170_v11 = vunpack.i.h.bf16 %v8168_v21  ;;  %v8169_v49 = vunpack.i.l.bf16 %v8168_v21  ;;  %v8165_v51 = vunpack.i.h.bf16 %v8163_v19  ;;  %v8164_v37 = vunpack.i.l.bf16 %v8163_v19 }
 0xd21   :  { %v3909_v47 = vsel %vm371_vm4, %v8150_v59, %v8169_v49  ;;  %v3910_v14 = vsel %vm371_vm4, %v8169_v49, %v8170_v11  ;;  %v3904_v40 = vsel %vm371_vm4, %v8145_v36, %v8164_v37  ;;  %v3905_v50 = vsel %vm371_vm4, %v8164_v37, %v8165_v51 }
 0xd22   :  { %v3929_v29 = vmax.f32 %v10517_v42, %v3909_v47  ;;  %v3924_v35 = vmax.f32 %v10527_v61, %v3904_v40  ;;  %v8173_v10 = vpop.permute.xlu1 %8172  ;;  %v3925_v9 = vmax.f32 %v10581_v26, %v3905_v50  ;;  %v3930_v4 = vmax.f32 %v10573_v17, %v3910_v14  ;;  %v8308_v42 = vld [vmem:[%s11368_s10 + $0x200] ss:$8 sps:$4 sm:$0xff]   ;;  %v8313_v17 = vld [vmem:[%s11368_s10 + $0x214] ss:$8 sps:$4 sm:$0xff]   ;;  %s8547_s10 = smov 118  }
 0xd23   :  { %v8175_v27 = vunpack.i.h.bf16 %v8173_v10  ;;  %v8174_v31 = vunpack.i.l.bf16 %v8173_v10  ;;  %v3848_v59 = vmax.f32 %v10519_v3, %v10554_v45  ;;  %v11535_v45 = vmov 0  }
 0xd24   :  { %v3935_v36 = vpack.c.bf16 %v3930_v4, %v3925_v9  ;;  %v3934_v52 = vpack.c.bf16 %v3929_v29, %v3924_v35 }
 0xd25   :  { %v3911_v61 = vsel %vm371_vm4, %v8170_v11, %v8175_v27  ;;  %v3906_v26 = vsel %vm371_vm4, %v8165_v51, %v8174_v31  ;;  %vm4411_vm4 = vcmask 957440  }
 0xd26   :  { %v3931_v55 = vmax.f32 %v3848_v59, %v3911_v61  ;;  %v3926_v6 = vmax.f32 %v3843_v56, %v3906_v26  ;;  %4499 = vmatprep.mubr.bf16.mxu1 %v3935_v36 }
 0xd27   :  { %4500 = vmatmul.mubr.bf16.vlgmr.msra.gmra.mrb[72].mxu1 %v3934_v52 }
 0xd28   :  { %v3936_v3 = vpack.c.bf16 %v3931_v55, %v3926_v6  ;;  %4511 = vmatpush1.bf16.msra.mxu1 %v8308_v42  ;;  %4542 = vmatprep.mubr.bf16.mxu1 %v11535_v45  ;;  %v4748_v45 = vld [vmem:[#allocation12 + $0x8] sm:$0xff] }
 0xd29   :  { %4512 = vmatprep.subr.bf16.mxu1 %v8313_v17 }
 0xd2c   :  { %4513 = vmatpush1.bf16.msra.mxu1 %v8311_v12  ;;  %v4747_v12 = vld [vmem:[#allocation12] sm:$0xff] }
 0xd2d   :  { %4514 = vmatprep.subr.bf16.mxu1 %v8316_v38 }
 0xd30   :  { %4515 = vmatpush1.bf16.msra.mxu1 %v8314_v33  ;;  %v8331_v33 = vld [vmem:[%s11369_s11] ss:$8 sps:$4 sm:$0xff]  }
 0xd31   :  { %4516 = vmatprep.subr.bf16.mxu1 %v8319_v2  ;;  %v10779_v2 = vpack.c.bf16 %v4748_v45, %v4747_v12 }
 0xd34   :  { %4517 = vmatpush1.bf16.msra.mxu1 %v8317_v16  ;;  %v4749_v16 = vld [vmem:[#allocation12 + $0x10] sm:$0xff] }
 0xd35   :  { %4518 = vmatprep.subr.bf16.mxu1 %v8322_v5  ;;  %v4750_v5 = vld [vmem:[#allocation12 + $0x18] sm:$0xff] }
 0xd38   :  { %4519 = vmatpush1.bf16.msra.mxu1 %v8320_v25  ;;  %v10783_v25 = vpack.c.bf16 %v4750_v5, %v4749_v16 }
 0xd39   :  { %4520 = vmatprep.subr.bf16.mxu1 %v8325_v18  ;;  %v4751_v18 = vld [vmem:[#allocation12 + $0x20] sm:$0xff] }
 0xd3a   :  { %v10787_v34 = vpack.c.bf16 %v4752_v46, %v4751_v18 }
 0xd3c   :  { %4521 = vmatpush1.bf16.msra.mxu1 %v8323_v8  ;;  %v4753_v8 = vld [vmem:[#allocation12 + $0x30] sm:$0xff] }
 0xd3d   :  { %4522 = vmatprep.subr.bf16.mxu1 %v8328_v22  ;;  %v4754_v22 = vld [vmem:[#allocation12 + $0x38] sm:$0xff] }
 0xd3e   :  { %v10791_v39 = vpack.c.bf16 %v4754_v22, %v4753_v8 }
 0xd40   :  { %4523 = vmatpush1.bf16.msra.mxu1 %v8326_v32  ;;  %v4756_v32 = vld [vmem:[#allocation12 + $0x48] sm:$0xff] }
 0xd41   :  { %4524 = vmatprep.subr.bf16.mxu1 %v4422_v28  ;;  %v10795_v41 = vpack.c.bf16 %v4756_v32, %v4755_v53  ;;  %v4757_v28 = vld [vmem:[#allocation12 + $0x50] sm:$0xff] }
 0xd44   :  { %4525 = vmatpush1.bf16.msra.mxu1 %v4419_v43  ;;  %v4758_v43 = vld [vmem:[#allocation12 + $0x58] sm:$0xff] }
 0xd47   :  { %6891 = vmatmul.mubr.msk.bf16.vlgmr.msra.gmra.mrb[72].mxu1 %vm4411_vm4, %v3936_v3 }
 0xe1a   :  { %v4544_v20 = vpop.f32.mrb[72].mxu1 }
 0xe1b   :  { %v4546_v58 = vpop.f32.mrb[73].mxu1 }
 0xe1c   :  { %v4548_v1 = vpop.f32.mrb[74].mxu1 }
 0xe1d   :  { %v4553_v30 = vpack.c.bf16 %v4548_v1, %v4544_v20  ;;  %v4550_v57 = vpop.f32.mrb[75].mxu1  ;;  %v10799_v20 = vpack.c.bf16 %v4758_v43, %v4757_v28  ;;  %v4760_v1 = vld [vmem:[#allocation12 + $0x68] sm:$0xff] }
 0xe1e   :  { %v4554_v0 = vpack.c.bf16 %v4550_v57, %v4546_v58  ;;  %v4759_v58 = vld [vmem:[#allocation12 + $0x60] sm:$0xff]  ;;  %v4761_v57 = vld [vmem:[#allocation12 + $0x70] sm:$0xff] }
 0xe1f   :  { %4567 = vrot.lane.b32.xlu0 %v4553_v30, %s8533_s30 }
 0xe20   :  { %4557 = vst.msk [vmem:[#allocation6 + $0x8] sm:$0xff] %vm4556_vm5, %v4554_v0  ;;  %v4762_v0 = vld [vmem:[#allocation12 + $0x78] sm:$0xff] }
 0xe23   :  { %4580 = vrot.lane.b32.xlu0 %v4553_v30, %s8534_s5 }
 0xe27   :  { %v4564_v23 = vld [vmem:[#allocation6 + $0x8] sm:$0xff]  ;;  %4593 = vrot.lane.b32.xlu0 %v4553_v30, %s8547_s10 }
 0xe28   :  { %4569 = vrot.lane.b32.xlu1 %v4564_v23, %s8533_s30  ;;  %4562 = vst.msk [vmem:[#allocation4 + $0x8] sm:$0xff] %vm4561_vm7, %v4564_v23 }
 0xe2b   :  { %4607 = vrot.lane.b32.xlu0 %v4553_v30, %s8548_s7 }
 0xe2c   :  { %4582 = vrot.lane.b32.xlu1 %v4564_v23, %s8534_s5 }
 0xe2f   :  { %v4675_v54 = vld [vmem:[#allocation4 + $0x8] sm:$0xff]  ;;  %4621 = vrot.lane.b32.xlu0 %v4553_v30, %s8549_s25 }
 0xe30   :  { %4595 = vrot.lane.b32.xlu1 %v4564_v23, %s8547_s10  ;;  %4704 = vmatprep.subr.bf16.mxu0 %v4675_v54  ;;  %v4763_v54 = vld [vmem:[#allocation12 + $0x80] sm:$0xff] }
 0xe31   :  { %4705 = vmatpush1.bf16.msra.mxu0 %v4553_v30 }
 0xe33   :  { %4635 = vrot.lane.b32.xlu0 %v4553_v30, %s8537_s15 }
 0xe34   :  { %4609 = vrot.lane.b32.xlu1 %v4564_v23, %s8548_s7 }
 0xe37   :  { %4648 = vrot.lane.b32.xlu0 %v4553_v30, %s8550_s26 }
 0xe38   :  { %4623 = vrot.lane.b32.xlu1 %v4564_v23, %s8549_s25 }
 0xe3b   :  { %4662 = vrot.lane.b32.xlu0 %v4553_v30, %s8551_s12  ;;  %v10803_v30 = vpack.c.bf16 %v4760_v1, %v4759_v58 }
 0xe3c   :  { %4637 = vrot.lane.b32.xlu1 %v4564_v23, %s8537_s15 }
 0xe40   :  { %4650 = vrot.lane.b32.xlu1 %v4564_v23, %s8550_s26 }
 0xe44   :  { %4664 = vrot.lane.b32.xlu1 %v4564_v23, %s8551_s12  ;;  %v7893_v23 = vpack.c.bf16 %v4762_v0, %v4761_v57 }
 0xe91   :  { %v4568_v60 = vpop.permute.xlu0 %4567 }
 0xe95   :  { %v4581_v24 = vpop.permute.xlu0 %4580 }
 0xe99   :  { %v4594_v7 = vpop.permute.xlu0 %4593 }
 0xe9a   :  { %v4570_v21 = vpop.permute.xlu1 %4569 }
 0xe9b   :  { %v4571_v19 = vsel %vm251_vm2, %v4568_v60, %v4570_v21  ;;  %4575 = vst.msk [vmem:[#allocation4 + $0x18] sm:$0xff] %vm4561_vm7, %v4570_v21  ;;  %v7896_v60 = vpack.c.bf16 %v4764_v13, %v4763_v54 }
 0xe9d   :  { %v4608_v49 = vpop.permute.xlu0 %4607 }
 0xe9e   :  { %v4583_v11 = vpop.permute.xlu1 %4582 }
 0xe9f   :  { %v4584_v51 = vsel %vm311_vm3, %v4581_v24, %v4583_v11  ;;  %4588 = vst.msk [vmem:[#allocation4 + $0x28] sm:$0xff] %vm4561_vm7, %v4583_v11  ;;  %vm4625_vm3 = vcmask 949248   ;;  %v4765_v24 = vld [vmem:[#allocation12 + $0x90] sm:$0xff]  ;;  %v4768_v11 = vld [vmem:[#allocation12 + $0xa8] sm:$0xff] }
 0xea1   :  { %v4622_v40 = vpop.permute.xlu0 %4621 }
 0xea2   :  { %v4596_v37 = vpop.permute.xlu1 %4595  ;;  %v4677_v47 = vld [vmem:[#allocation4 + $0x18] sm:$0xff] }
 0xea3   :  { %v4598_v14 = vsel %vm4597_vm8, %v4594_v7, %v4596_v37  ;;  %4602 = vst.msk [vmem:[#allocation4 + $0x38] sm:$0xff] %vm4561_vm7, %v4596_v37  ;;  %4706 = vmatprep.subr.bf16.mxu0 %v4677_v47  ;;  %v4766_v7 = vld [vmem:[#allocation12 + $0x98] sm:$0xff] }
 0xea4   :  { %4707 = vmatpush1.bf16.msra.mxu0 %v4571_v19  ;;  %v7899_v21 = vpack.c.bf16 %v4766_v7, %v4765_v24  ;;  %v4767_v19 = vld [vmem:[#allocation12 + $0xa0] sm:$0xff]  ;;  %v4770_v37 = vld [vmem:[#allocation12 + $0xb8] sm:$0xff]  ;;  %v5201_v7 = vld [vmem:[#allocation16] sm:$0xff] }
 0xea5   :  { %v4636_v4 = vpop.permute.xlu0 %4635 }
 0xea6   :  { %v4610_v50 = vpop.permute.xlu1 %4609  ;;  %v4679_v29 = vld [vmem:[#allocation4 + $0x28] sm:$0xff] }
 0xea7   :  { %v4612_v35 = vsel %vm4411_vm4, %v4608_v49, %v4610_v50  ;;  %4616 = vst.msk [vmem:[#allocation4 + $0x48] sm:$0xff] %vm4561_vm7, %v4610_v50  ;;  %4708 = vmatprep.subr.bf16.mxu0 %v4679_v29  ;;  %v7902_v49 = vpack.c.bf16 %v4768_v11, %v4767_v19  ;;  %v5202_v19 = vld [vmem:[#allocation16 + $0x8] sm:$0xff] }
 0xea8   :  { %4709 = vmatpush1.bf16.msra.mxu0 %v4584_v51  ;;  %v4769_v51 = vld [vmem:[#allocation12 + $0xb0] sm:$0xff] }
 0xea9   :  { %v4649_v36 = vpop.permute.xlu0 %4648  ;;  %v7905_v47 = vpack.c.bf16 %v4770_v37, %v4769_v51  ;;  %v5206_v37 = vld [vmem:[#allocation16 + $0x28] sm:$0xff] }
 0xeaa   :  { %v4624_v10 = vpop.permute.xlu1 %4623  ;;  %v4681_v9 = vld [vmem:[#allocation4 + $0x38] sm:$0xff] }
 0xeab   :  { %v4626_v27 = vsel %vm4625_vm3, %v4622_v40, %v4624_v10  ;;  %4630 = vst.msk [vmem:[#allocation4 + $0x58] sm:$0xff] %vm4561_vm7, %v4624_v10  ;;  %4710 = vmatprep.subr.bf16.mxu0 %v4681_v9  ;;  %v10813_v40 = vld.sshfl [vmem:[#allocation13] sm:$0x33 pattern:$0x76325410] }
 0xeac   :  { %4711 = vmatpush1.bf16.msra.mxu0 %v4598_v14  ;;  %v4771_v14 = vld [vmem:[#allocation12 + $0xc0] sm:$0xff]  ;;  %v4880_v50 = vcombine.high %v10813_v40, %v10813_v40 }
 0xead   :  { %v4663_v26 = vpop.permute.xlu0 %4662 }
 0xeae   :  { %v4638_v31 = vpop.permute.xlu1 %4637  ;;  %v4683_v59 = vld [vmem:[#allocation4 + $0x48] sm:$0xff] }
 0xeaf   :  { %v4639_v56 = vsel %vm491_vm6, %v4636_v4, %v4638_v31  ;;  %4643 = vst.msk [vmem:[#allocation4 + $0x68] sm:$0xff] %vm4561_vm7, %v4638_v31  ;;  %4712 = vmatprep.subr.bf16.mxu0 %v4683_v59  ;;  %vm5773_vm6 = vcmask 1045504  }
 0xeb0   :  { %4713 = vmatpush1.bf16.msra.mxu0 %v4612_v35 }
 0xeb2   :  { %v4651_v42 = vpop.permute.xlu1 %4650  ;;  %v4685_v52 = vld [vmem:[#allocation4 + $0x58] sm:$0xff] }
 0xeb3   :  { %v4653_v61 = vsel %vm4652_vm9, %v4649_v36, %v4651_v42  ;;  %4657 = vst.msk [vmem:[#allocation4 + $0x78] sm:$0xff] %vm4561_vm7, %v4651_v42  ;;  %4714 = vmatprep.subr.bf16.mxu0 %v4685_v52  ;;  %v4855_v42 = vld [vmem:[#allocation15] sm:$0x3] }
 0xeb4   :  { %4715 = vmatpush1.bf16.msra.mxu0 %v4626_v27  ;;  %v4860_v52 = vrot.slane %v4855_v42, %v9447_v48 }
 0xeb6   :  { %v4665_v17 = vpop.permute.xlu1 %4664  ;;  %v4687_v55 = vld [vmem:[#allocation4 + $0x68] sm:$0xff] }
 0xeb7   :  { %v4667_v6 = vsel %vm4666_vm12, %v4663_v26, %v4665_v17  ;;  %4671 = vst.msk [vmem:[#allocation4 + $0x88] sm:$0xff] %vm4561_vm7, %v4665_v17  ;;  %4716 = vmatprep.subr.bf16.mxu0 %v4687_v55 }
 0xeb8   :  { %4717 = vmatpush1.bf16.msra.mxu0 %v4639_v56 }
 0xeba   :  { %v4689_v3 = vld [vmem:[#allocation4 + $0x78] sm:$0xff] }
 0xebb   :  { %4718 = vmatprep.subr.bf16.mxu0 %v4689_v3 }
 0xebc   :  { %4719 = vmatpush1.bf16.msra.mxu0 %v4653_v61  ;;  %v4864_v61 = vrot.slane %v4855_v42, %v9451_v62 }
 0xebe   :  { %v4691_v38 = vld [vmem:[#allocation4 + $0x88] sm:$0xff] }
 0xebf   :  { %4720 = vmatprep.subr.bf16.mxu0 %v4691_v38 }
 0xec0   :  { %4721 = vmatpush1.bf16.msra.mxu0 %v4667_v6 }
 0xec1   :  { %7871 = vmatprep.subr.bf16.mxu0 %v11470_v44 }
 0xec3   :  { %4737 = vmatmul.mubr.bf16.vlgmr.msra.gmra.mrb[48].mxu0 %v8331_v33 }
 0xec4   :  { %7873 = vmatpush1.bf16.msra.mxu0 %v10779_v2 }
 0xec5   :  { %7874 = vmatprep.subr.bf16.mxu0 %v11470_v44 }
 0xec8   :  { %7876 = vmatpush1.bf16.msra.mxu0 %v10783_v25 }
 0xec9   :  { %7877 = vmatprep.subr.bf16.mxu0 %v11470_v44 }
 0xecc   :  { %7879 = vmatpush1.bf16.msra.mxu0 %v10787_v34 }
 0xecd   :  { %7880 = vmatprep.subr.bf16.mxu0 %v11470_v44 }
 0xed0   :  { %7882 = vmatpush1.bf16.msra.mxu0 %v10791_v39 }
 0xed1   :  { %7883 = vmatprep.subr.bf16.mxu0 %v11470_v44 }
 0xed4   :  { %7885 = vmatpush1.bf16.msra.mxu0 %v10795_v41 }
 0xed5   :  { %7886 = vmatprep.subr.bf16.mxu0 %v11470_v44 }
 0xed8   :  { %7888 = vmatpush1.bf16.msra.mxu0 %v10799_v20 }
 0xed9   :  { %7889 = vmatprep.subr.bf16.mxu0 %v11470_v44 }
 0xedc   :  { %7891 = vmatpush1.bf16.msra.mxu0 %v10803_v30 }
 0xedd   :  { %7892 = vmatprep.subr.bf16.mxu0 %v11470_v44 }
 0xee0   :  { %7894 = vmatpush1.bf16.msra.mxu0 %v7893_v23 }
 0xee1   :  { %7895 = vmatprep.subr.bf16.mxu0 %v11470_v44 }
 0xee4   :  { %7897 = vmatpush1.bf16.msra.mxu0 %v7896_v60 }
 0xee5   :  { %7898 = vmatprep.subr.bf16.mxu0 %v11470_v44 }
 0xee8   :  { %7900 = vmatpush1.bf16.msra.mxu0 %v7899_v21 }
 0xee9   :  { %7901 = vmatprep.subr.bf16.mxu0 %v11470_v44 }
 0xeec   :  { %7903 = vmatpush1.bf16.msra.mxu0 %v7902_v49 }
 0xeed   :  { %7904 = vmatprep.subr.bf16.mxu0 %v11470_v44 }
 0xef0   :  { %7906 = vmatpush1.bf16.msra.mxu0 %v7905_v47 }
 0xef1   :  { %4826 = vmatprep.subr.mxu0 %v11469_v63 }
 0xef4   :  { %4827 = vmatpush1.msra.mxu0 %v4771_v14 }
 0xef5   :  { %6898 = vmatprep.subr.msk.mxu0 %vm1281_vm10, %v4880_v50 }
 0xf96   :  { %v4738_v29 = vpop.f32.mrb[48].mxu0 }
 0xf97   :  { %v4740_v35 = vpop.f32.mrb[49].mxu0  ;;  %v4867_v26 = vmul.f32 %v4860_v52, %v4738_v29 }
 0xf98   :  { %v4742_v10 = vpop.f32.mrb[50].mxu0  ;;  %6895 = vmatprep.mubr.msk.f32.mxu0 %vm4561_vm7, %v4740_v35  ;;  %v4868_v17 = vmul.f32 %v4864_v61, %v4740_v35  ;;  %v5210_v35 = vld [vmem:[#allocation16 + $0x48] sm:$0xff] }
 0xf99   :  { %v4744_v9 = vpop.f32.mrb[51].mxu0  ;;  %4843 = vmatmul.mubr.f32.vlgmr.msra.gmra.mrb[52].mxu0 %v4738_v29  ;;  %v4869_v45 = vmul.f32 %v4860_v52, %v4742_v10  ;;  %v6911_v29 = vcombine.high %v5202_v19, %v5206_v37 }
 0xf9a   :  { %6896 = vmatprep.mubr.msk.f32.mxu0 %vm4561_vm7, %v4744_v9  ;;  %6899 = vmatpush1.msk.msra.mxu0 %vm1281_vm10, %v10813_v40  ;;  %v4870_v38 = vmul.f32 %v4864_v61, %v4744_v9  ;;  %v5217_v9 = vld [vmem:[#allocation16 + $0x80] sm:$0xff] }
 0xf9b   :  { %7907 = vmatprep.subr.bf16.mxu0 %v11470_v44  ;;  %5844 = vmatprep.subr.bf16.mxu1 %v6911_v29 }
 0xf9d   :  { %4848 = vmatmul.mubr.f32.gmra.mrb[54].mxu0 %v4742_v10  ;;  %v5214_v10 = vld [vmem:[#allocation16 + $0x68] sm:$0xff] }
 0xf9e   :  { %4955 = vmatprep.mubr.f32.mxu0 %v11469_v63  ;;  %v6918_v52 = vcombine.low %v5210_v35, %v5214_v10 }
0x106c   :  { %v4844_v4 = vpop.f32.mrb[52].mxu0 }
0x106d   :  { %v4853_v27 = vmul.f32 0.015625, %v4844_v4  ;;  %v4846_v31 = vpop.f32.mrb[53].mxu0 }
0x106e   :  { %v5221_v31 = vld [vmem:[#allocation16 + $0xa0] sm:$0xff] }
0x106f   :  { %6900 = vmatmul.mubr.msk.f32.vlgmr.msra.gmra.mrb[56].mxu0 %vm1274_vm11, %v4853_v27  ;;  %v6919_v27 = vcombine.high %v5210_v35, %v5214_v10  ;;  %v6925_v61 = vcombine.high %v5217_v9, %v5221_v31  ;;  %v5265_v35 = vld [vmem:[#allocation16 + $0x200] sm:$0xff] }
0x1070   :  { %v4849_v59 = vpop.f32.mrb[54].mxu0  ;;  %4961 = vmatprep.mubr.f32.mxu0 %v11469_v63  ;;  %7909 = vmatpush1.bf16.msra.mxu0 %v10779_v2  ;;  %v5269_v10 = vld [vmem:[#allocation16 + $0x220] sm:$0xff] }
0x1071   :  { %v4854_v56 = vmul.f32 0.015625, %v4849_v59  ;;  %v4851_v36 = vpop.f32.mrb[55].mxu0  ;;  %7910 = vmatprep.subr.bf16.mxu0 %v11470_v44  ;;  %v5218_v59 = vld [vmem:[#allocation16 + $0x88] sm:$0xff] }
0x1073   :  { %6901 = vmatmul.mubr.msk.f32.gmra.mrb[58].mxu0 %vm1274_vm11, %v4854_v56  ;;  %v5222_v56 = vld [vmem:[#allocation16 + $0xa8] sm:$0xff] }
0x1074   :  { %7912 = vmatpush1.bf16.msra.mxu0 %v10783_v25 }
0x1075   :  { %7913 = vmatprep.subr.bf16.mxu0 %v11470_v44 }
0x1078   :  { %7915 = vmatpush1.bf16.msra.mxu0 %v10787_v34 }
0x1079   :  { %7916 = vmatprep.subr.bf16.mxu0 %v11470_v44 }
0x107c   :  { %7918 = vmatpush1.bf16.msra.mxu0 %v10791_v39 }
0x107d   :  { %7919 = vmatprep.subr.bf16.mxu0 %v11470_v44 }
0x1080   :  { %7921 = vmatpush1.bf16.msra.mxu0 %v10795_v41 }
0x1081   :  { %7922 = vmatprep.subr.bf16.mxu0 %v11470_v44 }
0x1084   :  { %7924 = vmatpush1.bf16.msra.mxu0 %v10799_v20 }
0x1085   :  { %7925 = vmatprep.subr.bf16.mxu0 %v11470_v44 }
0x1088   :  { %7927 = vmatpush1.bf16.msra.mxu0 %v10803_v30 }
0x1089   :  { %7928 = vmatprep.subr.bf16.mxu0 %v11470_v44 }
0x108c   :  { %7930 = vmatpush1.bf16.msra.mxu0 %v7893_v23 }
0x108d   :  { %7931 = vmatprep.subr.bf16.mxu0 %v11470_v44 }
0x1090   :  { %7933 = vmatpush1.bf16.msra.mxu0 %v7896_v60 }
0x1091   :  { %7934 = vmatprep.subr.bf16.mxu0 %v11470_v44 }
0x1094   :  { %7936 = vmatpush1.bf16.msra.mxu0 %v7899_v21  ;;  %v5205_v21 = vld [vmem:[#allocation16 + $0x20] sm:$0xff] }
0x1095   :  { %7937 = vmatprep.subr.bf16.mxu0 %v11470_v44  ;;  %v6909_v51 = vcombine.high %v5201_v7, %v5205_v21 }
0x1098   :  { %7939 = vmatpush1.bf16.msra.mxu0 %v7902_v49  ;;  %v6908_v49 = vcombine.low %v5201_v7, %v5205_v21 }
0x1099   :  { %7940 = vmatprep.subr.bf16.mxu0 %v11470_v44 }
0x109c   :  { %7942 = vmatpush1.bf16.msra.mxu0 %v7905_v47  ;;  %v5209_v47 = vld [vmem:[#allocation16 + $0x40] sm:$0xff] }
0x109d   :  { %5030 = vmatprep.subr.mxu0 %v11469_v63 }
0x10a0   :  { %5031 = vmatpush1.msra.mxu0 %v4771_v14  ;;  %v5213_v14 = vld [vmem:[#allocation16 + $0x60] sm:$0xff] }
0x10a1   :  { %6904 = vmatprep.subr.msk.mxu0 %vm1281_vm10, %v4880_v50  ;;  %v6910_v50 = vcombine.low %v5202_v19, %v5206_v37  ;;  %v6917_v4 = vcombine.high %v5209_v47, %v5213_v14  ;;  %v6916_v42 = vcombine.low %v5209_v47, %v5213_v14  ;;  %v5257_v19 = vld [vmem:[#allocation16 + $0x1c0] sm:$0xff]  ;;  %v5262_v37 = vld [vmem:[#allocation16 + $0x1e8] sm:$0xff] }
0x10a3   :  { %5845 = vmatpush1.bf16.msra.mxu1 %v6910_v50 }
0x10a4   :  { %5846 = vmatprep.subr.bf16.mxu1 %v6919_v27 }
0x10a7   :  { %5847 = vmatpush1.bf16.msra.mxu1 %v6918_v52  ;;  %v5274_v52 = vld [vmem:[#allocation16 + $0x248] sm:$0xff] }
0x1142   :  { %v4957_v55 = vpop.f32.mrb[56].mxu0 }
0x1143   :  { %v4968_v6 = vsub.f32 %v4867_v26, %v4957_v55  ;;  %v4959_v3 = vpop.f32.mrb[57].mxu0  ;;  %v6927_v26 = vcombine.high %v5218_v59, %v5222_v56  ;;  %v5229_v55 = vld [vmem:[#allocation16 + $0xe0] sm:$0xff] }
0x1144   :  { %v4969_v12 = vsub.f32 %v4868_v17, %v4959_v3  ;;  %v5225_v17 = vld [vmem:[#allocation16 + $0xc0] sm:$0xff]  ;;  %v5230_v3 = vld [vmem:[#allocation16 + $0xe8] sm:$0xff] }
0x1145   :  { %v4972_v16 = vmul.f32 %v4968_v6, %v4968_v6  ;;  %5848 = vmatprep.subr.bf16.mxu1 %v6927_v26  ;;  %v6972_v26 = vcombine.low %v5265_v35, %v5269_v10 }
0x1146   :  { %v4973_v33 = vmul.f32 %v4969_v12, %v4969_v12  ;;  %v4963_v2 = vpop.f32.mrb[58].mxu0 }
0x1147   :  { %v4970_v5 = vsub.f32 %v4869_v45, %v4963_v2  ;;  %v4965_v25 = vpop.f32.mrb[59].mxu0  ;;  %v6926_v45 = vcombine.low %v5218_v59, %v5222_v56  ;;  %v5233_v2 = vld [vmem:[#allocation16 + $0x100] sm:$0xff]  ;;  %v6973_v59 = vcombine.high %v5265_v35, %v5269_v10 }
0x1148   :  { %v4971_v18 = vsub.f32 %v4870_v38, %v4965_v25  ;;  %6902 = vmatprep.mubr.msk.f32.mxu0 %vm4561_vm7, %v4973_v33  ;;  %v6933_v38 = vcombine.high %v5225_v17, %v5229_v55  ;;  %v5238_v25 = vld [vmem:[#allocation16 + $0x128] sm:$0xff] }
0x1149   :  { %5047 = vmatmul.mubr.f32.vlgmr.msra.gmra.mrb[60].mxu0 %v4972_v16  ;;  %v4974_v62 = vmul.f32 %v4970_v5, %v4970_v5  ;;  %v5237_v16 = vld [vmem:[#allocation16 + $0x120] sm:$0xff]  ;;  %5849 = vmatpush1.bf16.msra.mxu1 %v6926_v45  ;;  %v5775_v45 = vsel %vm5773_vm6, 4294967295, %v8546_v15 }
0x114a   :  { %v4975_v48 = vmul.f32 %v4971_v18, %v4971_v18  ;;  %6905 = vmatpush1.msk.msra.mxu0 %vm1281_vm10, %v10813_v40  ;;  %vm5774_vm10 = vcmask 1046528  }
0x114b   :  { %5801 = vmatprep.subr.bf16.mxu0 %v6909_v51  ;;  %v5258_v51 = vld [vmem:[#allocation16 + $0x1c8] sm:$0xff] }
0x114c   :  { %6903 = vmatprep.mubr.msk.f32.mxu0 %vm4561_vm7, %v4975_v48  ;;  %v6967_v29 = vcombine.high %v5258_v51, %v5262_v37 }
0x114d   :  { %5052 = vmatmul.mubr.f32.gmra.mrb[62].mxu0 %v4974_v62  ;;  %v6941_v62 = vcombine.high %v5233_v2, %v5237_v16 }
0x114e   :  { %5133 = vmatprep.mubr.f32.mxu0 %v11469_v63 }
0x121c   :  { %v5048_v46 = vpop.f32.mrb[60].mxu0 }
0x121d   :  { %v5057_v34 = vmul.f32 0.015625, %v5048_v46  ;;  %v5050_v8 = vpop.f32.mrb[61].mxu0 }
0x121e   :  { %v5245_v8 = vld [vmem:[#allocation16 + $0x160] sm:$0xff] }
0x121f   :  { %v5059_v22 = vadd.f32 1e-05, %v5057_v34  ;;  %v5241_v34 = vld [vmem:[#allocation16 + $0x140] sm:$0xff] }
0x1220   :  { %v5053_v39 = vpop.f32.mrb[62].mxu0 }
0x1221   :  { %8350 = vrsqrt.f32 %v5059_v22  ;;  %v5058_v53 = vmul.f32 0.015625, %v5053_v39  ;;  %v5055_v32 = vpop.f32.mrb[63].mxu0  ;;  %v5242_v22 = vld [vmem:[#allocation16 + $0x148] sm:$0xff] }
0x1222   :  { %v5246_v39 = vld [vmem:[#allocation16 + $0x168] sm:$0xff] }
0x1223   :  { %v5060_v41 = vadd.f32 1e-05, %v5058_v53  ;;  %v6940_v53 = vcombine.low %v5233_v2, %v5237_v16  ;;  %v5282_v2 = vld [vmem:[#allocation16 + $0x288] sm:$0xff] }
0x1225   :  { %8352 = vrsqrt.f32 %v5060_v41  ;;  %v6949_v41 = vcombine.high %v5241_v34, %v5245_v8 }
0x122b   :  { %v8351_v28 = vpop.eup %8350 }
0x122c   :  { %6906 = vmatmul.mubr.msk.f32.vlgmr.msra.gmra.mrb[64].mxu0 %vm1274_vm11, %v8351_v28  ;;  %v6951_v28 = vcombine.high %v5242_v22, %v5246_v39 }
0x122d   :  { %5139 = vmatprep.mubr.f32.mxu0 %v11469_v63  ;;  %5802 = vmatpush1.bf16.msra.mxu0 %v6908_v49  ;;  %v5261_v49 = vld [vmem:[#allocation16 + $0x1e0] sm:$0xff] }
0x122e   :  { %5803 = vmatprep.subr.bf16.mxu0 %v6917_v4  ;;  %v6965_v50 = vcombine.high %v5257_v19, %v5261_v49  ;;  %v5270_v4 = vld [vmem:[#allocation16 + $0x228] sm:$0xff]  ;;  %v6964_v27 = vcombine.low %v5257_v19, %v5261_v49  ;;  %v5207_v19 = vld [vmem:[#allocation16 + $0x30] sm:$0xff]  ;;  %v5204_v49 = vld [vmem:[#allocation16 + $0x18] sm:$0xff] }
0x122f   :  { %v8353_v43 = vpop.eup %8352 }
0x1230   :  { %6907 = vmatmul.mubr.msk.f32.gmra.mrb[66].mxu0 %vm1274_vm11, %v8353_v43  ;;  %v5249_v43 = vld [vmem:[#allocation16 + $0x180] sm:$0xff]  ;;  %vm8552_vm11 = vmmov 0  }
0x1231   :  { %5804 = vmatpush1.bf16.msra.mxu0 %v6916_v42  ;;  %v5277_v42 = vld [vmem:[#allocation16 + $0x260] sm:$0xff] }
0x1232   :  { %5805 = vmatprep.subr.bf16.mxu0 %v6925_v61  ;;  %v5278_v61 = vld [vmem:[#allocation16 + $0x268] sm:$0xff] }
0x12ff   :  { %v5135_v20 = vpop.f32.mrb[64].mxu0 }
0x1300   :  { %v10857_v58 = vmul.f32 %v5135_v20, %v4968_v6  ;;  %v5137_v1 = vpop.f32.mrb[65].mxu0  ;;  %v5226_v6 = vld [vmem:[#allocation16 + $0xc8] sm:$0xff]  ;;  %v5253_v20 = vld [vmem:[#allocation16 + $0x1a0] sm:$0xff] }
0x1301   :  { %v10859_v30 = vmul.f32 %v5137_v1, %v4969_v12  ;;  %v6924_v12 = vcombine.low %v5217_v9, %v5221_v31  ;;  %v6935_v33 = vcombine.high %v5226_v6, %v5230_v3  ;;  %v6934_v48 = vcombine.low %v5226_v6, %v5230_v3  ;;  %v5250_v1 = vld [vmem:[#allocation16 + $0x188] sm:$0xff] }
0x1302   :  { %v5150_v57 = vmax.f32 %v10857_v58, 0.0  ;;  %v6957_v7 = vcombine.high %v5249_v43, %v5253_v20  ;;  %v6956_v47 = vcombine.low %v5249_v43, %v5253_v20  ;;  %v5266_v9 = vld [vmem:[#allocation16 + $0x208] sm:$0xff]  ;;  %v6966_v31 = vcombine.low %v5258_v51, %v5262_v37 }
0x1303   :  { %v5151_v0 = vmax.f32 %v10859_v30, 0.0  ;;  %v5141_v23 = vpop.f32.mrb[66].mxu0  ;;  %5806 = vmatpush1.bf16.msra.mxu0 %v6924_v12  ;;  %5850 = vmatprep.subr.bf16.mxu1 %v6935_v33  ;;  %v6975_v56 = vcombine.high %v5266_v9, %v5270_v4  ;;  %v6983_v6 = vcombine.high %v5274_v52, %v5278_v61  ;;  %v6982_v12 = vcombine.low %v5274_v52, %v5278_v61  ;;  %v5285_v33 = vld [vmem:[#allocation16 + $0x2a0] sm:$0xff] }
0x1304   :  { %v10863_v54 = vmul.f32 %v5141_v23, %v4970_v5  ;;  %v5143_v13 = vpop.f32.mrb[67].mxu0  ;;  %v5234_v5 = vld [vmem:[#allocation16 + $0x108] sm:$0xff]  ;;  %5807 = vmatprep.subr.bf16.mxu0 %v6933_v38  ;;  %5851 = vmatpush1.bf16.msra.mxu1 %v6934_v48  ;;  %v5281_v38 = vld [vmem:[#allocation16 + $0x280] sm:$0xff] }
0x1305   :  { %v8176_v60 = vpack.i.bf16 %v5151_v0, %v5150_v57  ;;  %v10869_v24 = vmul.f32 %v5143_v13, %v4971_v18  ;;  %v6932_v18 = vcombine.low %v5225_v17, %v5229_v55  ;;  %v6943_v46 = vcombine.high %v5234_v5, %v5238_v25  ;;  %v5254_v23 = vld [vmem:[#allocation16 + $0x1a8] sm:$0xff] }
0x1306   :  { %v5152_v11 = vmax.f32 %v10863_v54, 0.0  ;;  %v6942_v32 = vcombine.low %v5234_v5, %v5238_v25  ;;  %v6948_v13 = vcombine.low %v5241_v34, %v5245_v8  ;;  %v6959_v21 = vcombine.high %v5250_v1, %v5254_v23  ;;  %v5286_v5 = vld [vmem:[#allocation16 + $0x2a8] sm:$0xff]  ;;  %v5293_v34 = vld [vmem:[#allocation16 + $0x2e0] sm:$0x77]  ;;  %v5211_v54 = vld [vmem:[#allocation16 + $0x50] sm:$0xff] }
0x1307   :  { %v5153_v40 = vmax.f32 %v10869_v24, 0.0  ;;  %8177 = vrot.lane.b32.xlu0 %v8176_v60, %s8533_s30  ;;  %5808 = vmatpush1.bf16.msra.mxu0 %v6932_v18  ;;  %v6950_v60 = vcombine.low %v5242_v22, %v5246_v39  ;;  %v6958_v14 = vcombine.low %v5250_v1, %v5254_v23  ;;  %v6974_v17 = vcombine.low %v5266_v9, %v5270_v4  ;;  %v5290_v8 = vld [vmem:[#allocation16 + $0x2c8] sm:$0xff] }
0x1308   :  { %5809 = vmatprep.subr.bf16.mxu0 %v6941_v62  ;;  %5852 = vmatprep.subr.bf16.mxu1 %v6943_v46  ;;  %v6989_v16 = vcombine.high %v5281_v38, %v5285_v33  ;;  %v10880_v25 = vsel %vm5774_vm10, %v5775_v45, 0  ;;  %v6988_v18 = vcombine.low %v5281_v38, %v5285_v33  ;;  %v6990_v48 = vcombine.low %v5282_v2, %v5286_v5  ;;  %v5289_v46 = vld [vmem:[#allocation16 + $0x2c0] sm:$0xff]  ;;  %v5294_v39 = vld [vmem:[#allocation16 + $0x2e8] sm:$0x77]  ;;  %v5219_v45 = vld [vmem:[#allocation16 + $0x90] sm:$0xff] }
0x1309   :  { %v8181_v36 = vpack.i.bf16 %v5153_v40, %v5152_v11  ;;  %5853 = vmatpush1.bf16.msra.mxu1 %v6942_v32  ;;  %v6991_v62 = vcombine.high %v5282_v2, %v5286_v5  ;;  %v6997_v22 = vcombine.high %v5289_v46, %v5293_v34  ;;  %v6998_v15 = vcombine.low %v5290_v8, %v5294_v39  ;;  %v5223_v2 = vld [vmem:[#allocation16 + $0xb0] sm:$0xff]  ;;  %v5224_v5 = vld [vmem:[#allocation16 + $0xb8] sm:$0xff] }
0x130a   :  { %5854 = vmatprep.subr.bf16.mxu1 %v6951_v28  ;;  %v6999_v32 = vcombine.high %v5290_v8, %v5294_v39  ;;  %v5231_v8 = vld [vmem:[#allocation16 + $0xf0] sm:$0xff]  ;;  %v5232_v39 = vld [vmem:[#allocation16 + $0xf8] sm:$0xff] }
0x130b   :  { %8182 = vrot.lane.b32.xlu1 %v8181_v36, %s8533_s30  ;;  %5810 = vmatpush1.bf16.msra.mxu0 %v6940_v53  ;;  %v5273_v36 = vld [vmem:[#allocation16 + $0x240] sm:$0xff]  ;;  %v6996_v53 = vcombine.low %v5289_v46, %v5293_v34  ;;  %v5781_v28 = vand.u32 %v6997_v22, %v10880_v25  ;;  %v5227_v34 = vld [vmem:[#allocation16 + $0xd0] sm:$0xff]  ;;  %v5228_v22 = vld [vmem:[#allocation16 + $0xd8] sm:$0xff] }
0x130c   :  { %5811 = vmatprep.subr.bf16.mxu0 %v6949_v41  ;;  %v6981_v55 = vcombine.high %v5273_v36, %v5277_v42  ;;  %v6980_v3 = vcombine.low %v5273_v36, %v5277_v42  ;;  %v5787_v1 = vand.u32 %v6999_v32, %v10880_v25  ;;  %v6937_v32 = vcombine.high %v5227_v34, %v5231_v8 }
0x130d   :  { %5855 = vmatpush1.bf16.msra.mxu1 %v6950_v60  ;;  %v5778_v23 = vand.u32 %v6996_v53, %v10880_v25  ;;  %v6928_v53 = vcombine.low %v5219_v45, %v5223_v2 }
0x130e   :  { %5856 = vmatprep.subr.bf16.mxu1 %v6959_v21  ;;  %v5203_v21 = vld [vmem:[#allocation16 + $0x10] sm:$0xff] }
0x130f   :  { %5812 = vmatpush1.bf16.msra.mxu0 %v6948_v13  ;;  %v5784_v13 = vand.u32 %v6998_v15, %v10880_v25  ;;  %v6912_v35 = vcombine.low %v5203_v21, %v5207_v19 }
0x1310   :  { %5813 = vmatprep.subr.bf16.mxu0 %v6957_v7 }
0x1311   :  { %5857 = vmatpush1.bf16.msra.mxu1 %v6958_v14  ;;  %v5208_v14 = vld [vmem:[#allocation16 + $0x38] sm:$0xff] }
0x1312   :  { %5858 = vmatprep.subr.bf16.mxu1 %v6967_v29  ;;  %v6914_v10 = vcombine.low %v5204_v49, %v5208_v14 }
0x1313   :  { %5814 = vmatpush1.bf16.msra.mxu0 %v6956_v47  ;;  %v6913_v47 = vcombine.high %v5203_v21, %v5207_v19  ;;  %v5243_v21 = vld [vmem:[#allocation16 + $0x150] sm:$0xff] }
0x1314   :  { %5815 = vmatprep.subr.bf16.mxu0 %v6965_v50  ;;  %v5247_v19 = vld [vmem:[#allocation16 + $0x170] sm:$0xff] }
0x1315   :  { %5859 = vmatpush1.bf16.msra.mxu1 %v6966_v31 }
0x1316   :  { %5860 = vmatprep.subr.bf16.mxu1 %v6975_v56 }
0x1317   :  { %5816 = vmatpush1.bf16.msra.mxu0 %v6964_v27 }
0x1318   :  { %5817 = vmatprep.subr.bf16.mxu0 %v6973_v59 }
0x1319   :  { %5861 = vmatpush1.bf16.msra.mxu1 %v6974_v17  ;;  %v5215_v17 = vld [vmem:[#allocation16 + $0x70] sm:$0xff] }
0x131a   :  { %5862 = vmatprep.subr.bf16.mxu1 %v6983_v6  ;;  %v5216_v6 = vld [vmem:[#allocation16 + $0x78] sm:$0xff]  ;;  %v6921_v38 = vcombine.high %v5211_v54, %v5215_v17 }
0x131b   :  { %5818 = vmatpush1.bf16.msra.mxu0 %v6972_v26 }
0x131c   :  { %5819 = vmatprep.subr.bf16.mxu0 %v6981_v55  ;;  %v5212_v55 = vld [vmem:[#allocation16 + $0x58] sm:$0xff] }
0x131d   :  { %5863 = vmatpush1.bf16.msra.mxu1 %v6982_v12  ;;  %v6923_v33 = vcombine.high %v5212_v55, %v5216_v6 }
0x131e   :  { %5864 = vmatprep.subr.bf16.mxu1 %v6991_v62  ;;  %v6929_v62 = vcombine.high %v5219_v45, %v5223_v2  ;;  %v5276_v45 = vld [vmem:[#allocation16 + $0x258] sm:$0xff] }
0x131f   :  { %5820 = vmatpush1.bf16.msra.mxu0 %v6980_v3 }
0x1320   :  { %5821 = vmatprep.subr.bf16.mxu0 %v6989_v16  ;;  %v5220_v16 = vld [vmem:[#allocation16 + $0x98] sm:$0xff] }
0x1321   :  { %5865 = vmatpush1.bf16.msra.mxu1 %v6990_v48  ;;  %v6922_v48 = vcombine.low %v5212_v55, %v5216_v6  ;;  %v6931_v46 = vcombine.high %v5220_v16, %v5224_v5  ;;  %v6930_v15 = vcombine.low %v5220_v16, %v5224_v5  ;;  %v5275_v6 = vld [vmem:[#allocation16 + $0x250] sm:$0xff] }
0x1322   :  { %5866 = vmatprep.subr.bf16.mxu1 %v5787_v1  ;;  %v5240_v1 = vld [vmem:[#allocation16 + $0x138] sm:$0xff]  ;;  %v5283_v16 = vld [vmem:[#allocation16 + $0x290] sm:$0xff] }
0x1323   :  { %5822 = vmatpush1.bf16.msra.mxu0 %v6988_v18  ;;  %v6920_v18 = vcombine.low %v5211_v54, %v5215_v17  ;;  %v5272_v54 = vld [vmem:[#allocation16 + $0x238] sm:$0xff]  ;;  %v5287_v5 = vld [vmem:[#allocation16 + $0x2b0] sm:$0xff] }
0x1324   :  { %5823 = vmatprep.subr.bf16.mxu0 %v5781_v28  ;;  %v5235_v28 = vld [vmem:[#allocation16 + $0x110] sm:$0xff] }
0x1325   :  { %5867 = vmatpush1.bf16.msra.mxu1 %v5784_v13  ;;  %v6938_v13 = vcombine.low %v5228_v22, %v5232_v39 }
0x1327   :  { %5824 = vmatpush1.bf16.msra.mxu0 %v5778_v23  ;;  %v6936_v23 = vcombine.low %v5227_v34, %v5231_v8  ;;  %v5291_v34 = vld [vmem:[#allocation16 + $0x2d0] sm:$0xff] }
0x1328   :  { %5887 = vmatprep.subr.bf16.mxu0 %v6913_v47  ;;  %v5295_v8 = vld [vmem:[#allocation16 + $0x2f0] sm:$0x77] }
0x1379   :  { %v8178_v41 = vpop.permute.xlu0 %8177 }
0x137a   :  { %v8180_v43 = vunpack.i.h.bf16 %v8178_v41  ;;  %v8179_v20 = vunpack.i.l.bf16 %v8178_v41  ;;  %v6939_v41 = vcombine.high %v5228_v22, %v5232_v39  ;;  %v5292_v22 = vld [vmem:[#allocation16 + $0x2d8] sm:$0xff] }
0x137b   :  { %v5296_v39 = vld [vmem:[#allocation16 + $0x2f8] sm:$0x77] }
0x137c   :  { %v5173_v60 = vmax.f32 %v5151_v0, %v8180_v43  ;;  %v5166_v7 = vsel %vm251_vm2, %v8179_v20, %v8180_v43  ;;  %v6915_v0 = vcombine.high %v5204_v49, %v5208_v14  ;;  %v5239_v43 = vld [vmem:[#allocation16 + $0x130] sm:$0xff]  ;;  %v5236_v20 = vld [vmem:[#allocation16 + $0x118] sm:$0xff]  ;;  %v6953_v14 = vcombine.high %v5243_v21, %v5247_v19 }
0x137d   :  { %v5172_v51 = vmax.f32 %v5150_v57, %v5166_v7  ;;  %v8183_v37 = vpop.permute.xlu1 %8182  ;;  %v6947_v7 = vcombine.high %v5236_v20, %v5240_v1  ;;  %v5244_v49 = vld [vmem:[#allocation16 + $0x158] sm:$0xff]  ;;  %v6946_v47 = vcombine.low %v5236_v20, %v5240_v1  ;;  %v6992_v20 = vcombine.low %v5283_v16, %v5287_v5 }
0x137e   :  { %v8185_v50 = vunpack.i.h.bf16 %v8183_v37  ;;  %v8184_v29 = vunpack.i.l.bf16 %v8183_v37  ;;  %5930 = vmatprep.subr.bf16.mxu1 %v6915_v0  ;;  %v6944_v37 = vcombine.low %v5235_v28, %v5239_v43  ;;  %v6952_v0 = vcombine.low %v5243_v21, %v5247_v19  ;;  %v6021_v21 = vld [vmem:[%s11375_s17 + $0x80] sm:$0xff]  ;;  %v6022_v19 = vld [vmem:[%s11375_s17 + $0x88] sm:$0xff] }
0x137f   :  { %v8186_v30 = vpack.i.bf16 %v5173_v60, %v5172_v51 }
0x1380   :  { %v5175_v9 = vmax.f32 %v5153_v40, %v8185_v50  ;;  %v5167_v4 = vsel %vm251_vm2, %v8184_v29, %v8185_v50  ;;  %vm5769_vm2 = vcmask 498688   ;;  %v5251_v29 = vld [vmem:[#allocation16 + $0x190] sm:$0xff] }
0x1381   :  { %v5174_v58 = vmax.f32 %v5152_v11, %v5167_v4  ;;  %8187 = vrot.lane.b32.xlu0 %v8186_v30, %s8547_s10  ;;  %v5256_v30 = vld [vmem:[#allocation16 + $0x1b8] sm:$0xff] }
0x1383   :  { %v8191_v57 = vpack.i.bf16 %v5175_v9, %v5174_v58 }
0x1385   :  { %8192 = vrot.lane.b32.xlu1 %v8191_v57, %s8547_s10  ;;  %v5259_v57 = vld [vmem:[#allocation16 + $0x1d0] sm:$0xff] }
0x13f3   :  { %v8188_v27 = vpop.permute.xlu0 %8187 }
0x13f4   :  { %v8190_v31 = vunpack.i.h.bf16 %v8188_v27  ;;  %v8189_v59 = vunpack.i.l.bf16 %v8188_v27  ;;  %v5263_v27 = vld [vmem:[#allocation16 + $0x1f0] sm:$0xff] }
0x13f6   :  { %v5189_v36 = vsel %vm4597_vm8, %v8189_v59, %v8190_v31  ;;  %v5196_v40 = vmax.f32 %v5173_v60, %v8190_v31  ;;  %v6945_v60 = vcombine.high %v5235_v28, %v5239_v43  ;;  %v5260_v31 = vld [vmem:[#allocation16 + $0x1d8] sm:$0xff]  ;;  %v7001_v28 = vcombine.high %v5291_v34, %v5295_v8 }
0x13f7   :  { %v8193_v56 = vpop.permute.xlu1 %8192  ;;  %v5195_v11 = vmax.f32 %v5172_v51, %v5189_v36  ;;  %v5248_v51 = vld [vmem:[#allocation16 + $0x178] sm:$0xff]  ;;  %v7003_v43 = vcombine.high %v5292_v22, %v5296_v39 }
0x13f8   :  { %v8195_v42 = vunpack.i.h.bf16 %v8193_v56  ;;  %v8194_v24 = vunpack.i.l.bf16 %v8193_v56  ;;  %v6955_v50 = vcombine.high %v5244_v49, %v5248_v51  ;;  %v5264_v59 = vld [vmem:[#allocation16 + $0x1f8] sm:$0xff] }
0x13fa   :  { %v5198_v52 = vmax.f32 %v5175_v9, %v8195_v42  ;;  %v5190_v61 = vsel %vm4597_vm8, %v8194_v24, %v8195_v42  ;;  %v6954_v9 = vcombine.low %v5244_v49, %v5248_v51  ;;  %v6969_v42 = vcombine.high %v5259_v57, %v5263_v27  ;;  %v6053_v49 = vld [vmem:[%s11375_s17 + $0x180] sm:$0xff]  ;;  %v6054_v51 = vld [vmem:[%s11375_s17 + $0x188] sm:$0xff] }
0x13fb   :  { %v5197_v26 = vmax.f32 %v5174_v58, %v5190_v61  ;;  %v6971_v24 = vcombine.high %v5260_v31, %v5264_v59  ;;  %v5268_v61 = vld [vmem:[#allocation16 + $0x218] sm:$0xff] }
0x13fc   :  { %v5200_v3 = vpack.c.bf16 %v5198_v52, %v5196_v40  ;;  %v5267_v40 = vld [vmem:[#allocation16 + $0x210] sm:$0xff]  ;;  %v6979_v55 = vcombine.high %v5268_v61, %v5272_v54  ;;  %v6978_v2 = vcombine.low %v5268_v61, %v5272_v54  ;;  %v6058_v61 = vld [vmem:[%s11375_s17 + $0x1a8] sm:$0xff] }
0x13fd   :  { %v10900_v12 = vpack.c.bf16 %v5197_v26, %v5195_v11  ;;  %v5271_v52 = vld [vmem:[#allocation16 + $0x230] sm:$0xff]  ;;  %v6968_v11 = vcombine.low %v5259_v57, %v5263_v27  ;;  %v6970_v26 = vcombine.low %v5260_v31, %v5264_v59  ;;  %v6007_v27 = vld [vmem:[%s11375_s17 + $0x10] sm:$0xff] }
0x13fe   :  { %7004 = vmatprep.mubr.msk.bf16.mxu0 %vm5769_vm2, %v5200_v3  ;;  %7005 = vmatprep.mubr.msk.bf16.mxu1 %vm5769_vm2, %v5200_v3  ;;  %v6977_v17 = vcombine.high %v5267_v40, %v5271_v52  ;;  %v6008_v31 = vld [vmem:[%s11375_s17 + $0x18] sm:$0xff] }
0x13ff   :  { %5834 = vmatmul.mubr.bf16.vlgmr.msra.gmra.mrb[68].mxu0 %v10900_v12  ;;  %5877 = vmatmul.mubr.bf16.vlgmr.msra.gmra.mrb[76].mxu1 %v10900_v12  ;;  %v7949_v54 = vpack.c.bf16 %v6008_v31, %v6007_v27  ;;  %v6018_v31 = vld [vmem:[%s11375_s17 + $0x68] sm:$0xff] }
0x1400   :  { %5888 = vmatpush1.bf16.msra.mxu0 %v6912_v35  ;;  %5931 = vmatpush1.bf16.msra.mxu1 %v6914_v10  ;;  %v5255_v35 = vld [vmem:[#allocation16 + $0x1b0] sm:$0xff]  ;;  %v5252_v10 = vld [vmem:[#allocation16 + $0x198] sm:$0xff] }
0x1401   :  { %7006 = vmatprep.mubr.msk.bf16.mxu0 %vm5769_vm2, %v5200_v3  ;;  %7007 = vmatprep.mubr.msk.bf16.mxu1 %vm5769_vm2, %v5200_v3  ;;  %v6961_v4 = vcombine.high %v5251_v29, %v5255_v35  ;;  %v6963_v58 = vcombine.high %v5252_v10, %v5256_v30  ;;  %v6960_v56 = vcombine.low %v5251_v29, %v5255_v35  ;;  %v5279_v3 = vld [vmem:[#allocation16 + $0x270] sm:$0xff] }
0x1402   :  { %5889 = vmatprep.subr.bf16.mxu0 %v6921_v38  ;;  %5932 = vmatprep.subr.bf16.mxu1 %v6923_v33  ;;  %v6962_v36 = vcombine.low %v5252_v10, %v5256_v30  ;;  %v5280_v38 = vld [vmem:[#allocation16 + $0x278] sm:$0xff]  ;;  %v6976_v33 = vcombine.low %v5267_v40, %v5271_v52  ;;  %v7943_v29 = vpack.c.bf16 %v6022_v19, %v6021_v21  ;;  %v6023_v30 = vld [vmem:[%s11375_s17 + $0x90] sm:$0xff]  ;;  %v6064_v19 = vld [vmem:[%s11375_s17 + $0x1d8] sm:$0xff] }
0x1403   :  { %v7975_v35 = vpack.c.bf16 %v6054_v51, %v6053_v49  ;;  %v6037_v10 = vld [vmem:[%s11375_s17 + $0x100] sm:$0xff]  ;;  %v6026_v40 = vld [vmem:[%s11375_s17 + $0xa8] sm:$0xff]  ;;  %v6063_v21 = vld [vmem:[%s11375_s17 + $0x1d0] sm:$0xff] }
0x1404   :  { %5890 = vmatpush1.bf16.msra.mxu0 %v6920_v18  ;;  %5933 = vmatpush1.bf16.msra.mxu1 %v6922_v48  ;;  %v6985_v18 = vcombine.high %v5275_v6, %v5279_v3  ;;  %v6987_v48 = vcombine.high %v5276_v45, %v5280_v38  ;;  %v6057_v52 = vld [vmem:[%s11375_s17 + $0x1a0] sm:$0xff] }
0x1405   :  { %5891 = vmatprep.subr.bf16.mxu0 %v6929_v62  ;;  %5934 = vmatprep.subr.bf16.mxu1 %v6931_v46  ;;  %v5284_v62 = vld [vmem:[#allocation16 + $0x298] sm:$0xff] }
0x1406   :  { %v5288_v46 = vld [vmem:[#allocation16 + $0x2b8] sm:$0xff] }
0x1407   :  { %v6994_v1 = vcombine.low %v5284_v62, %v5288_v46 }
0x1408   :  { %5892 = vmatpush1.bf16.msra.mxu0 %v6928_v53  ;;  %5935 = vmatpush1.bf16.msra.mxu1 %v6930_v15  ;;  %v6984_v53 = vcombine.low %v5275_v6, %v5279_v3  ;;  %v6986_v15 = vcombine.low %v5276_v45, %v5280_v38  ;;  %v7983_v6 = vpack.c.bf16 %v6058_v61, %v6057_v52  ;;  %v6042_v3 = vld [vmem:[%s11375_s17 + $0x128] sm:$0xff]  ;;  %v6027_v45 = vld [vmem:[%s11375_s17 + $0xb0] sm:$0xff]  ;;  %v6028_v38 = vld [vmem:[%s11375_s17 + $0xb8] sm:$0xff] }
0x1409   :  { %5893 = vmatprep.subr.bf16.mxu0 %v6937_v32  ;;  %5936 = vmatprep.subr.bf16.mxu1 %v6939_v41  ;;  %v6993_v32 = vcombine.high %v5283_v16, %v5287_v5  ;;  %v6995_v41 = vcombine.high %v5284_v62, %v5288_v46  ;;  %v7955_v62 = vpack.c.bf16 %v6028_v38, %v6027_v45  ;;  %v6067_v52 = vld [vmem:[%s11375_s17 + $0x1f0] sm:$0xff]  ;;  %v6085_v45 = vld [vmem:[%s11375_s17 + $0x280] sm:$0xff]  ;;  %v6086_v38 = vld [vmem:[%s11375_s17 + $0x288] sm:$0xff] }
0x140c   :  { %5894 = vmatpush1.bf16.msra.mxu0 %v6936_v23  ;;  %5937 = vmatpush1.bf16.msra.mxu1 %v6938_v13  ;;  %v7000_v23 = vcombine.low %v5291_v34, %v5295_v8  ;;  %v7002_v13 = vcombine.low %v5292_v22, %v5296_v39  ;;  %v6043_v34 = vld [vmem:[%s11375_s17 + $0x130] sm:$0xff]  ;;  %v6044_v8 = vld [vmem:[%s11375_s17 + $0x138] sm:$0xff]  ;;  %v6029_v22 = vld [vmem:[%s11375_s17 + $0xc0] sm:$0xff] }
0x140d   :  { %5895 = vmatprep.subr.bf16.mxu0 %v6945_v60  ;;  %5938 = vmatprep.subr.bf16.mxu1 %v6947_v7  ;;  %v5793_v60 = vand.u32 %v7001_v28, %v10880_v25  ;;  %v5799_v7 = vand.u32 %v7003_v43, %v10880_v25  ;;  %v6030_v39 = vld [vmem:[%s11375_s17 + $0xc8] sm:$0xff]  ;;  %v6013_v28 = vld [vmem:[%s11375_s17 + $0x40] sm:$0xff] }
0x140e   :  { %v6014_v43 = vld [vmem:[%s11375_s17 + $0x48] sm:$0xff] }
0x140f   :  { %v7961_v49 = vpack.c.bf16 %v6014_v43, %v6013_v28  ;;  %v6088_v28 = vld [vmem:[%s11375_s17 + $0x298] sm:$0xff] }
0x1410   :  { %5896 = vmatpush1.bf16.msra.mxu0 %v6944_v37  ;;  %5939 = vmatpush1.bf16.msra.mxu1 %v6946_v47  ;;  %v5790_v37 = vand.u32 %v7000_v23, %v10880_v25  ;;  %v5796_v47 = vand.u32 %v7002_v13, %v10880_v25  ;;  %v6038_v25 = vld [vmem:[%s11375_s17 + $0x108] sm:$0xff]  ;;  %v6045_v23 = vld [vmem:[%s11375_s17 + $0x140] sm:$0xff] }
0x1411   :  { %5897 = vmatprep.subr.bf16.mxu0 %v6953_v14  ;;  %5940 = vmatprep.subr.bf16.mxu1 %v6955_v50  ;;  %v6005_v14 = vld [vmem:[%s11375_s17] sm:$0xff]  ;;  %v6006_v50 = vld [vmem:[%s11375_s17 + $0x8] sm:$0xff]  ;;  %v7977_v57 = vpack.c.bf16 %v6038_v25, %v6037_v10 }
0x1412   :  { %v6046_v13 = vld [vmem:[%s11375_s17 + $0x148] sm:$0xff]  ;;  %v6033_v10 = vld [vmem:[%s11375_s17 + $0xe0] sm:$0xff] }
0x1413   :  { %v7993_v51 = vpack.c.bf16 %v6046_v13, %v6045_v23  ;;  %v6034_v25 = vld [vmem:[%s11375_s17 + $0xe8] sm:$0xff]  ;;  %v6119_v23 = vld [vmem:[%s11375_s17 + $0x390] sm:$0xff]  ;;  %v6120_v13 = vld [vmem:[%s11375_s17 + $0x398] sm:$0xff] }
0x1414   :  { %5898 = vmatpush1.bf16.msra.mxu0 %v6952_v0  ;;  %5941 = vmatpush1.bf16.msra.mxu1 %v6954_v9  ;;  %v6024_v0 = vld [vmem:[%s11375_s17 + $0x98] sm:$0xff]  ;;  %v6055_v9 = vld [vmem:[%s11375_s17 + $0x190] sm:$0xff] }
0x1415   :  { %5899 = vmatprep.subr.bf16.mxu0 %v6961_v4  ;;  %5942 = vmatprep.subr.bf16.mxu1 %v6963_v58  ;;  %v6056_v4 = vld [vmem:[%s11375_s17 + $0x198] sm:$0xff]  ;;  %v7945_v58 = vpack.c.bf16 %v6006_v50, %v6005_v14  ;;  %v7947_v59 = vpack.c.bf16 %v6024_v0, %v6023_v30  ;;  %v7995_v50 = vpack.c.bf16 %v6064_v19, %v6063_v21  ;;  %v6065_v30 = vld [vmem:[%s11375_s17 + $0x1e0] sm:$0xff]  ;;  %v6066_v0 = vld [vmem:[%s11375_s17 + $0x1e8] sm:$0xff] }
0x1416   :  { %v7999_v27 = vpack.c.bf16 %v6066_v0, %v6065_v30  ;;  %v5981_v19 = vld [vmem:[#allocation18 + $0x40] sm:$0xff]  ;;  %v6072_v30 = vld [vmem:[%s11375_s17 + $0x218] sm:$0xff] }
0x1418   :  { %5900 = vmatpush1.bf16.msra.mxu0 %v6960_v56  ;;  %5943 = vmatpush1.bf16.msra.mxu1 %v6962_v36  ;;  %v7979_v56 = vpack.c.bf16 %v6056_v4, %v6055_v9  ;;  %v6039_v36 = vld [vmem:[%s11375_s17 + $0x110] sm:$0xff] }
0x1419   :  { %5901 = vmatprep.subr.bf16.mxu0 %v6969_v42  ;;  %5944 = vmatprep.subr.bf16.mxu1 %v6971_v24  ;;  %v6040_v42 = vld [vmem:[%s11375_s17 + $0x118] sm:$0xff]  ;;  %v6025_v24 = vld [vmem:[%s11375_s17 + $0xa0] sm:$0xff] }
0x141c   :  { %5902 = vmatpush1.bf16.msra.mxu0 %v6968_v11  ;;  %5945 = vmatpush1.bf16.msra.mxu1 %v6970_v26  ;;  %v7981_v11 = vpack.c.bf16 %v6040_v42, %v6039_v36  ;;  %v6009_v26 = vld [vmem:[%s11375_s17 + $0x20] sm:$0xff] }
0x141d   :  { %5903 = vmatprep.subr.bf16.mxu0 %v6977_v17  ;;  %5946 = vmatprep.subr.bf16.mxu1 %v6979_v55  ;;  %v6010_v17 = vld [vmem:[%s11375_s17 + $0x28] sm:$0xff]  ;;  %v7951_v55 = vpack.c.bf16 %v6026_v40, %v6025_v24  ;;  %v6035_v24 = vld [vmem:[%s11375_s17 + $0xf0] sm:$0xff]  ;;  %v6036_v40 = vld [vmem:[%s11375_s17 + $0xf8] sm:$0xff] }
0x141e   :  { %v7953_v16 = vpack.c.bf16 %v6010_v17, %v6009_v26  ;;  %v7971_v61 = vpack.c.bf16 %v6036_v40, %v6035_v24  ;;  %v6020_v17 = vld [vmem:[%s11375_s17 + $0x78] sm:$0xff] }
0x1420   :  { %5904 = vmatpush1.bf16.msra.mxu0 %v6976_v33  ;;  %5947 = vmatpush1.bf16.msra.mxu1 %v6978_v2  ;;  %v6059_v33 = vld [vmem:[%s11375_s17 + $0x1b0] sm:$0xff]  ;;  %v6060_v2 = vld [vmem:[%s11375_s17 + $0x1b8] sm:$0xff] }
0x1421   :  { %5905 = vmatprep.subr.bf16.mxu0 %v6985_v18  ;;  %5948 = vmatprep.subr.bf16.mxu1 %v6987_v48  ;;  %v6011_v18 = vld [vmem:[%s11375_s17 + $0x30] sm:$0xff]  ;;  %v6012_v48 = vld [vmem:[%s11375_s17 + $0x38] sm:$0xff]  ;;  %v7987_v46 = vpack.c.bf16 %v6060_v2, %v6059_v33  ;;  %v6117_v33 = vld [vmem:[%s11375_s17 + $0x380] sm:$0xff]  ;;  %v8007_v2 = vpack.c.bf16 %v6086_v38, %v6085_v45 }
0x1424   :  { %5906 = vmatpush1.bf16.msra.mxu0 %v6984_v53  ;;  %5949 = vmatpush1.bf16.msra.mxu1 %v6986_v15  ;;  %v6061_v53 = vld [vmem:[%s11375_s17 + $0x1c0] sm:$0xff]  ;;  %v6062_v15 = vld [vmem:[%s11375_s17 + $0x1c8] sm:$0xff] }
0x1425   :  { %5907 = vmatprep.subr.bf16.mxu0 %v6993_v32  ;;  %5950 = vmatprep.subr.bf16.mxu1 %v6995_v41  ;;  %v7957_v32 = vpack.c.bf16 %v6012_v48, %v6011_v18  ;;  %v7989_v41 = vpack.c.bf16 %v6044_v8, %v6043_v34  ;;  %v5973_v18 = vld [vmem:[#allocation18] sm:$0xff]  ;;  %v5975_v48 = vld [vmem:[#allocation18 + $0x10] sm:$0xff]  ;;  %v5982_v34 = vld [vmem:[#allocation18 + $0x48] sm:$0xff] }
0x1426   :  { %v6069_v8 = vld [vmem:[%s11375_s17 + $0x200] sm:$0xff] }
0x1428   :  { %5908 = vmatpush1.bf16.msra.mxu0 %v6992_v20  ;;  %5951 = vmatpush1.bf16.msra.mxu1 %v6994_v1  ;;  %v7959_v20 = vpack.c.bf16 %v6030_v39, %v6029_v22  ;;  %v7991_v1 = vpack.c.bf16 %v6062_v15, %v6061_v53  ;;  %v6070_v22 = vld [vmem:[%s11375_s17 + $0x208] sm:$0xff]  ;;  %v6101_v39 = vld [vmem:[%s11375_s17 + $0x300] sm:$0xff] }
0x1429   :  { %5909 = vmatprep.subr.bf16.mxu0 %v5793_v60  ;;  %5952 = vmatprep.subr.bf16.mxu1 %v5799_v7  ;;  %v6031_v60 = vld [vmem:[%s11375_s17 + $0xd0] sm:$0xff]  ;;  %v6032_v7 = vld [vmem:[%s11375_s17 + $0xd8] sm:$0xff] }
0x142a   :  { %v7963_v14 = vpack.c.bf16 %v6032_v7, %v6031_v60 }
0x142c   :  { %5910 = vmatpush1.bf16.msra.mxu0 %v5790_v37  ;;  %5953 = vmatpush1.bf16.msra.mxu1 %v5796_v47  ;;  %v6015_v37 = vld [vmem:[%s11375_s17 + $0x50] sm:$0xff]  ;;  %v6016_v47 = vld [vmem:[%s11375_s17 + $0x58] sm:$0xff] }
0x142d   :  { %7944 = vmatprep.subr.bf16.mxu0 %v7943_v29  ;;  %7976 = vmatprep.subr.bf16.mxu1 %v7975_v35  ;;  %v6047_v29 = vld [vmem:[%s11375_s17 + $0x150] sm:$0xff]  ;;  %v6048_v35 = vld [vmem:[%s11375_s17 + $0x158] sm:$0xff]  ;;  %v7965_v9 = vpack.c.bf16 %v6016_v47, %v6015_v37 }
0x142e   :  { %v7997_v4 = vpack.c.bf16 %v6048_v35, %v6047_v29 }
0x142f   :  { %5920 = vmatmul.mubr.bf16.vlgmr.msra.gmra.mrb[72].mxu0 %v10900_v12  ;;  %5963 = vmatmul.mubr.bf16.vlgmr.msra.gmra.mrb[80].mxu1 %v10900_v12  ;;  %v6041_v12 = vld [vmem:[%s11375_s17 + $0x120] sm:$0xff] }
0x1430   :  { %7946 = vmatpush3.bf16.msra.mxu0 %v7945_v58  ;;  %7978 = vmatpush3.bf16.msra.mxu1 %v7977_v57  ;;  %v7985_v5 = vpack.c.bf16 %v6042_v3, %v6041_v12  ;;  %v6017_v58 = vld [vmem:[%s11375_s17 + $0x60] sm:$0xff]  ;;  %v7967_v57 = vpack.c.bf16 %v6034_v25, %v6033_v10  ;;  %v6052_v12 = vld [vmem:[%s11375_s17 + $0x178] sm:$0xff]  ;;  %v6071_v25 = vld [vmem:[%s11375_s17 + $0x210] sm:$0xff] }
0x1431   :  { %7948 = vmatprep.subr.bf16.mxu0 %v7947_v59  ;;  %7980 = vmatprep.subr.bf16.mxu1 %v7979_v56  ;;  %v6049_v59 = vld [vmem:[%s11375_s17 + $0x160] sm:$0xff]  ;;  %v6050_v56 = vld [vmem:[%s11375_s17 + $0x168] sm:$0xff]  ;;  %v7969_v36 = vpack.c.bf16 %v6018_v31, %v6017_v58  ;;  %v6103_v58 = vld [vmem:[%s11375_s17 + $0x310] sm:$0xff] }
0x1432   :  { %v8001_v42 = vpack.c.bf16 %v6050_v56, %v6049_v59  ;;  %v6090_v31 = vld [vmem:[%s11375_s17 + $0x2a8] sm:$0xff]  ;;  %v6121_v59 = vld [vmem:[%s11375_s17 + $0x3a0] sm:$0xff] }
0x1433   :  { %v6122_v56 = vld [vmem:[%s11375_s17 + $0x3a8] sm:$0xff] }
0x1434   :  { %7950 = vmatpush3.bf16.msra.mxu0 %v7949_v54  ;;  %7982 = vmatpush3.bf16.msra.mxu1 %v7981_v11  ;;  %v6068_v54 = vld [vmem:[%s11375_s17 + $0x1f8] sm:$0xff]  ;;  %v6019_v11 = vld [vmem:[%s11375_s17 + $0x70] sm:$0xff] }
0x1435   :  { %7952 = vmatprep.subr.bf16.mxu0 %v7951_v55  ;;  %7984 = vmatprep.subr.bf16.mxu1 %v7983_v6  ;;  %v8003_v26 = vpack.c.bf16 %v6068_v54, %v6067_v52  ;;  %v7973_v55 = vpack.c.bf16 %v6020_v17, %v6019_v11  ;;  %v6051_v6 = vld [vmem:[%s11375_s17 + $0x170] sm:$0xff]  ;;  %v6073_v52 = vld [vmem:[%s11375_s17 + $0x220] sm:$0xff]  ;;  %v8047_v11 = vpack.c.bf16 %v6122_v56, %v6121_v59  ;;  %v6106_v17 = vld [vmem:[%s11375_s17 + $0x328] sm:$0xff] }
0x1436   :  { %v8005_v3 = vpack.c.bf16 %v6052_v12, %v6051_v6  ;;  %v6092_v6 = vld [vmem:[%s11375_s17 + $0x2b8] sm:$0xff]  ;;  %v6123_v12 = vld [vmem:[%s11375_s17 + $0x3b0] sm:$0xff] }
0x1437   :  { %v6131_v59 = vld [vmem:[%s11375_s17 + $0x3f0] sm:$0xff]  ;;  %v6132_v56 = vld [vmem:[%s11375_s17 + $0x3f8] sm:$0xff] }
0x1438   :  { %7954 = vmatpush3.bf16.msra.mxu0 %v7953_v16  ;;  %7986 = vmatpush3.bf16.msra.mxu1 %v7985_v5  ;;  %v6118_v16 = vld [vmem:[%s11375_s17 + $0x388] sm:$0xff] }
0x1439   :  { %7956 = vmatprep.subr.bf16.mxu0 %v7955_v62  ;;  %7988 = vmatprep.subr.bf16.mxu1 %v7987_v46  ;;  %v8039_v5 = vpack.c.bf16 %v6118_v16, %v6117_v33  ;;  %v5974_v62 = vld [vmem:[#allocation18 + $0x8] sm:$0xff]  ;;  %v5976_v46 = vld [vmem:[#allocation18 + $0x18] sm:$0xff] }
0x143a   :  { %v6075_v33 = vld [vmem:[%s11375_s17 + $0x230] sm:$0xff] }
0x143c   :  { %7958 = vmatpush3.bf16.msra.mxu0 %v7957_v32  ;;  %7990 = vmatpush3.bf16.msra.mxu1 %v7989_v41  ;;  %v6102_v32 = vld [vmem:[%s11375_s17 + $0x308] sm:$0xff]  ;;  %v6087_v41 = vld [vmem:[%s11375_s17 + $0x290] sm:$0xff] }
0x143d   :  { %7960 = vmatprep.subr.bf16.mxu0 %v7959_v20  ;;  %7992 = vmatprep.subr.bf16.mxu1 %v7991_v1  ;;  %v5984_v1 = vld [vmem:[#allocation18 + $0x58] sm:$0xff]  ;;  %v8041_v35 = vpack.c.bf16 %v6102_v32, %v6101_v39  ;;  %v8011_v10 = vpack.c.bf16 %v6088_v28, %v6087_v41 }
0x143e   :  { %v6109_v28 = vld [vmem:[%s11375_s17 + $0x340] sm:$0xff] }
0x1440   :  { %7962 = vmatpush3.bf16.msra.mxu0 %v7961_v49  ;;  %7994 = vmatpush3.bf16.msra.mxu1 %v7993_v51  ;;  %v8009_v51 = vpack.c.bf16 %v6070_v22, %v6069_v8  ;;  %v6126_v8 = vld [vmem:[%s11375_s17 + $0x3c8] sm:$0xff] }
0x1441   :  { %7964 = vmatprep.subr.bf16.mxu0 %v7963_v14  ;;  %7996 = vmatprep.subr.bf16.mxu1 %v7995_v50  ;;  %v5983_v14 = vld [vmem:[#allocation18 + $0x50] sm:$0xff] }
0x1444   :  { %7966 = vmatpush3.bf16.msra.mxu0 %v7965_v9  ;;  %7998 = vmatpush3.bf16.msra.mxu1 %v7997_v4  ;;  %v8043_v4 = vpack.c.bf16 %v6120_v13, %v6119_v23  ;;  %v6127_v23 = vld [vmem:[%s11375_s17 + $0x3d0] sm:$0xff]  ;;  %v6128_v13 = vld [vmem:[%s11375_s17 + $0x3d8] sm:$0xff] }
0x1445   :  { %7968 = vmatprep.subr.bf16.mxu0 %v7967_v57  ;;  %8000 = vmatprep.subr.bf16.mxu1 %v7999_v27  ;;  %v6104_v57 = vld [vmem:[%s11375_s17 + $0x318] sm:$0xff]  ;;  %v6089_v27 = vld [vmem:[%s11375_s17 + $0x2a0] sm:$0xff] }
0x1446   :  { %v8045_v40 = vpack.c.bf16 %v6104_v57, %v6103_v58  ;;  %v8015_v54 = vpack.c.bf16 %v6090_v31, %v6089_v27  ;;  %v6113_v58 = vld [vmem:[%s11375_s17 + $0x360] sm:$0xff]  ;;  %v6114_v57 = vld [vmem:[%s11375_s17 + $0x368] sm:$0xff]  ;;  %v6099_v27 = vld [vmem:[%s11375_s17 + $0x2f0] sm:$0xff] }
0x1447   :  { %v6100_v31 = vld [vmem:[%s11375_s17 + $0x2f8] sm:$0xff] }
0x1448   :  { %7970 = vmatpush3.bf16.msra.mxu0 %v7969_v36  ;;  %8002 = vmatpush3.bf16.msra.mxu1 %v8001_v42  ;;  %v8013_v36 = vpack.c.bf16 %v6072_v30, %v6071_v25  ;;  %v6081_v30 = vld [vmem:[%s11375_s17 + $0x260] sm:$0xff] }
0x1449   :  { %7972 = vmatprep.subr.bf16.mxu0 %v7971_v61  ;;  %8004 = vmatprep.subr.bf16.mxu1 %v8003_v26  ;;  %v6074_v61 = vld [vmem:[%s11375_s17 + $0x228] sm:$0xff]  ;;  %v6105_v26 = vld [vmem:[%s11375_s17 + $0x320] sm:$0xff] }
0x144a   :  { %v8017_v45 = vpack.c.bf16 %v6074_v61, %v6073_v52  ;;  %v8049_v38 = vpack.c.bf16 %v6106_v17, %v6105_v26  ;;  %v8067_v52 = vpack.c.bf16 %v6132_v56, %v6131_v59  ;;  %v6084_v61 = vld [vmem:[%s11375_s17 + $0x278] sm:$0xff] }
0x144c   :  { %7974 = vmatpush3.bf16.msra.mxu0 %v7973_v55  ;;  %8006 = vmatpush3.bf16.msra.mxu1 %v8005_v3  ;;  %v6091_v55 = vld [vmem:[%s11375_s17 + $0x2b0] sm:$0xff]  ;;  %v6124_v3 = vld [vmem:[%s11375_s17 + $0x3b8] sm:$0xff] }
0x144d   :  { %8008 = vmatprep.subr.bf16.mxu0 %v8007_v2  ;;  %8040 = vmatprep.subr.bf16.mxu1 %v8039_v5  ;;  %v6076_v2 = vld [vmem:[%s11375_s17 + $0x238] sm:$0xff]  ;;  %v8019_v16 = vpack.c.bf16 %v6092_v6, %v6091_v55  ;;  %v8051_v5 = vpack.c.bf16 %v6124_v3, %v6123_v12  ;;  %v5980_v6 = vld [vmem:[#allocation18 + $0x38] sm:$0xff]  ;;  %v5977_v3 = vld [vmem:[#allocation18 + $0x20] sm:$0xff] }
0x144e   :  { %v8021_v22 = vpack.c.bf16 %v6076_v2, %v6075_v33  ;;  %v5978_v55 = vld [vmem:[#allocation18 + $0x28] sm:$0xff] }
0x14d2   :  { %v5835_v53 = vpop.f32.mrb[68].mxu0  ;;  %v5878_v15 = vpop.f32.mrb[76].mxu1 }
0x14d3   :  { %v5837_v43 = vpop.f32.mrb[69].mxu0  ;;  %v5880_v20 = vpop.f32.mrb[77].mxu1  ;;  %v5989_v37 = vmul.f32 %v5973_v18, %v5835_v53  ;;  %v5991_v47 = vmul.f32 %v5975_v48, %v5878_v15  ;;  %v6107_v18 = vld [vmem:[%s11375_s17 + $0x330] sm:$0xff]  ;;  %v6108_v48 = vld [vmem:[%s11375_s17 + $0x338] sm:$0xff]  ;;  %v6077_v53 = vld [vmem:[%s11375_s17 + $0x240] sm:$0xff] }
0x14d4   :  { %v5990_v60 = vmul.f32 %v5974_v62, %v5837_v43  ;;  %v5992_v7 = vmul.f32 %v5976_v46, %v5880_v20  ;;  %v5839_v21 = vpop.f32.mrb[70].mxu0  ;;  %v5882_v49 = vpop.f32.mrb[78].mxu1  ;;  %v6093_v62 = vld [vmem:[%s11375_s17 + $0x2c0] sm:$0xff]  ;;  %v6094_v46 = vld [vmem:[%s11375_s17 + $0x2c8] sm:$0xff]  ;;  %v8053_v39 = vpack.c.bf16 %v6108_v48, %v6107_v18  ;;  %v6095_v20 = vld [vmem:[%s11375_s17 + $0x2d0] sm:$0xff] }
0x14d5   :  { %v5841_v50 = vpop.f32.mrb[71].mxu0  ;;  %v5884_v29 = vpop.f32.mrb[79].mxu1  ;;  %v5997_v42 = vmul.f32 %v5981_v19, %v5839_v21  ;;  %v5999_v24 = vmul.f32 %v5983_v14, %v5882_v49  ;;  %v6078_v15 = vld [vmem:[%s11375_s17 + $0x248] sm:$0xff]  ;;  %v8023_v32 = vpack.c.bf16 %v6094_v46, %v6093_v62  ;;  %v6079_v21 = vld [vmem:[%s11375_s17 + $0x250] sm:$0xff]  ;;  %v6080_v19 = vld [vmem:[%s11375_s17 + $0x258] sm:$0xff] }
0x14d6   :  { %v5998_v0 = vmul.f32 %v5982_v34, %v5841_v50  ;;  %v6000_v9 = vmul.f32 %v5984_v1, %v5884_v29  ;;  %6197 = vmatprep.mubr.f32.mxu0 %v5990_v60  ;;  %6272 = vmatprep.mubr.f32.mxu1 %v5992_v7  ;;  %v6125_v34 = vld [vmem:[%s11375_s17 + $0x3c0] sm:$0xff]  ;;  %v6110_v43 = vld [vmem:[%s11375_s17 + $0x348] sm:$0xff]  ;;  %v6096_v1 = vld [vmem:[%s11375_s17 + $0x2d8] sm:$0xff]  ;;  %v8025_v60 = vpack.c.bf16 %v6078_v15, %v6077_v53 }
0x14d7   :  { %6198 = vmatmul.mubr.f32.vlgmr.msra.gmra.mrb[76].mxu0 %v5989_v37  ;;  %6273 = vmatmul.mubr.f32.vlgmr.msra.gmra.mrb[84].mxu1 %v5991_v47  ;;  %v8055_v41 = vpack.c.bf16 %v6126_v8, %v6125_v34  ;;  %v8057_v7 = vpack.c.bf16 %v6110_v43, %v6109_v28  ;;  %v8027_v49 = vpack.c.bf16 %v6096_v1, %v6095_v20  ;;  %v6111_v37 = vld [vmem:[%s11375_s17 + $0x350] sm:$0xff]  ;;  %v6112_v47 = vld [vmem:[%s11375_s17 + $0x358] sm:$0xff]  ;;  %v6097_v14 = vld [vmem:[%s11375_s17 + $0x2e0] sm:$0xff] }
0x14d8   :  { %6202 = vmatprep.mubr.f32.mxu0 %v5998_v0  ;;  %6277 = vmatprep.mubr.f32.mxu1 %v6000_v9  ;;  %v6098_v50 = vld [vmem:[%s11375_s17 + $0x2e8] sm:$0xff]  ;;  %v6129_v29 = vld [vmem:[%s11375_s17 + $0x3e0] sm:$0xff]  ;;  %v8061_v25 = vpack.c.bf16 %v6112_v47, %v6111_v37 }
0x14d9   :  { %8010 = vmatpush3.bf16.msra.mxu0 %v8009_v51  ;;  %8042 = vmatpush3.bf16.msra.mxu1 %v8041_v35  ;;  %v8059_v51 = vpack.c.bf16 %v6128_v13, %v6127_v23  ;;  %v6130_v35 = vld [vmem:[%s11375_s17 + $0x3e8] sm:$0xff]  ;;  %v8031_v9 = vpack.c.bf16 %v6098_v50, %v6097_v14  ;;  %v5987_v53 = vld [vmem:[#allocation18 + $0x70] sm:$0xff] }
0x14da   :  { %8012 = vmatprep.subr.bf16.mxu0 %v8011_v10  ;;  %8044 = vmatprep.subr.bf16.mxu1 %v8043_v4  ;;  %v8029_v10 = vpack.c.bf16 %v6080_v19, %v6079_v21  ;;  %v6082_v0 = vld [vmem:[%s11375_s17 + $0x268] sm:$0xff]  ;;  %v8063_v4 = vpack.c.bf16 %v6130_v35, %v6129_v29  ;;  %v8334_v43 = vld [vmem:[%s11377_s19] sm:$0xff]  }
0x14db   :  { %6203 = vmatmul.mubr.f32.gmra.mrb[78].mxu0 %v5997_v42  ;;  %6278 = vmatmul.mubr.f32.gmra.mrb[86].mxu1 %v5999_v24  ;;  %v8065_v42 = vpack.c.bf16 %v6114_v57, %v6113_v58  ;;  %v6083_v24 = vld [vmem:[%s11375_s17 + $0x270] sm:$0xff]  ;;  %v8335_v20 = vld [vmem:[%s11377_s19 + $0x8] sm:$0xff]  }
0x14dc   :  { %v8037_v26 = vpack.c.bf16 %v6084_v61, %v6083_v24  ;;  %v8336_v61 = vld [vmem:[%s11377_s19 + $0x10] sm:$0xff]  }
0x14dd   :  { %8014 = vmatpush3.bf16.msra.mxu0 %v8013_v36  ;;  %8046 = vmatpush3.bf16.msra.mxu1 %v8045_v40  ;;  %v8033_v36 = vpack.c.bf16 %v6082_v0, %v6081_v30  ;;  %v8035_v40 = vpack.c.bf16 %v6100_v31, %v6099_v27 }
0x14de   :  { %8016 = vmatprep.subr.bf16.mxu0 %v8015_v54  ;;  %8048 = vmatprep.subr.bf16.mxu1 %v8047_v11  ;;  %v6115_v54 = vld [vmem:[%s11375_s17 + $0x370] sm:$0xff]  ;;  %v6116_v11 = vld [vmem:[%s11375_s17 + $0x378] sm:$0xff] }
0x14df   :  { %v8069_v17 = vpack.c.bf16 %v6116_v11, %v6115_v54  ;;  %v8337_v54 = vld [vmem:[%s11377_s19 + $0x18] sm:$0xff]   ;;  %v8338_v11 = vld [vmem:[%s11379_s21] sm:$0xff]  }
0x14e1   :  { %8018 = vmatpush3.bf16.msra.mxu0 %v8017_v45  ;;  %8050 = vmatpush3.bf16.msra.mxu1 %v8049_v38  ;;  %v5979_v38 = vld [vmem:[#allocation18 + $0x30] sm:$0xff] }
0x14e2   :  { %8020 = vmatprep.subr.bf16.mxu0 %v8019_v16  ;;  %8052 = vmatprep.subr.bf16.mxu1 %v8051_v5  ;;  %v5986_v16 = vld [vmem:[#allocation18 + $0x68] sm:$0xff]  ;;  %v5988_v5 = vld [vmem:[#allocation18 + $0x78] sm:$0xff] }
0x14e5   :  { %8022 = vmatpush3.bf16.msra.mxu0 %v8021_v22  ;;  %8054 = vmatpush3.bf16.msra.mxu1 %v8053_v39  ;;  %v5985_v39 = vld [vmem:[#allocation18 + $0x60] sm:$0xff] }
0x14e6   :  { %8024 = vmatprep.subr.bf16.mxu0 %v8023_v32  ;;  %8056 = vmatprep.subr.bf16.mxu1 %v8055_v41 }
0x14e9   :  { %8026 = vmatpush3.bf16.msra.mxu0 %v8025_v60  ;;  %8058 = vmatpush3.bf16.msra.mxu1 %v8057_v7 }
0x14ea   :  { %8028 = vmatprep.subr.bf16.mxu0 %v8027_v49  ;;  %8060 = vmatprep.subr.bf16.mxu1 %v8059_v51 }
0x14ed   :  { %8030 = vmatpush3.bf16.msra.mxu0 %v8029_v10  ;;  %8062 = vmatpush3.bf16.msra.mxu1 %v8061_v25 }
0x14ee   :  { %8032 = vmatprep.subr.bf16.mxu0 %v8031_v9  ;;  %8064 = vmatprep.subr.bf16.mxu1 %v8063_v4 }
0x14f1   :  { %8034 = vmatpush3.bf16.msra.mxu0 %v8033_v36  ;;  %8066 = vmatpush3.bf16.msra.mxu1 %v8065_v42 }
0x14f2   :  { %8036 = vmatprep.subr.bf16.mxu0 %v8035_v40  ;;  %8068 = vmatprep.subr.bf16.mxu1 %v8067_v52  ;;  %v8553_v52 = vmov 1.0  }
0x14f5   :  { %8038 = vmatpush3.bf16.msra.mxu0 %v8037_v26  ;;  %8070 = vmatpush3.bf16.msra.mxu1 %v8069_v17  ;;  %v8339_v26 = vld [vmem:[%s11379_s21 + $0x8] sm:$0xff]   ;;  %v6433_v17 = vld [vmem:[%s11376_s18] sm:$0x1] }
0x14f6   :  { %8071 = vmatprep.subr.bf16.mxu0 %v11470_v44  ;;  %7495 = vmatprep.subr.bf16.mxu1 %v11469_v63 }
0x1502   :  { %v5921_v12 = vpop.f32.mrb[72].mxu0  ;;  %v5964_v45 = vpop.f32.mrb[80].mxu1 }
0x1503   :  { %v5923_v33 = vpop.f32.mrb[73].mxu0  ;;  %v5966_v2 = vpop.f32.mrb[81].mxu1  ;;  %v5993_v34 = vmul.f32 %v5977_v3, %v5921_v12  ;;  %v5995_v8 = vmul.f32 %v5979_v38, %v5964_v45 }
0x1504   :  { %v5994_v18 = vmul.f32 %v5978_v55, %v5923_v33  ;;  %v5996_v48 = vmul.f32 %v5980_v6, %v5966_v2  ;;  %v5925_v62 = vpop.f32.mrb[74].mxu0  ;;  %v5968_v46 = vpop.f32.mrb[82].mxu1  ;;  %v8340_v33 = vld [vmem:[%s11379_s21 + $0x10] sm:$0xff]   ;;  %v8341_v2 = vld [vmem:[%s11379_s21 + $0x18] sm:$0xff]   ;;  %s6669_s21 = ssub.f32 0.0, %s11536_s3 }
0x1505   :  { %v5927_v22 = vpop.f32.mrb[75].mxu0  ;;  %v5970_v44 = vpop.f32.mrb[83].mxu1  ;;  %v6001_v41 = vmul.f32 %v5985_v39, %v5925_v62  ;;  %v6003_v28 = vmul.f32 %v5987_v53, %v5968_v46 }
0x1506   :  { %v6002_v15 = vmul.f32 %v5986_v16, %v5927_v22  ;;  %v6004_v32 = vmul.f32 %v5988_v5, %v5970_v44  ;;  %6347 = vmatprep.mubr.f32.mxu0 %v5994_v18  ;;  %6422 = vmatprep.mubr.f32.mxu1 %v5996_v48  ;;  %v6519_v16 = vld [vmem:[%s11378_s20] sm:$0x1]  ;;  %v6670_v39 = vstv %s6669_s21 }
0x1507   :  { %6348 = vmatmul.mubr.f32.vlgmr.msra.gmra.mrb[80].mxu0 %v5993_v34  ;;  %6423 = vmatmul.mubr.f32.vlgmr.msra.gmra.mrb[88].mxu1 %v5995_v8 }
0x1508   :  { %6352 = vmatprep.mubr.f32.mxu0 %v6002_v15  ;;  %6427 = vmatprep.mubr.f32.mxu1 %v6004_v32 }
0x1509   :  { %7496 = vmatpush3.bf16.msra.mxu1 %v8334_v43 }
0x150a   :  { %7497 = vmatprep.subr.bf16.mxu1 %v11469_v63 }
0x150b   :  { %6353 = vmatmul.mubr.f32.gmra.mrb[82].mxu0 %v6001_v41  ;;  %6428 = vmatmul.mubr.f32.gmra.mrb[90].mxu1 %v6003_v28 }
0x150c   :  { %7492 = vmatprep.mubr.msk.f32.mxu0 %vm8552_vm11, %v11469_v63  ;;  %7503 = vmatprep.mubr.msk.bf16.mxu1 %vm8552_vm11, %v11469_v63 }
0x150d   :  { %7498 = vmatpush3.bf16.msra.mxu1 %v8335_v20 }
0x150e   :  { %7499 = vmatprep.subr.bf16.mxu1 %v11469_v63 }
0x1511   :  { %7500 = vmatpush3.bf16.msra.mxu1 %v8336_v61 }
0x1512   :  { %7501 = vmatprep.subr.bf16.mxu1 %v11469_v63 }
0x1515   :  { %7502 = vmatpush3.bf16.msra.mxu1 %v8337_v54 }
0x15aa   :  { %v7355_v1 = vpop.f32.mrb[76].mxu0  ;;  %v7393_v23 = vpop.f32.mrb[84].mxu1 }
0x15ab   :  { %v7356_v13 = vpop.f32.mrb[77].mxu0  ;;  %v7394_v60 = vpop.f32.mrb[85].mxu1 }
0x15ac   :  { %v7357_v7 = vadd.f32 %v7356_v13, %v7355_v1  ;;  %v7395_v21 = vadd.f32 %v7394_v60, %v7393_v23  ;;  %v6677_v23 = vld [vmem:[%s11381_s23] sm:$0x1] }
0x15ae   :  { %v6275_v19 = vadd.f32 %v7395_v21, %v7357_v7  ;;  %v7358_v49 = vpop.f32.mrb[78].mxu0  ;;  %v7396_v51 = vpop.f32.mrb[86].mxu1 }
0x15af   :  { %v7359_v37 = vpop.f32.mrb[79].mxu0  ;;  %v7397_v47 = vpop.f32.mrb[87].mxu1 }
0x15b0   :  { %v7360_v14 = vadd.f32 %v7359_v37, %v7358_v49  ;;  %v7398_v50 = vadd.f32 %v7397_v47, %v7396_v51 }
0x15b2   :  { %v6280_v29 = vadd.f32 %v7398_v50, %v7360_v14 }
0x15da   :  { %v7431_v35 = vpop.f32.mrb[80].mxu0  ;;  %v7469_v10 = vpop.f32.mrb[88].mxu1 }
0x15db   :  { %v7432_v25 = vpop.f32.mrb[81].mxu0  ;;  %v7470_v30 = vpop.f32.mrb[89].mxu1 }
0x15dc   :  { %v7433_v0 = vadd.f32 %v7432_v25, %v7431_v35  ;;  %v7471_v9 = vadd.f32 %v7470_v30, %v7469_v10 }
0x15de   :  { %v6350_v4 = vadd.f32 %v7433_v0, %v6275_v19  ;;  %v7434_v58 = vpop.f32.mrb[82].mxu0  ;;  %v7472_v57 = vpop.f32.mrb[90].mxu1 }
0x15df   :  { %v7435_v27 = vpop.f32.mrb[83].mxu0  ;;  %v7473_v31 = vpop.f32.mrb[91].mxu1 }
0x15e0   :  { %v6425_v59 = vadd.f32 %v7471_v9, %v6350_v4  ;;  %v7436_v56 = vadd.f32 %v7435_v27, %v7434_v58  ;;  %v7474_v36 = vadd.f32 %v7473_v31, %v7472_v57 }
0x15e2   :  { %v6355_v42 = vadd.f32 %v7436_v56, %v6280_v29 }
0x15e4   :  { %v6430_v24 = vadd.f32 %v7474_v36, %v6355_v42 }
0x15e6   :  { %v8072_v40 = vpack.c.bf16 %v6430_v24, %v6425_v59 }
0x15e8   :  { %8073 = vmatpush3.bf16.msra.mxu0 %v8072_v40 }
0x15e9   :  { %7507 = vmatprep.subr.bf16.mxu0 %v11469_v63 }
0x15eb   :  { %7493 = vmatmul.mubr.msk.f32.vlgmr.msra.gmra.mrb[84].mxu0 %vm754_vm1, %v8553_v52 }
0x15ec   :  { %7515 = vmatprep.mubr.msk.bf16.mxu0 %vm8552_vm11, %v11469_v63  ;;  %7508 = vmatpush3.bf16.msra.mxu0 %v8338_v11 }
0x15ed   :  { %7509 = vmatprep.subr.bf16.mxu0 %v11469_v63 }
0x15f0   :  { %7510 = vmatpush3.bf16.msra.mxu0 %v8339_v26 }
0x15f1   :  { %7511 = vmatprep.subr.bf16.mxu0 %v11469_v63 }
0x15f4   :  { %7512 = vmatpush3.bf16.msra.mxu0 %v8340_v33 }
0x15f5   :  { %7513 = vmatprep.subr.bf16.mxu0 %v11469_v63  ;;  %v6600_v63 = vld [vmem:[%s11380_s22] sm:$0x1] }
0x15f8   :  { %7514 = vmatpush3.bf16.msra.mxu0 %v8341_v2 }
0x16be   :  { %v6503_v55 = vpop.f32.mrb[84].mxu0 }
0x16bf   :  { %v6504_v6 = vadd.f32 %v6503_v55, %v6433_v17  ;;  %v7494_v12 = vpop.f32.mrb[85].mxu0 }
0x16c1   :  { %vm6507_vm1 = vcmp.gt.f32.partialorder %v6504_v6, 0.0  ;;  %v6508_v3 = vmul.f32 0.01, %v6504_v6 }
0x16c3   :  { %v6509_v45 = vsel %vm6507_vm1, %v6504_v6, %v6508_v3 }
0x16c4   :  { %v6510_v38 = vpack.c.bf16 %v6509_v45, %v6509_v45 }
0x16c6   :  { %7504 = vmatmul.mubr.msk.bf16.vlgmr.msra.gmra.mrb[92].mxu1 %vm6544_vm13, %v6510_v38 }
0x1799   :  { %v6582_v5 = vpop.f32.mrb[92].mxu1 }
0x179a   :  { %v6583_v18 = vadd.f32 %v6582_v5, %v6519_v16  ;;  %v7505_v48 = vpop.f32.mrb[93].mxu1 }
0x179b   :  { %v6585_v62 = vpop.f32.mrb[94].mxu1 }
0x179c   :  { %vm6588_vm14 = vcmp.gt.f32.partialorder %v6583_v18, 0.0  ;;  %v6589_v46 = vmul.f32 0.01, %v6583_v18  ;;  %v7506_v34 = vpop.f32.mrb[95].mxu1 }
0x179e   :  { %v6590_v8 = vsel %vm6588_vm14, %v6583_v18, %v6589_v46 }
0x179f   :  { %v6591_v22 = vpack.c.bf16 %v6590_v8, %v6590_v8 }
0x17a1   :  { %7516 = vmatmul.mubr.msk.bf16.vlgmr.msra.gmra.mrb[88].mxu0 %vm6544_vm13, %v6591_v22 }
0x1874   :  { %v6662_v44 = vpop.f32.mrb[88].mxu0 }
0x1875   :  { %v6663_v53 = vadd.f32 %v6662_v44, %v6600_v63  ;;  %v7517_v15 = vpop.f32.mrb[89].mxu0 }
0x1876   :  { %v6665_v32 = vpop.f32.mrb[90].mxu0 }
0x1877   :  { %v6671_v41 = vmul.f32 %v6670_v39, %v6663_v53  ;;  %v7518_v28 = vpop.f32.mrb[91].mxu0 }
0x1879   :  { %v6672_v43 = vmul.f32 1.442695, %v6671_v41 }
0x187b   :  { %8354 = vpow2.f32 %v6672_v43 }
0x1885   :  { %v8355_v20 = vpop.eup %8354 }
0x1886   :  { %v6674_v1 = vadd.f32 1.0, %v8355_v20 }
0x1888   :  { %8356 = vrcp.f32 %v6674_v1 }
0x1892   :  { %v8357_v13 = vpop.eup %8356 }
0x1893   :  { %v6678_v60 = vmul.f32 %v8357_v13, %v6677_v23 }
0x1895   :  { %6680 = vst.msk [vmem:[%s11382_s24] sm:$0x1] %vm6679_vm15, %v6678_v60 }
0x1896   :  { %6685 = vsyncpa [#allocation9], 1 }
0x1897   :  { %6686 = vsyncpa [#allocation11], 1 }
0x1898   :  { %6687 = vsyncpa [#allocation14], 1 }
0x1899   :  { %6688 = vsyncpa [#allocation17], 1 }

</bundles_post_ra>
